<compile_context>
chip_gen: v7x
topology: tpu7x:2x2x1
jax: 0.10.0
libtpu: 0.0.40
codegen_flags: <defaults>
</compile_context>

<pallas_src>
import functools

import numpy as np
import jax
import jax.numpy as jnp
from jax.experimental import pallas as pl
from jax.experimental.pallas import tpu as pltpu


# ---------------------------------------------------------------------------
# Triplet index set (static, baked into the kernel at trace time).
# ---------------------------------------------------------------------------
def triplet_index(M: int, rho: float):
    half = (M - 1) // 2
    idx = []
    for m in range(-half, half + 1):
        for n in range(-half, half + 1):
            if m * n == 0:
                continue
            if abs(m * n) > rho * half:
                continue
            if n < m:                       # 'reduce-1' symmetry
                continue
            if abs(m + n) > half:           # keep tap p+m+n inside the window
                continue
            idx.append((m, n))
    return idx


# ---------------------------------------------------------------------------
# Pallas kernel: one grid step == one (8, 128) tile of batch elements.
# ---------------------------------------------------------------------------
def _eq_pbc_kernel(cr_ref, ci_ref, p_ref, xr_ref, xi_ref, outr_ref, outi_ref,
                   *, M, index):
    p = M // 2

    # xr_ref / xi_ref blocks have shape (M*2, TBS, LANE); tap t, polarization j
    # lives at leading index 2*t + j.  Every load is an aligned (8,128) tile.
    def rx(t, j):
        return xr_ref[2 * t + j]

    def ix(t, j):
        return xi_ref[2 * t + j]

    zero = jnp.zeros(p_ref.shape, jnp.float32)      # (TBS, LANE)
    acc_r = [zero, zero]
    acc_i = [zero, zero]

    # ---- FWM triplet features + per-polarization complex linear ------------
    for t_idx, (m, n) in enumerate(index):
        ta, tb, tm = p + n, p + m + n, p + m
        # A = sum_j E_j(ta) * conj(E_j(tb))  -- shared across both output pols
        a_r = (rx(ta, 0) * rx(tb, 0) + ix(ta, 0) * ix(tb, 0)
               + rx(ta, 1) * rx(tb, 1) + ix(ta, 1) * ix(tb, 1))
        a_i = (ix(ta, 0) * rx(tb, 0) - rx(ta, 0) * ix(tb, 0)
               + ix(ta, 1) * rx(tb, 1) - rx(ta, 1) * ix(tb, 1))
        for i in range(2):
            em_r, em_i = rx(tm, i), ix(tm, i)
            f_r = a_r * em_r - a_i * em_i
            f_i = a_r * em_i + a_i * em_r
            wr = cr_ref[i, t_idx]                    # SMEM scalar
            wi = ci_ref[i, t_idx]
            acc_r[i] = acc_r[i] + (wr * f_r - wi * f_i)
            acc_i[i] = acc_i[i] + (wr * f_i + wi * f_r)

    # ---- add center tap, scale nonlinear term by P --------------------------
    Pv = p_ref[...]                                  # (TBS, LANE)
    for i in range(2):
        outr_ref[i] = rx(p, i) + Pv * acc_r[i]
        outi_ref[i] = ix(p, i) + Pv * acc_i[i]


# ---------------------------------------------------------------------------
# Wrapper (layout, padding, pallas_call).
# ---------------------------------------------------------------------------
def eq_pbc(x, task_info, params, *, M, rho=1.0):
    batch, Mx, Nmodes = x.shape
    assert Mx == M, "second axis of x must equal M"
    assert Nmodes == 2, "this kernel implements the Nmodes=2 path"
    index = tuple(triplet_index(M, rho))
    hdim = len(index)
    assert params["cr"].shape == (Nmodes, hdim)
    assert params["ci"].shape == (Nmodes, hdim)

    TBS, LANE = 8, 128                    # sublane x lane tile of batch
    tile = TBS * LANE
    Bp = ((batch + tile - 1) // tile) * tile
    Bs = Bp // LANE
    pad = Bp - batch

    # get_power: P = 10**(P_dBm/10) / Nmodes    (per batch element)
    P = (10.0 ** (task_info[:, 0] / 10.0) / Nmodes).astype(jnp.float32)

    # [batch, M, 2] complex -> real/imag planes [M*2, batch], batch last (lanes)
    xt = jnp.transpose(x, (1, 2, 0))                 # [M, 2, batch] complex
    xr = jnp.real(xt).astype(jnp.float32).reshape(M * Nmodes, batch)
    xi = jnp.imag(xt).astype(jnp.float32).reshape(M * Nmodes, batch)
    if pad:
        xr = jnp.pad(xr, ((0, 0), (0, pad)))
        xi = jnp.pad(xi, ((0, 0), (0, pad)))
        P = jnp.pad(P, (0, pad))
    xr = xr.reshape(M * Nmodes, Bs, LANE)
    xi = xi.reshape(M * Nmodes, Bs, LANE)
    Pm = P.reshape(Bs, LANE)

    kernel = functools.partial(_eq_pbc_kernel, M=M, index=index)
    smem = pl.BlockSpec(memory_space=pltpu.MemorySpace.SMEM)
    x_spec = pl.BlockSpec((M * Nmodes, TBS, LANE), lambda g: (0, g, 0))
    p_spec = pl.BlockSpec((TBS, LANE), lambda g: (g, 0))
    o_spec = pl.BlockSpec((Nmodes, TBS, LANE), lambda g: (0, g, 0))

    out_r, out_i = pl.pallas_call(
        kernel,
        grid=(Bs // TBS,),
        in_specs=[smem, smem, p_spec, x_spec, x_spec],
        out_specs=[o_spec, o_spec],
        out_shape=[jax.ShapeDtypeStruct((Nmodes, Bs, LANE), jnp.float32),
                   jax.ShapeDtypeStruct((Nmodes, Bs, LANE), jnp.float32)],
        compiler_params=pltpu.CompilerParams(
            dimension_semantics=("parallel",)),
    )(params["cr"], params["ci"], Pm, xr, xi)

    out = (out_r + 1j * out_i).reshape(Nmodes, Bp)[:, :batch]   # [2, batch]
    return jnp.transpose(out)                                   # [batch, 2]


# ---------------------------------------------------------------------------
# Pure-JAX reference (mirrors the PyTorch forward).
# ---------------------------------------------------------------------------
def reference(x, task_info, params, *, M, rho=1.0):
    batch, _, Nmodes = x.shape
    p = M // 2
    index = triplet_index(M, rho)

    P = 10.0 ** (task_info[:, 0] / 10.0) / Nmodes                # [batch]
    W = params["cr"] + 1j * params["ci"]                         # [2, hdim]
    E = x.astype(jnp.complex64)

    feats = []
    for (m, n) in index:
        A = E[:, p + n, :] * jnp.conj(E[:, p + m + n, :])        # [batch, 2]
        A = A + jnp.roll(A, 1, axis=-1)                          # sum over pols
        feats.append(A * E[:, p + m, :])
    F = jnp.stack(feats, axis=-1)                                # [batch, 2, hdim]
    Eo = jnp.stack([jnp.sum(F[:, i, :] * W[i], axis=-1) for i in range(Nmodes)],
                   axis=-1)                                      # [batch, 2]
    return E[:, p, :] + Eo * P[:, None]


if __name__ == "__main__":
    batch, M, Nmodes, rho = 1000, 11, 2, 1.0
    index = triplet_index(M, rho)
    hdim = len(index)

    key = jax.random.PRNGKey(0)
    k1, k2, k3, k4, k5 = jax.random.split(key, 5)

    x = (jax.random.normal(k1, (batch, M, Nmodes), jnp.float32)
         + 1j * jax.random.normal(k2, (batch, M, Nmodes), jnp.float32)
         ).astype(jnp.complex64)
    # task_info = [P_dBm, Fi, Fs, Nch]
    p_dbm = jax.random.uniform(k3, (batch,), jnp.float32, -2.0, 2.0)
    task_info = jnp.stack([p_dbm,
                           jnp.zeros((batch,), jnp.float32),
                           jnp.full((batch,), 80e9, jnp.float32),
                           jnp.ones((batch,), jnp.float32)], axis=-1)

    # ComplexLinear weights per polarization (module inits to zero, which would
    # make the output a trivial center-tap copy; use small non-zero values).
    params = dict(
        cr=0.05 * jax.random.normal(k4, (Nmodes, hdim), jnp.float32),
        ci=0.05 * jax.random.normal(k5, (Nmodes, hdim), jnp.float32),
    )

    out = eq_pbc(x, task_info, params, M=M, rho=rho)
    out = jax.block_until_ready(out)

    ref = reference(x, task_info, params, M=M, rho=rho)
    np.testing.assert_allclose(np.asarray(out), np.asarray(ref),
                               rtol=2e-3, atol=2e-3)
    print("KERNEL_OK")
</pallas_src>

<mosaic_0001>
module attributes {stable_mosaic.version = 11 : i64} {
  func.func @_eq_pbc_kernel(%arg0: i32, %arg1: memref<2x20xf32, #tpu.memory_space<smem>>, %arg2: memref<2x20xf32, #tpu.memory_space<smem>>, %arg3: memref<8x128xf32, #tpu.memory_space<vmem>>, %arg4: memref<22x8x128xf32, #tpu.memory_space<vmem>>, %arg5: memref<22x8x128xf32, #tpu.memory_space<vmem>>, %arg6: memref<2x8x128xf32, #tpu.memory_space<vmem>>, %arg7: memref<2x8x128xf32, #tpu.memory_space<vmem>>) attributes {dimension_semantics = [#tpu.dimension_semantics<parallel>], iteration_bounds = array<i64: 1>, scalar_prefetch = 0 : i64, scratch_operands = 0 : i64, tpu.core_type = #tpu.core_type<tc>, window_params = [{transform_indices = @transform_0, window_bounds = array<i64: 2, 20>}, {transform_indices = @transform_1, window_bounds = array<i64: 2, 20>}, {transform_indices = @transform_2, window_bounds = array<i64: 8, 128>}, {transform_indices = @transform_3, window_bounds = array<i64: 22, 8, 128>}, {transform_indices = @transform_4, window_bounds = array<i64: 22, 8, 128>}, {transform_indices = @transform_5, window_bounds = array<i64: 2, 8, 128>}, {transform_indices = @transform_6, window_bounds = array<i64: 2, 8, 128>}]} {
    %cst = arith.constant 0.000000e+00 : f32
    %0 = vector.broadcast %cst : f32 to vector<8x128xf32>
    %c12 = arith.constant 12 : index
    %c0 = arith.constant 0 : index
    %c0_0 = arith.constant 0 : index
    %1 = vector.load %arg4[%c12, %c0, %c0_0] : memref<22x8x128xf32, #tpu.memory_space<vmem>>, vector<1x8x128xf32>
    %2 = vector.shape_cast %1 : vector<1x8x128xf32> to vector<8x128xf32>
    %c2 = arith.constant 2 : index
    %c0_1 = arith.constant 0 : index
    %c0_2 = arith.constant 0 : index
    %3 = vector.load %arg4[%c2, %c0_1, %c0_2] : memref<22x8x128xf32, #tpu.memory_space<vmem>>, vector<1x8x128xf32>
    %4 = vector.shape_cast %3 : vector<1x8x128xf32> to vector<8x128xf32>
    %5 = arith.mulf %2, %4 : vector<8x128xf32>
    %c12_3 = arith.constant 12 : index
    %c0_4 = arith.constant 0 : index
    %c0_5 = arith.constant 0 : index
    %6 = vector.load %arg5[%c12_3, %c0_4, %c0_5] : memref<22x8x128xf32, #tpu.memory_space<vmem>>, vector<1x8x128xf32>
    %7 = vector.shape_cast %6 : vector<1x8x128xf32> to vector<8x128xf32>
    %c2_6 = arith.constant 2 : index
    %c0_7 = arith.constant 0 : index
    %c0_8 = arith.constant 0 : index
    %8 = vector.load %arg5[%c2_6, %c0_7, %c0_8] : memref<22x8x128xf32, #tpu.memory_space<vmem>>, vector<1x8x128xf32>
    %9 = vector.shape_cast %8 : vector<1x8x128xf32> to vector<8x128xf32>
    %10 = arith.mulf %7, %9 : vector<8x128xf32>
    %11 = arith.addf %5, %10 : vector<8x128xf32>
    %c13 = arith.constant 13 : index
    %c0_9 = arith.constant 0 : index
    %c0_10 = arith.constant 0 : index
    %12 = vector.load %arg4[%c13, %c0_9, %c0_10] : memref<22x8x128xf32, #tpu.memory_space<vmem>>, vector<1x8x128xf32>
    %13 = vector.shape_cast %12 : vector<1x8x128xf32> to vector<8x128xf32>
    %c3 = arith.constant 3 : index
    %c0_11 = arith.constant 0 : index
    %c0_12 = arith.constant 0 : index
    %14 = vector.load %arg4[%c3, %c0_11, %c0_12] : memref<22x8x128xf32, #tpu.memory_space<vmem>>, vector<1x8x128xf32>
    %15 = vector.shape_cast %14 : vector<1x8x128xf32> to vector<8x128xf32>
    %16 = arith.mulf %13, %15 : vector<8x128xf32>
    %17 = arith.addf %11, %16 : vector<8x128xf32>
    %c13_13 = arith.constant 13 : index
    %c0_14 = arith.constant 0 : index
    %c0_15 = arith.constant 0 : index
    %18 = vector.load %arg5[%c13_13, %c0_14, %c0_15] : memref<22x8x128xf32, #tpu.memory_space<vmem>>, vector<1x8x128xf32>
    %19 = vector.shape_cast %18 : vector<1x8x128xf32> to vector<8x128xf32>
    %c3_16 = arith.constant 3 : index
    %c0_17 = arith.constant 0 : index
    %c0_18 = arith.constant 0 : index
    %20 = vector.load %arg5[%c3_16, %c0_17, %c0_18] : memref<22x8x128xf32, #tpu.memory_space<vmem>>, vector<1x8x128xf32>
    %21 = vector.shape_cast %20 : vector<1x8x128xf32> to vector<8x128xf32>
    %22 = arith.mulf %19, %21 : vector<8x128xf32>
    %23 = arith.addf %17, %22 : vector<8x128xf32>
    %c12_19 = arith.constant 12 : index
    %c0_20 = arith.constant 0 : index
    %c0_21 = arith.constant 0 : index
    %24 = vector.load %arg5[%c12_19, %c0_20, %c0_21] : memref<22x8x128xf32, #tpu.memory_space<vmem>>, vector<1x8x128xf32>
    %25 = vector.shape_cast %24 : vector<1x8x128xf32> to vector<8x128xf32>
    %c2_22 = arith.constant 2 : index
    %c0_23 = arith.constant 0 : index
    %c0_24 = arith.constant 0 : index
    %26 = vector.load %arg4[%c2_22, %c0_23, %c0_24] : memref<22x8x128xf32, #tpu.memory_space<vmem>>, vector<1x8x128xf32>
    %27 = vector.shape_cast %26 : vector<1x8x128xf32> to vector<8x128xf32>
    %28 = arith.mulf %25, %27 : vector<8x128xf32>
    %c12_25 = arith.constant 12 : index
    %c0_26 = arith.constant 0 : index
    %c0_27 = arith.constant 0 : index
    %29 = vector.load %arg4[%c12_25, %c0_26, %c0_27] : memref<22x8x128xf32, #tpu.memory_space<vmem>>, vector<1x8x128xf32>
    %30 = vector.shape_cast %29 : vector<1x8x128xf32> to vector<8x128xf32>
    %c2_28 = arith.constant 2 : index
    %c0_29 = arith.constant 0 : index
    %c0_30 = arith.constant 0 : index
    %31 = vector.load %arg5[%c2_28, %c0_29, %c0_30] : memref<22x8x128xf32, #tpu.memory_space<vmem>>, vector<1x8x128xf32>
    %32 = vector.shape_cast %31 : vector<1x8x128xf32> to vector<8x128xf32>
    %33 = arith.mulf %30, %32 : vector<8x128xf32>
    %34 = arith.subf %28, %33 : vector<8x128xf32>
    %c13_31 = arith.constant 13 : index
    %c0_32 = arith.constant 0 : index
    %c0_33 = arith.constant 0 : index
    %35 = vector.load %arg5[%c13_31, %c0_32, %c0_33] : memref<22x8x128xf32, #tpu.memory_space<vmem>>, vector<1x8x128xf32>
    %36 = vector.shape_cast %35 : vector<1x8x128xf32> to vector<8x128xf32>
    %c3_34 = arith.constant 3 : index
    %c0_35 = arith.constant 0 : index
    %c0_36 = arith.constant 0 : index
    %37 = vector.load %arg4[%c3_34, %c0_35, %c0_36] : memref<22x8x128xf32, #tpu.memory_space<vmem>>, vector<1x8x128xf32>
    %38 = vector.shape_cast %37 : vector<1x8x128xf32> to vector<8x128xf32>
    %39 = arith.mulf %36, %38 : vector<8x128xf32>
    %40 = arith.addf %34, %39 : vector<8x128xf32>
    %c13_37 = arith.constant 13 : index
    %c0_38 = arith.constant 0 : index
    %c0_39 = arith.constant 0 : index
    %41 = vector.load %arg4[%c13_37, %c0_38, %c0_39] : memref<22x8x128xf32, #tpu.memory_space<vmem>>, vector<1x8x128xf32>
    %42 = vector.shape_cast %41 : vector<1x8x128xf32> to vector<8x128xf32>
    %c3_40 = arith.constant 3 : index
    %c0_41 = arith.constant 0 : index
    %c0_42 = arith.constant 0 : index
    %43 = vector.load %arg5[%c3_40, %c0_41, %c0_42] : memref<22x8x128xf32, #tpu.memory_space<vmem>>, vector<1x8x128xf32>
    %44 = vector.shape_cast %43 : vector<1x8x128xf32> to vector<8x128xf32>
    %45 = arith.mulf %42, %44 : vector<8x128xf32>
    %46 = arith.subf %40, %45 : vector<8x128xf32>
    %c0_43 = arith.constant 0 : index
    %c0_44 = arith.constant 0 : index
    %c0_45 = arith.constant 0 : index
    %47 = vector.load %arg4[%c0_43, %c0_44, %c0_45] : memref<22x8x128xf32, #tpu.memory_space<vmem>>, vector<1x8x128xf32>
    %48 = vector.shape_cast %47 : vector<1x8x128xf32> to vector<8x128xf32>
    %c0_46 = arith.constant 0 : index
    %c0_47 = arith.constant 0 : index
    %c0_48 = arith.constant 0 : index
    %49 = vector.load %arg5[%c0_46, %c0_47, %c0_48] : memref<22x8x128xf32, #tpu.memory_space<vmem>>, vector<1x8x128xf32>
    %50 = vector.shape_cast %49 : vector<1x8x128xf32> to vector<8x128xf32>
    %51 = arith.mulf %23, %48 : vector<8x128xf32>
    %52 = arith.mulf %46, %50 : vector<8x128xf32>
    %53 = arith.subf %51, %52 : vector<8x128xf32>
    %54 = arith.mulf %23, %50 : vector<8x128xf32>
    %55 = arith.mulf %46, %48 : vector<8x128xf32>
    %56 = arith.addf %54, %55 : vector<8x128xf32>
    %c0_49 = arith.constant 0 : index
    %c0_50 = arith.constant 0 : index
    %57 = memref.load %arg1[%c0_49, %c0_50] : memref<2x20xf32, #tpu.memory_space<smem>>
    %c0_51 = arith.constant 0 : index
    %c0_52 = arith.constant 0 : index
    %58 = memref.load %arg2[%c0_51, %c0_52] : memref<2x20xf32, #tpu.memory_space<smem>>
    %59 = vector.broadcast %57 : f32 to vector<8x128xf32>
    %60 = arith.mulf %59, %53 : vector<8x128xf32>
    %61 = vector.broadcast %58 : f32 to vector<8x128xf32>
    %62 = arith.mulf %61, %56 : vector<8x128xf32>
    %63 = arith.subf %60, %62 : vector<8x128xf32>
    %64 = arith.addf %0, %63 : vector<8x128xf32>
    %65 = vector.broadcast %57 : f32 to vector<8x128xf32>
    %66 = arith.mulf %65, %56 : vector<8x128xf32>
    %67 = vector.broadcast %58 : f32 to vector<8x128xf32>
    %68 = arith.mulf %67, %53 : vector<8x128xf32>
    %69 = arith.addf %66, %68 : vector<8x128xf32>
    %70 = arith.addf %0, %69 : vector<8x128xf32>
    %c1 = arith.constant 1 : index
    %c0_53 = arith.constant 0 : index
    %c0_54 = arith.constant 0 : index
    %71 = vector.load %arg4[%c1, %c0_53, %c0_54] : memref<22x8x128xf32, #tpu.memory_space<vmem>>, vector<1x8x128xf32>
    %72 = vector.shape_cast %71 : vector<1x8x128xf32> to vector<8x128xf32>
    %c1_55 = arith.constant 1 : index
    %c0_56 = arith.constant 0 : index
    %c0_57 = arith.constant 0 : index
    %73 = vector.load %arg5[%c1_55, %c0_56, %c0_57] : memref<22x8x128xf32, #tpu.memory_space<vmem>>, vector<1x8x128xf32>
    %74 = vector.shape_cast %73 : vector<1x8x128xf32> to vector<8x128xf32>
    %75 = arith.mulf %23, %72 : vector<8x128xf32>
    %76 = arith.mulf %46, %74 : vector<8x128xf32>
    %77 = arith.subf %75, %76 : vector<8x128xf32>
    %78 = arith.mulf %23, %74 : vector<8x128xf32>
    %79 = arith.mulf %46, %72 : vector<8x128xf32>
    %80 = arith.addf %78, %79 : vector<8x128xf32>
    %c1_58 = arith.constant 1 : index
    %c0_59 = arith.constant 0 : index
    %81 = memref.load %arg1[%c1_58, %c0_59] : memref<2x20xf32, #tpu.memory_space<smem>>
    %c1_60 = arith.constant 1 : index
    %c0_61 = arith.constant 0 : index
    %82 = memref.load %arg2[%c1_60, %c0_61] : memref<2x20xf32, #tpu.memory_space<smem>>
    %83 = vector.broadcast %81 : f32 to vector<8x128xf32>
    %84 = arith.mulf %83, %77 : vector<8x128xf32>
    %85 = vector.broadcast %82 : f32 to vector<8x128xf32>
    %86 = arith.mulf %85, %80 : vector<8x128xf32>
    %87 = arith.subf %84, %86 : vector<8x128xf32>
    %88 = arith.addf %0, %87 : vector<8x128xf32>
    %89 = vector.broadcast %81 : f32 to vector<8x128xf32>
    %90 = arith.mulf %89, %80 : vector<8x128xf32>
    %91 = vector.broadcast %82 : f32 to vector<8x128xf32>
    %92 = arith.mulf %91, %77 : vector<8x128xf32>
    %93 = arith.addf %90, %92 : vector<8x128xf32>
    %94 = arith.addf %0, %93 : vector<8x128xf32>
    %c8 = arith.constant 8 : index
    %c0_62 = arith.constant 0 : index
    %c0_63 = arith.constant 0 : index
    %95 = vector.load %arg4[%c8, %c0_62, %c0_63] : memref<22x8x128xf32, #tpu.memory_space<vmem>>, vector<1x8x128xf32>
    %96 = vector.shape_cast %95 : vector<1x8x128xf32> to vector<8x128xf32>
    %c0_64 = arith.constant 0 : index
    %c0_65 = arith.constant 0 : index
    %c0_66 = arith.constant 0 : index
    %97 = vector.load %arg4[%c0_64, %c0_65, %c0_66] : memref<22x8x128xf32, #tpu.memory_space<vmem>>, vector<1x8x128xf32>
    %98 = vector.shape_cast %97 : vector<1x8x128xf32> to vector<8x128xf32>
    %99 = arith.mulf %96, %98 : vector<8x128xf32>
    %c8_67 = arith.constant 8 : index
    %c0_68 = arith.constant 0 : index
    %c0_69 = arith.constant 0 : index
    %100 = vector.load %arg5[%c8_67, %c0_68, %c0_69] : memref<22x8x128xf32, #tpu.memory_space<vmem>>, vector<1x8x128xf32>
    %101 = vector.shape_cast %100 : vector<1x8x128xf32> to vector<8x128xf32>
    %c0_70 = arith.constant 0 : index
    %c0_71 = arith.constant 0 : index
    %c0_72 = arith.constant 0 : index
    %102 = vector.load %arg5[%c0_70, %c0_71, %c0_72] : memref<22x8x128xf32, #tpu.memory_space<vmem>>, vector<1x8x128xf32>
    %103 = vector.shape_cast %102 : vector<1x8x128xf32> to vector<8x128xf32>
    %104 = arith.mulf %101, %103 : vector<8x128xf32>
    %105 = arith.addf %99, %104 : vector<8x128xf32>
    %c9 = arith.constant 9 : index
    %c0_73 = arith.constant 0 : index
    %c0_74 = arith.constant 0 : index
    %106 = vector.load %arg4[%c9, %c0_73, %c0_74] : memref<22x8x128xf32, #tpu.memory_space<vmem>>, vector<1x8x128xf32>
    %107 = vector.shape_cast %106 : vector<1x8x128xf32> to vector<8x128xf32>
    %c1_75 = arith.constant 1 : index
    %c0_76 = arith.constant 0 : index
    %c0_77 = arith.constant 0 : index
    %108 = vector.load %arg4[%c1_75, %c0_76, %c0_77] : memref<22x8x128xf32, #tpu.memory_space<vmem>>, vector<1x8x128xf32>
    %109 = vector.shape_cast %108 : vector<1x8x128xf32> to vector<8x128xf32>
    %110 = arith.mulf %107, %109 : vector<8x128xf32>
    %111 = arith.addf %105, %110 : vector<8x128xf32>
    %c9_78 = arith.constant 9 : index
    %c0_79 = arith.constant 0 : index
    %c0_80 = arith.constant 0 : index
    %112 = vector.load %arg5[%c9_78, %c0_79, %c0_80] : memref<22x8x128xf32, #tpu.memory_space<vmem>>, vector<1x8x128xf32>
    %113 = vector.shape_cast %112 : vector<1x8x128xf32> to vector<8x128xf32>
    %c1_81 = arith.constant 1 : index
    %c0_82 = arith.constant 0 : index
    %c0_83 = arith.constant 0 : index
    %114 = vector.load %arg5[%c1_81, %c0_82, %c0_83] : memref<22x8x128xf32, #tpu.memory_space<vmem>>, vector<1x8x128xf32>
    %115 = vector.shape_cast %114 : vector<1x8x128xf32> to vector<8x128xf32>
    %116 = arith.mulf %113, %115 : vector<8x128xf32>
    %117 = arith.addf %111, %116 : vector<8x128xf32>
    %c8_84 = arith.constant 8 : index
    %c0_85 = arith.constant 0 : index
    %c0_86 = arith.constant 0 : index
    %118 = vector.load %arg5[%c8_84, %c0_85, %c0_86] : memref<22x8x128xf32, #tpu.memory_space<vmem>>, vector<1x8x128xf32>
    %119 = vector.shape_cast %118 : vector<1x8x128xf32> to vector<8x128xf32>
    %c0_87 = arith.constant 0 : index
    %c0_88 = arith.constant 0 : index
    %c0_89 = arith.constant 0 : index
    %120 = vector.load %arg4[%c0_87, %c0_88, %c0_89] : memref<22x8x128xf32, #tpu.memory_space<vmem>>, vector<1x8x128xf32>
    %121 = vector.shape_cast %120 : vector<1x8x128xf32> to vector<8x128xf32>
    %122 = arith.mulf %119, %121 : vector<8x128xf32>
    %c8_90 = arith.constant 8 : index
    %c0_91 = arith.constant 0 : index
    %c0_92 = arith.constant 0 : index
    %123 = vector.load %arg4[%c8_90, %c0_91, %c0_92] : memref<22x8x128xf32, #tpu.memory_space<vmem>>, vector<1x8x128xf32>
    %124 = vector.shape_cast %123 : vector<1x8x128xf32> to vector<8x128xf32>
    %c0_93 = arith.constant 0 : index
    %c0_94 = arith.constant 0 : index
    %c0_95 = arith.constant 0 : index
    %125 = vector.load %arg5[%c0_93, %c0_94, %c0_95] : memref<22x8x128xf32, #tpu.memory_space<vmem>>, vector<1x8x128xf32>
    %126 = vector.shape_cast %125 : vector<1x8x128xf32> to vector<8x128xf32>
    %127 = arith.mulf %124, %126 : vector<8x128xf32>
    %128 = arith.subf %122, %127 : vector<8x128xf32>
    %c9_96 = arith.constant 9 : index
    %c0_97 = arith.constant 0 : index
    %c0_98 = arith.constant 0 : index
    %129 = vector.load %arg5[%c9_96, %c0_97, %c0_98] : memref<22x8x128xf32, #tpu.memory_space<vmem>>, vector<1x8x128xf32>
    %130 = vector.shape_cast %129 : vector<1x8x128xf32> to vector<8x128xf32>
    %c1_99 = arith.constant 1 : index
    %c0_100 = arith.constant 0 : index
    %c0_101 = arith.constant 0 : index
    %131 = vector.load %arg4[%c1_99, %c0_100, %c0_101] : memref<22x8x128xf32, #tpu.memory_space<vmem>>, vector<1x8x128xf32>
    %132 = vector.shape_cast %131 : vector<1x8x128xf32> to vector<8x128xf32>
    %133 = arith.mulf %130, %132 : vector<8x128xf32>
    %134 = arith.addf %128, %133 : vector<8x128xf32>
    %c9_102 = arith.constant 9 : index
    %c0_103 = arith.constant 0 : index
    %c0_104 = arith.constant 0 : index
    %135 = vector.load %arg4[%c9_102, %c0_103, %c0_104] : memref<22x8x128xf32, #tpu.memory_space<vmem>>, vector<1x8x128xf32>
    %136 = vector.shape_cast %135 : vector<1x8x128xf32> to vector<8x128xf32>
    %c1_105 = arith.constant 1 : index
    %c0_106 = arith.constant 0 : index
    %c0_107 = arith.constant 0 : index
    %137 = vector.load %arg5[%c1_105, %c0_106, %c0_107] : memref<22x8x128xf32, #tpu.memory_space<vmem>>, vector<1x8x128xf32>
    %138 = vector.shape_cast %137 : vector<1x8x128xf32> to vector<8x128xf32>
    %139 = arith.mulf %136, %138 : vector<8x128xf32>
    %140 = arith.subf %134, %139 : vector<8x128xf32>
    %c2_108 = arith.constant 2 : index
    %c0_109 = arith.constant 0 : index
    %c0_110 = arith.constant 0 : index
    %141 = vector.load %arg4[%c2_108, %c0_109, %c0_110] : memref<22x8x128xf32, #tpu.memory_space<vmem>>, vector<1x8x128xf32>
    %142 = vector.shape_cast %141 : vector<1x8x128xf32> to vector<8x128xf32>
    %c2_111 = arith.constant 2 : index
    %c0_112 = arith.constant 0 : index
    %c0_113 = arith.constant 0 : index
    %143 = vector.load %arg5[%c2_111, %c0_112, %c0_113] : memref<22x8x128xf32, #tpu.memory_space<vmem>>, vector<1x8x128xf32>
    %144 = vector.shape_cast %143 : vector<1x8x128xf32> to vector<8x128xf32>
    %145 = arith.mulf %117, %142 : vector<8x128xf32>
    %146 = arith.mulf %140, %144 : vector<8x128xf32>
    %147 = arith.subf %145, %146 : vector<8x128xf32>
    %148 = arith.mulf %117, %144 : vector<8x128xf32>
    %149 = arith.mulf %140, %142 : vector<8x128xf32>
    %150 = arith.addf %148, %149 : vector<8x128xf32>
    %c0_114 = arith.constant 0 : index
    %c1_115 = arith.constant 1 : index
    %151 = memref.load %arg1[%c0_114, %c1_115] : memref<2x20xf32, #tpu.memory_space<smem>>
    %c0_116 = arith.constant 0 : index
    %c1_117 = arith.constant 1 : index
    %152 = memref.load %arg2[%c0_116, %c1_117] : memref<2x20xf32, #tpu.memory_space<smem>>
    %153 = vector.broadcast %151 : f32 to vector<8x128xf32>
    %154 = arith.mulf %153, %147 : vector<8x128xf32>
    %155 = vector.broadcast %152 : f32 to vector<8x128xf32>
    %156 = arith.mulf %155, %150 : vector<8x128xf32>
    %157 = arith.subf %154, %156 : vector<8x128xf32>
    %158 = arith.addf %64, %157 : vector<8x128xf32>
    %159 = vector.broadcast %151 : f32 to vector<8x128xf32>
    %160 = arith.mulf %159, %150 : vector<8x128xf32>
    %161 = vector.broadcast %152 : f32 to vector<8x128xf32>
    %162 = arith.mulf %161, %147 : vector<8x128xf32>
    %163 = arith.addf %160, %162 : vector<8x128xf32>
    %164 = arith.addf %70, %163 : vector<8x128xf32>
    %c3_118 = arith.constant 3 : index
    %c0_119 = arith.constant 0 : index
    %c0_120 = arith.constant 0 : index
    %165 = vector.load %arg4[%c3_118, %c0_119, %c0_120] : memref<22x8x128xf32, #tpu.memory_space<vmem>>, vector<1x8x128xf32>
    %166 = vector.shape_cast %165 : vector<1x8x128xf32> to vector<8x128xf32>
    %c3_121 = arith.constant 3 : index
    %c0_122 = arith.constant 0 : index
    %c0_123 = arith.constant 0 : index
    %167 = vector.load %arg5[%c3_121, %c0_122, %c0_123] : memref<22x8x128xf32, #tpu.memory_space<vmem>>, vector<1x8x128xf32>
    %168 = vector.shape_cast %167 : vector<1x8x128xf32> to vector<8x128xf32>
    %169 = arith.mulf %117, %166 : vector<8x128xf32>
    %170 = arith.mulf %140, %168 : vector<8x128xf32>
    %171 = arith.subf %169, %170 : vector<8x128xf32>
    %172 = arith.mulf %117, %168 : vector<8x128xf32>
    %173 = arith.mulf %140, %166 : vector<8x128xf32>
    %174 = arith.addf %172, %173 : vector<8x128xf32>
    %c1_124 = arith.constant 1 : index
    %c1_125 = arith.constant 1 : index
    %175 = memref.load %arg1[%c1_124, %c1_125] : memref<2x20xf32, #tpu.memory_space<smem>>
    %c1_126 = arith.constant 1 : index
    %c1_127 = arith.constant 1 : index
    %176 = memref.load %arg2[%c1_126, %c1_127] : memref<2x20xf32, #tpu.memory_space<smem>>
    %177 = vector.broadcast %175 : f32 to vector<8x128xf32>
    %178 = arith.mulf %177, %171 : vector<8x128xf32>
    %179 = vector.broadcast %176 : f32 to vector<8x128xf32>
    %180 = arith.mulf %179, %174 : vector<8x128xf32>
    %181 = arith.subf %178, %180 : vector<8x128xf32>
    %182 = arith.addf %88, %181 : vector<8x128xf32>
    %183 = vector.broadcast %175 : f32 to vector<8x128xf32>
    %184 = arith.mulf %183, %174 : vector<8x128xf32>
    %185 = vector.broadcast %176 : f32 to vector<8x128xf32>
    %186 = arith.mulf %185, %171 : vector<8x128xf32>
    %187 = arith.addf %184, %186 : vector<8x128xf32>
    %188 = arith.addf %94, %187 : vector<8x128xf32>
    %c12_128 = arith.constant 12 : index
    %c0_129 = arith.constant 0 : index
    %c0_130 = arith.constant 0 : index
    %189 = vector.load %arg4[%c12_128, %c0_129, %c0_130] : memref<22x8x128xf32, #tpu.memory_space<vmem>>, vector<1x8x128xf32>
    %190 = vector.shape_cast %189 : vector<1x8x128xf32> to vector<8x128xf32>
    %c4 = arith.constant 4 : index
    %c0_131 = arith.constant 0 : index
    %c0_132 = arith.constant 0 : index
    %191 = vector.load %arg4[%c4, %c0_131, %c0_132] : memref<22x8x128xf32, #tpu.memory_space<vmem>>, vector<1x8x128xf32>
    %192 = vector.shape_cast %191 : vector<1x8x128xf32> to vector<8x128xf32>
    %193 = arith.mulf %190, %192 : vector<8x128xf32>
    %c12_133 = arith.constant 12 : index
    %c0_134 = arith.constant 0 : index
    %c0_135 = arith.constant 0 : index
    %194 = vector.load %arg5[%c12_133, %c0_134, %c0_135] : memref<22x8x128xf32, #tpu.memory_space<vmem>>, vector<1x8x128xf32>
    %195 = vector.shape_cast %194 : vector<1x8x128xf32> to vector<8x128xf32>
    %c4_136 = arith.constant 4 : index
    %c0_137 = arith.constant 0 : index
    %c0_138 = arith.constant 0 : index
    %196 = vector.load %arg5[%c4_136, %c0_137, %c0_138] : memref<22x8x128xf32, #tpu.memory_space<vmem>>, vector<1x8x128xf32>
    %197 = vector.shape_cast %196 : vector<1x8x128xf32> to vector<8x128xf32>
    %198 = arith.mulf %195, %197 : vector<8x128xf32>
    %199 = arith.addf %193, %198 : vector<8x128xf32>
    %c13_139 = arith.constant 13 : index
    %c0_140 = arith.constant 0 : index
    %c0_141 = arith.constant 0 : index
    %200 = vector.load %arg4[%c13_139, %c0_140, %c0_141] : memref<22x8x128xf32, #tpu.memory_space<vmem>>, vector<1x8x128xf32>
    %201 = vector.shape_cast %200 : vector<1x8x128xf32> to vector<8x128xf32>
    %c5 = arith.constant 5 : index
    %c0_142 = arith.constant 0 : index
    %c0_143 = arith.constant 0 : index
    %202 = vector.load %arg4[%c5, %c0_142, %c0_143] : memref<22x8x128xf32, #tpu.memory_space<vmem>>, vector<1x8x128xf32>
    %203 = vector.shape_cast %202 : vector<1x8x128xf32> to vector<8x128xf32>
    %204 = arith.mulf %201, %203 : vector<8x128xf32>
    %205 = arith.addf %199, %204 : vector<8x128xf32>
    %c13_144 = arith.constant 13 : index
    %c0_145 = arith.constant 0 : index
    %c0_146 = arith.constant 0 : index
    %206 = vector.load %arg5[%c13_144, %c0_145, %c0_146] : memref<22x8x128xf32, #tpu.memory_space<vmem>>, vector<1x8x128xf32>
    %207 = vector.shape_cast %206 : vector<1x8x128xf32> to vector<8x128xf32>
    %c5_147 = arith.constant 5 : index
    %c0_148 = arith.constant 0 : index
    %c0_149 = arith.constant 0 : index
    %208 = vector.load %arg5[%c5_147, %c0_148, %c0_149] : memref<22x8x128xf32, #tpu.memory_space<vmem>>, vector<1x8x128xf32>
    %209 = vector.shape_cast %208 : vector<1x8x128xf32> to vector<8x128xf32>
    %210 = arith.mulf %207, %209 : vector<8x128xf32>
    %211 = arith.addf %205, %210 : vector<8x128xf32>
    %c12_150 = arith.constant 12 : index
    %c0_151 = arith.constant 0 : index
    %c0_152 = arith.constant 0 : index
    %212 = vector.load %arg5[%c12_150, %c0_151, %c0_152] : memref<22x8x128xf32, #tpu.memory_space<vmem>>, vector<1x8x128xf32>
    %213 = vector.shape_cast %212 : vector<1x8x128xf32> to vector<8x128xf32>
    %c4_153 = arith.constant 4 : index
    %c0_154 = arith.constant 0 : index
    %c0_155 = arith.constant 0 : index
    %214 = vector.load %arg4[%c4_153, %c0_154, %c0_155] : memref<22x8x128xf32, #tpu.memory_space<vmem>>, vector<1x8x128xf32>
    %215 = vector.shape_cast %214 : vector<1x8x128xf32> to vector<8x128xf32>
    %216 = arith.mulf %213, %215 : vector<8x128xf32>
    %c12_156 = arith.constant 12 : index
    %c0_157 = arith.constant 0 : index
    %c0_158 = arith.constant 0 : index
    %217 = vector.load %arg4[%c12_156, %c0_157, %c0_158] : memref<22x8x128xf32, #tpu.memory_space<vmem>>, vector<1x8x128xf32>
    %218 = vector.shape_cast %217 : vector<1x8x128xf32> to vector<8x128xf32>
    %c4_159 = arith.constant 4 : index
    %c0_160 = arith.constant 0 : index
    %c0_161 = arith.constant 0 : index
    %219 = vector.load %arg5[%c4_159, %c0_160, %c0_161] : memref<22x8x128xf32, #tpu.memory_space<vmem>>, vector<1x8x128xf32>
    %220 = vector.shape_cast %219 : vector<1x8x128xf32> to vector<8x128xf32>
    %221 = arith.mulf %218, %220 : vector<8x128xf32>
    %222 = arith.subf %216, %221 : vector<8x128xf32>
    %c13_162 = arith.constant 13 : index
    %c0_163 = arith.constant 0 : index
    %c0_164 = arith.constant 0 : index
    %223 = vector.load %arg5[%c13_162, %c0_163, %c0_164] : memref<22x8x128xf32, #tpu.memory_space<vmem>>, vector<1x8x128xf32>
    %224 = vector.shape_cast %223 : vector<1x8x128xf32> to vector<8x128xf32>
    %c5_165 = arith.constant 5 : index
    %c0_166 = arith.constant 0 : index
    %c0_167 = arith.constant 0 : index
    %225 = vector.load %arg4[%c5_165, %c0_166, %c0_167] : memref<22x8x128xf32, #tpu.memory_space<vmem>>, vector<1x8x128xf32>
    %226 = vector.shape_cast %225 : vector<1x8x128xf32> to vector<8x128xf32>
    %227 = arith.mulf %224, %226 : vector<8x128xf32>
    %228 = arith.addf %222, %227 : vector<8x128xf32>
    %c13_168 = arith.constant 13 : index
    %c0_169 = arith.constant 0 : index
    %c0_170 = arith.constant 0 : index
    %229 = vector.load %arg4[%c13_168, %c0_169, %c0_170] : memref<22x8x128xf32, #tpu.memory_space<vmem>>, vector<1x8x128xf32>
    %230 = vector.shape_cast %229 : vector<1x8x128xf32> to vector<8x128xf32>
    %c5_171 = arith.constant 5 : index
    %c0_172 = arith.constant 0 : index
    %c0_173 = arith.constant 0 : index
    %231 = vector.load %arg5[%c5_171, %c0_172, %c0_173] : memref<22x8x128xf32, #tpu.memory_space<vmem>>, vector<1x8x128xf32>
    %232 = vector.shape_cast %231 : vector<1x8x128xf32> to vector<8x128xf32>
    %233 = arith.mulf %230, %232 : vector<8x128xf32>
    %234 = arith.subf %228, %233 : vector<8x128xf32>
    %c2_174 = arith.constant 2 : index
    %c0_175 = arith.constant 0 : index
    %c0_176 = arith.constant 0 : index
    %235 = vector.load %arg4[%c2_174, %c0_175, %c0_176] : memref<22x8x128xf32, #tpu.memory_space<vmem>>, vector<1x8x128xf32>
    %236 = vector.shape_cast %235 : vector<1x8x128xf32> to vector<8x128xf32>
    %c2_177 = arith.constant 2 : index
    %c0_178 = arith.constant 0 : index
    %c0_179 = arith.constant 0 : index
    %237 = vector.load %arg5[%c2_177, %c0_178, %c0_179] : memref<22x8x128xf32, #tpu.memory_space<vmem>>, vector<1x8x128xf32>
    %238 = vector.shape_cast %237 : vector<1x8x128xf32> to vector<8x128xf32>
    %239 = arith.mulf %211, %236 : vector<8x128xf32>
    %240 = arith.mulf %234, %238 : vector<8x128xf32>
    %241 = arith.subf %239, %240 : vector<8x128xf32>
    %242 = arith.mulf %211, %238 : vector<8x128xf32>
    %243 = arith.mulf %234, %236 : vector<8x128xf32>
    %244 = arith.addf %242, %243 : vector<8x128xf32>
    %c0_180 = arith.constant 0 : index
    %c2_181 = arith.constant 2 : index
    %245 = memref.load %arg1[%c0_180, %c2_181] : memref<2x20xf32, #tpu.memory_space<smem>>
    %c0_182 = arith.constant 0 : index
    %c2_183 = arith.constant 2 : index
    %246 = memref.load %arg2[%c0_182, %c2_183] : memref<2x20xf32, #tpu.memory_space<smem>>
    %247 = vector.broadcast %245 : f32 to vector<8x128xf32>
    %248 = arith.mulf %247, %241 : vector<8x128xf32>
    %249 = vector.broadcast %246 : f32 to vector<8x128xf32>
    %250 = arith.mulf %249, %244 : vector<8x128xf32>
    %251 = arith.subf %248, %250 : vector<8x128xf32>
    %252 = arith.addf %158, %251 : vector<8x128xf32>
    %253 = vector.broadcast %245 : f32 to vector<8x128xf32>
    %254 = arith.mulf %253, %244 : vector<8x128xf32>
    %255 = vector.broadcast %246 : f32 to vector<8x128xf32>
    %256 = arith.mulf %255, %241 : vector<8x128xf32>
    %257 = arith.addf %254, %256 : vector<8x128xf32>
    %258 = arith.addf %164, %257 : vector<8x128xf32>
    %c3_184 = arith.constant 3 : index
    %c0_185 = arith.constant 0 : index
    %c0_186 = arith.constant 0 : index
    %259 = vector.load %arg4[%c3_184, %c0_185, %c0_186] : memref<22x8x128xf32, #tpu.memory_space<vmem>>, vector<1x8x128xf32>
    %260 = vector.shape_cast %259 : vector<1x8x128xf32> to vector<8x128xf32>
    %c3_187 = arith.constant 3 : index
    %c0_188 = arith.constant 0 : index
    %c0_189 = arith.constant 0 : index
    %261 = vector.load %arg5[%c3_187, %c0_188, %c0_189] : memref<22x8x128xf32, #tpu.memory_space<vmem>>, vector<1x8x128xf32>
    %262 = vector.shape_cast %261 : vector<1x8x128xf32> to vector<8x128xf32>
    %263 = arith.mulf %211, %260 : vector<8x128xf32>
    %264 = arith.mulf %234, %262 : vector<8x128xf32>
    %265 = arith.subf %263, %264 : vector<8x128xf32>
    %266 = arith.mulf %211, %262 : vector<8x128xf32>
    %267 = arith.mulf %234, %260 : vector<8x128xf32>
    %268 = arith.addf %266, %267 : vector<8x128xf32>
    %c1_190 = arith.constant 1 : index
    %c2_191 = arith.constant 2 : index
    %269 = memref.load %arg1[%c1_190, %c2_191] : memref<2x20xf32, #tpu.memory_space<smem>>
    %c1_192 = arith.constant 1 : index
    %c2_193 = arith.constant 2 : index
    %270 = memref.load %arg2[%c1_192, %c2_193] : memref<2x20xf32, #tpu.memory_space<smem>>
    %271 = vector.broadcast %269 : f32 to vector<8x128xf32>
    %272 = arith.mulf %271, %265 : vector<8x128xf32>
    %273 = vector.broadcast %270 : f32 to vector<8x128xf32>
    %274 = arith.mulf %273, %268 : vector<8x128xf32>
    %275 = arith.subf %272, %274 : vector<8x128xf32>
    %276 = arith.addf %182, %275 : vector<8x128xf32>
    %277 = vector.broadcast %269 : f32 to vector<8x128xf32>
    %278 = arith.mulf %277, %268 : vector<8x128xf32>
    %279 = vector.broadcast %270 : f32 to vector<8x128xf32>
    %280 = arith.mulf %279, %265 : vector<8x128xf32>
    %281 = arith.addf %278, %280 : vector<8x128xf32>
    %282 = arith.addf %188, %281 : vector<8x128xf32>
    %c8_194 = arith.constant 8 : index
    %c0_195 = arith.constant 0 : index
    %c0_196 = arith.constant 0 : index
    %283 = vector.load %arg4[%c8_194, %c0_195, %c0_196] : memref<22x8x128xf32, #tpu.memory_space<vmem>>, vector<1x8x128xf32>
    %284 = vector.shape_cast %283 : vector<1x8x128xf32> to vector<8x128xf32>
    %c2_197 = arith.constant 2 : index
    %c0_198 = arith.constant 0 : index
    %c0_199 = arith.constant 0 : index
    %285 = vector.load %arg4[%c2_197, %c0_198, %c0_199] : memref<22x8x128xf32, #tpu.memory_space<vmem>>, vector<1x8x128xf32>
    %286 = vector.shape_cast %285 : vector<1x8x128xf32> to vector<8x128xf32>
    %287 = arith.mulf %284, %286 : vector<8x128xf32>
    %c8_200 = arith.constant 8 : index
    %c0_201 = arith.constant 0 : index
    %c0_202 = arith.constant 0 : index
    %288 = vector.load %arg5[%c8_200, %c0_201, %c0_202] : memref<22x8x128xf32, #tpu.memory_space<vmem>>, vector<1x8x128xf32>
    %289 = vector.shape_cast %288 : vector<1x8x128xf32> to vector<8x128xf32>
    %c2_203 = arith.constant 2 : index
    %c0_204 = arith.constant 0 : index
    %c0_205 = arith.constant 0 : index
    %290 = vector.load %arg5[%c2_203, %c0_204, %c0_205] : memref<22x8x128xf32, #tpu.memory_space<vmem>>, vector<1x8x128xf32>
    %291 = vector.shape_cast %290 : vector<1x8x128xf32> to vector<8x128xf32>
    %292 = arith.mulf %289, %291 : vector<8x128xf32>
    %293 = arith.addf %287, %292 : vector<8x128xf32>
    %c9_206 = arith.constant 9 : index
    %c0_207 = arith.constant 0 : index
    %c0_208 = arith.constant 0 : index
    %294 = vector.load %arg4[%c9_206, %c0_207, %c0_208] : memref<22x8x128xf32, #tpu.memory_space<vmem>>, vector<1x8x128xf32>
    %295 = vector.shape_cast %294 : vector<1x8x128xf32> to vector<8x128xf32>
    %c3_209 = arith.constant 3 : index
    %c0_210 = arith.constant 0 : index
    %c0_211 = arith.constant 0 : index
    %296 = vector.load %arg4[%c3_209, %c0_210, %c0_211] : memref<22x8x128xf32, #tpu.memory_space<vmem>>, vector<1x8x128xf32>
    %297 = vector.shape_cast %296 : vector<1x8x128xf32> to vector<8x128xf32>
    %298 = arith.mulf %295, %297 : vector<8x128xf32>
    %299 = arith.addf %293, %298 : vector<8x128xf32>
    %c9_212 = arith.constant 9 : index
    %c0_213 = arith.constant 0 : index
    %c0_214 = arith.constant 0 : index
    %300 = vector.load %arg5[%c9_212, %c0_213, %c0_214] : memref<22x8x128xf32, #tpu.memory_space<vmem>>, vector<1x8x128xf32>
    %301 = vector.shape_cast %300 : vector<1x8x128xf32> to vector<8x128xf32>
    %c3_215 = arith.constant 3 : index
    %c0_216 = arith.constant 0 : index
    %c0_217 = arith.constant 0 : index
    %302 = vector.load %arg5[%c3_215, %c0_216, %c0_217] : memref<22x8x128xf32, #tpu.memory_space<vmem>>, vector<1x8x128xf32>
    %303 = vector.shape_cast %302 : vector<1x8x128xf32> to vector<8x128xf32>
    %304 = arith.mulf %301, %303 : vector<8x128xf32>
    %305 = arith.addf %299, %304 : vector<8x128xf32>
    %c8_218 = arith.constant 8 : index
    %c0_219 = arith.constant 0 : index
    %c0_220 = arith.constant 0 : index
    %306 = vector.load %arg5[%c8_218, %c0_219, %c0_220] : memref<22x8x128xf32, #tpu.memory_space<vmem>>, vector<1x8x128xf32>
    %307 = vector.shape_cast %306 : vector<1x8x128xf32> to vector<8x128xf32>
    %c2_221 = arith.constant 2 : index
    %c0_222 = arith.constant 0 : index
    %c0_223 = arith.constant 0 : index
    %308 = vector.load %arg4[%c2_221, %c0_222, %c0_223] : memref<22x8x128xf32, #tpu.memory_space<vmem>>, vector<1x8x128xf32>
    %309 = vector.shape_cast %308 : vector<1x8x128xf32> to vector<8x128xf32>
    %310 = arith.mulf %307, %309 : vector<8x128xf32>
    %c8_224 = arith.constant 8 : index
    %c0_225 = arith.constant 0 : index
    %c0_226 = arith.constant 0 : index
    %311 = vector.load %arg4[%c8_224, %c0_225, %c0_226] : memref<22x8x128xf32, #tpu.memory_space<vmem>>, vector<1x8x128xf32>
    %312 = vector.shape_cast %311 : vector<1x8x128xf32> to vector<8x128xf32>
    %c2_227 = arith.constant 2 : index
    %c0_228 = arith.constant 0 : index
    %c0_229 = arith.constant 0 : index
    %313 = vector.load %arg5[%c2_227, %c0_228, %c0_229] : memref<22x8x128xf32, #tpu.memory_space<vmem>>, vector<1x8x128xf32>
    %314 = vector.shape_cast %313 : vector<1x8x128xf32> to vector<8x128xf32>
    %315 = arith.mulf %312, %314 : vector<8x128xf32>
    %316 = arith.subf %310, %315 : vector<8x128xf32>
    %c9_230 = arith.constant 9 : index
    %c0_231 = arith.constant 0 : index
    %c0_232 = arith.constant 0 : index
    %317 = vector.load %arg5[%c9_230, %c0_231, %c0_232] : memref<22x8x128xf32, #tpu.memory_space<vmem>>, vector<1x8x128xf32>
    %318 = vector.shape_cast %317 : vector<1x8x128xf32> to vector<8x128xf32>
    %c3_233 = arith.constant 3 : index
    %c0_234 = arith.constant 0 : index
    %c0_235 = arith.constant 0 : index
    %319 = vector.load %arg4[%c3_233, %c0_234, %c0_235] : memref<22x8x128xf32, #tpu.memory_space<vmem>>, vector<1x8x128xf32>
    %320 = vector.shape_cast %319 : vector<1x8x128xf32> to vector<8x128xf32>
    %321 = arith.mulf %318, %320 : vector<8x128xf32>
    %322 = arith.addf %316, %321 : vector<8x128xf32>
    %c9_236 = arith.constant 9 : index
    %c0_237 = arith.constant 0 : index
    %c0_238 = arith.constant 0 : index
    %323 = vector.load %arg4[%c9_236, %c0_237, %c0_238] : memref<22x8x128xf32, #tpu.memory_space<vmem>>, vector<1x8x128xf32>
    %324 = vector.shape_cast %323 : vector<1x8x128xf32> to vector<8x128xf32>
    %c3_239 = arith.constant 3 : index
    %c0_240 = arith.constant 0 : index
    %c0_241 = arith.constant 0 : index
    %325 = vector.load %arg5[%c3_239, %c0_240, %c0_241] : memref<22x8x128xf32, #tpu.memory_space<vmem>>, vector<1x8x128xf32>
    %326 = vector.shape_cast %325 : vector<1x8x128xf32> to vector<8x128xf32>
    %327 = arith.mulf %324, %326 : vector<8x128xf32>
    %328 = arith.subf %322, %327 : vector<8x128xf32>
    %c4_242 = arith.constant 4 : index
    %c0_243 = arith.constant 0 : index
    %c0_244 = arith.constant 0 : index
    %329 = vector.load %arg4[%c4_242, %c0_243, %c0_244] : memref<22x8x128xf32, #tpu.memory_space<vmem>>, vector<1x8x128xf32>
    %330 = vector.shape_cast %329 : vector<1x8x128xf32> to vector<8x128xf32>
    %c4_245 = arith.constant 4 : index
    %c0_246 = arith.constant 0 : index
    %c0_247 = arith.constant 0 : index
    %331 = vector.load %arg5[%c4_245, %c0_246, %c0_247] : memref<22x8x128xf32, #tpu.memory_space<vmem>>, vector<1x8x128xf32>
    %332 = vector.shape_cast %331 : vector<1x8x128xf32> to vector<8x128xf32>
    %333 = arith.mulf %305, %330 : vector<8x128xf32>
    %334 = arith.mulf %328, %332 : vector<8x128xf32>
    %335 = arith.subf %333, %334 : vector<8x128xf32>
    %336 = arith.mulf %305, %332 : vector<8x128xf32>
    %337 = arith.mulf %328, %330 : vector<8x128xf32>
    %338 = arith.addf %336, %337 : vector<8x128xf32>
    %c0_248 = arith.constant 0 : index
    %c3_249 = arith.constant 3 : index
    %339 = memref.load %arg1[%c0_248, %c3_249] : memref<2x20xf32, #tpu.memory_space<smem>>
    %c0_250 = arith.constant 0 : index
    %c3_251 = arith.constant 3 : index
    %340 = memref.load %arg2[%c0_250, %c3_251] : memref<2x20xf32, #tpu.memory_space<smem>>
    %341 = vector.broadcast %339 : f32 to vector<8x128xf32>
    %342 = arith.mulf %341, %335 : vector<8x128xf32>
    %343 = vector.broadcast %340 : f32 to vector<8x128xf32>
    %344 = arith.mulf %343, %338 : vector<8x128xf32>
    %345 = arith.subf %342, %344 : vector<8x128xf32>
    %346 = arith.addf %252, %345 : vector<8x128xf32>
    %347 = vector.broadcast %339 : f32 to vector<8x128xf32>
    %348 = arith.mulf %347, %338 : vector<8x128xf32>
    %349 = vector.broadcast %340 : f32 to vector<8x128xf32>
    %350 = arith.mulf %349, %335 : vector<8x128xf32>
    %351 = arith.addf %348, %350 : vector<8x128xf32>
    %352 = arith.addf %258, %351 : vector<8x128xf32>
    %c5_252 = arith.constant 5 : index
    %c0_253 = arith.constant 0 : index
    %c0_254 = arith.constant 0 : index
    %353 = vector.load %arg4[%c5_252, %c0_253, %c0_254] : memref<22x8x128xf32, #tpu.memory_space<vmem>>, vector<1x8x128xf32>
    %354 = vector.shape_cast %353 : vector<1x8x128xf32> to vector<8x128xf32>
    %c5_255 = arith.constant 5 : index
    %c0_256 = arith.constant 0 : index
    %c0_257 = arith.constant 0 : index
    %355 = vector.load %arg5[%c5_255, %c0_256, %c0_257] : memref<22x8x128xf32, #tpu.memory_space<vmem>>, vector<1x8x128xf32>
    %356 = vector.shape_cast %355 : vector<1x8x128xf32> to vector<8x128xf32>
    %357 = arith.mulf %305, %354 : vector<8x128xf32>
    %358 = arith.mulf %328, %356 : vector<8x128xf32>
    %359 = arith.subf %357, %358 : vector<8x128xf32>
    %360 = arith.mulf %305, %356 : vector<8x128xf32>
    %361 = arith.mulf %328, %354 : vector<8x128xf32>
    %362 = arith.addf %360, %361 : vector<8x128xf32>
    %c1_258 = arith.constant 1 : index
    %c3_259 = arith.constant 3 : index
    %363 = memref.load %arg1[%c1_258, %c3_259] : memref<2x20xf32, #tpu.memory_space<smem>>
    %c1_260 = arith.constant 1 : index
    %c3_261 = arith.constant 3 : index
    %364 = memref.load %arg2[%c1_260, %c3_261] : memref<2x20xf32, #tpu.memory_space<smem>>
    %365 = vector.broadcast %363 : f32 to vector<8x128xf32>
    %366 = arith.mulf %365, %359 : vector<8x128xf32>
    %367 = vector.broadcast %364 : f32 to vector<8x128xf32>
    %368 = arith.mulf %367, %362 : vector<8x128xf32>
    %369 = arith.subf %366, %368 : vector<8x128xf32>
    %370 = arith.addf %276, %369 : vector<8x128xf32>
    %371 = vector.broadcast %363 : f32 to vector<8x128xf32>
    %372 = arith.mulf %371, %362 : vector<8x128xf32>
    %373 = vector.broadcast %364 : f32 to vector<8x128xf32>
    %374 = arith.mulf %373, %359 : vector<8x128xf32>
    %375 = arith.addf %372, %374 : vector<8x128xf32>
    %376 = arith.addf %282, %375 : vector<8x128xf32>
    %c12_262 = arith.constant 12 : index
    %c0_263 = arith.constant 0 : index
    %c0_264 = arith.constant 0 : index
    %377 = vector.load %arg4[%c12_262, %c0_263, %c0_264] : memref<22x8x128xf32, #tpu.memory_space<vmem>>, vector<1x8x128xf32>
    %378 = vector.shape_cast %377 : vector<1x8x128xf32> to vector<8x128xf32>
    %c6 = arith.constant 6 : index
    %c0_265 = arith.constant 0 : index
    %c0_266 = arith.constant 0 : index
    %379 = vector.load %arg4[%c6, %c0_265, %c0_266] : memref<22x8x128xf32, #tpu.memory_space<vmem>>, vector<1x8x128xf32>
    %380 = vector.shape_cast %379 : vector<1x8x128xf32> to vector<8x128xf32>
    %381 = arith.mulf %378, %380 : vector<8x128xf32>
    %c12_267 = arith.constant 12 : index
    %c0_268 = arith.constant 0 : index
    %c0_269 = arith.constant 0 : index
    %382 = vector.load %arg5[%c12_267, %c0_268, %c0_269] : memref<22x8x128xf32, #tpu.memory_space<vmem>>, vector<1x8x128xf32>
    %383 = vector.shape_cast %382 : vector<1x8x128xf32> to vector<8x128xf32>
    %c6_270 = arith.constant 6 : index
    %c0_271 = arith.constant 0 : index
    %c0_272 = arith.constant 0 : index
    %384 = vector.load %arg5[%c6_270, %c0_271, %c0_272] : memref<22x8x128xf32, #tpu.memory_space<vmem>>, vector<1x8x128xf32>
    %385 = vector.shape_cast %384 : vector<1x8x128xf32> to vector<8x128xf32>
    %386 = arith.mulf %383, %385 : vector<8x128xf32>
    %387 = arith.addf %381, %386 : vector<8x128xf32>
    %c13_273 = arith.constant 13 : index
    %c0_274 = arith.constant 0 : index
    %c0_275 = arith.constant 0 : index
    %388 = vector.load %arg4[%c13_273, %c0_274, %c0_275] : memref<22x8x128xf32, #tpu.memory_space<vmem>>, vector<1x8x128xf32>
    %389 = vector.shape_cast %388 : vector<1x8x128xf32> to vector<8x128xf32>
    %c7 = arith.constant 7 : index
    %c0_276 = arith.constant 0 : index
    %c0_277 = arith.constant 0 : index
    %390 = vector.load %arg4[%c7, %c0_276, %c0_277] : memref<22x8x128xf32, #tpu.memory_space<vmem>>, vector<1x8x128xf32>
    %391 = vector.shape_cast %390 : vector<1x8x128xf32> to vector<8x128xf32>
    %392 = arith.mulf %389, %391 : vector<8x128xf32>
    %393 = arith.addf %387, %392 : vector<8x128xf32>
    %c13_278 = arith.constant 13 : index
    %c0_279 = arith.constant 0 : index
    %c0_280 = arith.constant 0 : index
    %394 = vector.load %arg5[%c13_278, %c0_279, %c0_280] : memref<22x8x128xf32, #tpu.memory_space<vmem>>, vector<1x8x128xf32>
    %395 = vector.shape_cast %394 : vector<1x8x128xf32> to vector<8x128xf32>
    %c7_281 = arith.constant 7 : index
    %c0_282 = arith.constant 0 : index
    %c0_283 = arith.constant 0 : index
    %396 = vector.load %arg5[%c7_281, %c0_282, %c0_283] : memref<22x8x128xf32, #tpu.memory_space<vmem>>, vector<1x8x128xf32>
    %397 = vector.shape_cast %396 : vector<1x8x128xf32> to vector<8x128xf32>
    %398 = arith.mulf %395, %397 : vector<8x128xf32>
    %399 = arith.addf %393, %398 : vector<8x128xf32>
    %c12_284 = arith.constant 12 : index
    %c0_285 = arith.constant 0 : index
    %c0_286 = arith.constant 0 : index
    %400 = vector.load %arg5[%c12_284, %c0_285, %c0_286] : memref<22x8x128xf32, #tpu.memory_space<vmem>>, vector<1x8x128xf32>
    %401 = vector.shape_cast %400 : vector<1x8x128xf32> to vector<8x128xf32>
    %c6_287 = arith.constant 6 : index
    %c0_288 = arith.constant 0 : index
    %c0_289 = arith.constant 0 : index
    %402 = vector.load %arg4[%c6_287, %c0_288, %c0_289] : memref<22x8x128xf32, #tpu.memory_space<vmem>>, vector<1x8x128xf32>
    %403 = vector.shape_cast %402 : vector<1x8x128xf32> to vector<8x128xf32>
    %404 = arith.mulf %401, %403 : vector<8x128xf32>
    %c12_290 = arith.constant 12 : index
    %c0_291 = arith.constant 0 : index
    %c0_292 = arith.constant 0 : index
    %405 = vector.load %arg4[%c12_290, %c0_291, %c0_292] : memref<22x8x128xf32, #tpu.memory_space<vmem>>, vector<1x8x128xf32>
    %406 = vector.shape_cast %405 : vector<1x8x128xf32> to vector<8x128xf32>
    %c6_293 = arith.constant 6 : index
    %c0_294 = arith.constant 0 : index
    %c0_295 = arith.constant 0 : index
    %407 = vector.load %arg5[%c6_293, %c0_294, %c0_295] : memref<22x8x128xf32, #tpu.memory_space<vmem>>, vector<1x8x128xf32>
    %408 = vector.shape_cast %407 : vector<1x8x128xf32> to vector<8x128xf32>
    %409 = arith.mulf %406, %408 : vector<8x128xf32>
    %410 = arith.subf %404, %409 : vector<8x128xf32>
    %c13_296 = arith.constant 13 : index
    %c0_297 = arith.constant 0 : index
    %c0_298 = arith.constant 0 : index
    %411 = vector.load %arg5[%c13_296, %c0_297, %c0_298] : memref<22x8x128xf32, #tpu.memory_space<vmem>>, vector<1x8x128xf32>
    %412 = vector.shape_cast %411 : vector<1x8x128xf32> to vector<8x128xf32>
    %c7_299 = arith.constant 7 : index
    %c0_300 = arith.constant 0 : index
    %c0_301 = arith.constant 0 : index
    %413 = vector.load %arg4[%c7_299, %c0_300, %c0_301] : memref<22x8x128xf32, #tpu.memory_space<vmem>>, vector<1x8x128xf32>
    %414 = vector.shape_cast %413 : vector<1x8x128xf32> to vector<8x128xf32>
    %415 = arith.mulf %412, %414 : vector<8x128xf32>
    %416 = arith.addf %410, %415 : vector<8x128xf32>
    %c13_302 = arith.constant 13 : index
    %c0_303 = arith.constant 0 : index
    %c0_304 = arith.constant 0 : index
    %417 = vector.load %arg4[%c13_302, %c0_303, %c0_304] : memref<22x8x128xf32, #tpu.memory_space<vmem>>, vector<1x8x128xf32>
    %418 = vector.shape_cast %417 : vector<1x8x128xf32> to vector<8x128xf32>
    %c7_305 = arith.constant 7 : index
    %c0_306 = arith.constant 0 : index
    %c0_307 = arith.constant 0 : index
    %419 = vector.load %arg5[%c7_305, %c0_306, %c0_307] : memref<22x8x128xf32, #tpu.memory_space<vmem>>, vector<1x8x128xf32>
    %420 = vector.shape_cast %419 : vector<1x8x128xf32> to vector<8x128xf32>
    %421 = arith.mulf %418, %420 : vector<8x128xf32>
    %422 = arith.subf %416, %421 : vector<8x128xf32>
    %c4_308 = arith.constant 4 : index
    %c0_309 = arith.constant 0 : index
    %c0_310 = arith.constant 0 : index
    %423 = vector.load %arg4[%c4_308, %c0_309, %c0_310] : memref<22x8x128xf32, #tpu.memory_space<vmem>>, vector<1x8x128xf32>
    %424 = vector.shape_cast %423 : vector<1x8x128xf32> to vector<8x128xf32>
    %c4_311 = arith.constant 4 : index
    %c0_312 = arith.constant 0 : index
    %c0_313 = arith.constant 0 : index
    %425 = vector.load %arg5[%c4_311, %c0_312, %c0_313] : memref<22x8x128xf32, #tpu.memory_space<vmem>>, vector<1x8x128xf32>
    %426 = vector.shape_cast %425 : vector<1x8x128xf32> to vector<8x128xf32>
    %427 = arith.mulf %399, %424 : vector<8x128xf32>
    %428 = arith.mulf %422, %426 : vector<8x128xf32>
    %429 = arith.subf %427, %428 : vector<8x128xf32>
    %430 = arith.mulf %399, %426 : vector<8x128xf32>
    %431 = arith.mulf %422, %424 : vector<8x128xf32>
    %432 = arith.addf %430, %431 : vector<8x128xf32>
    %c0_314 = arith.constant 0 : index
    %c4_315 = arith.constant 4 : index
    %433 = memref.load %arg1[%c0_314, %c4_315] : memref<2x20xf32, #tpu.memory_space<smem>>
    %c0_316 = arith.constant 0 : index
    %c4_317 = arith.constant 4 : index
    %434 = memref.load %arg2[%c0_316, %c4_317] : memref<2x20xf32, #tpu.memory_space<smem>>
    %435 = vector.broadcast %433 : f32 to vector<8x128xf32>
    %436 = arith.mulf %435, %429 : vector<8x128xf32>
    %437 = vector.broadcast %434 : f32 to vector<8x128xf32>
    %438 = arith.mulf %437, %432 : vector<8x128xf32>
    %439 = arith.subf %436, %438 : vector<8x128xf32>
    %440 = arith.addf %346, %439 : vector<8x128xf32>
    %441 = vector.broadcast %433 : f32 to vector<8x128xf32>
    %442 = arith.mulf %441, %432 : vector<8x128xf32>
    %443 = vector.broadcast %434 : f32 to vector<8x128xf32>
    %444 = arith.mulf %443, %429 : vector<8x128xf32>
    %445 = arith.addf %442, %444 : vector<8x128xf32>
    %446 = arith.addf %352, %445 : vector<8x128xf32>
    %c5_318 = arith.constant 5 : index
    %c0_319 = arith.constant 0 : index
    %c0_320 = arith.constant 0 : index
    %447 = vector.load %arg4[%c5_318, %c0_319, %c0_320] : memref<22x8x128xf32, #tpu.memory_space<vmem>>, vector<1x8x128xf32>
    %448 = vector.shape_cast %447 : vector<1x8x128xf32> to vector<8x128xf32>
    %c5_321 = arith.constant 5 : index
    %c0_322 = arith.constant 0 : index
    %c0_323 = arith.constant 0 : index
    %449 = vector.load %arg5[%c5_321, %c0_322, %c0_323] : memref<22x8x128xf32, #tpu.memory_space<vmem>>, vector<1x8x128xf32>
    %450 = vector.shape_cast %449 : vector<1x8x128xf32> to vector<8x128xf32>
    %451 = arith.mulf %399, %448 : vector<8x128xf32>
    %452 = arith.mulf %422, %450 : vector<8x128xf32>
    %453 = arith.subf %451, %452 : vector<8x128xf32>
    %454 = arith.mulf %399, %450 : vector<8x128xf32>
    %455 = arith.mulf %422, %448 : vector<8x128xf32>
    %456 = arith.addf %454, %455 : vector<8x128xf32>
    %c1_324 = arith.constant 1 : index
    %c4_325 = arith.constant 4 : index
    %457 = memref.load %arg1[%c1_324, %c4_325] : memref<2x20xf32, #tpu.memory_space<smem>>
    %c1_326 = arith.constant 1 : index
    %c4_327 = arith.constant 4 : index
    %458 = memref.load %arg2[%c1_326, %c4_327] : memref<2x20xf32, #tpu.memory_space<smem>>
    %459 = vector.broadcast %457 : f32 to vector<8x128xf32>
    %460 = arith.mulf %459, %453 : vector<8x128xf32>
    %461 = vector.broadcast %458 : f32 to vector<8x128xf32>
    %462 = arith.mulf %461, %456 : vector<8x128xf32>
    %463 = arith.subf %460, %462 : vector<8x128xf32>
    %464 = arith.addf %370, %463 : vector<8x128xf32>
    %465 = vector.broadcast %457 : f32 to vector<8x128xf32>
    %466 = arith.mulf %465, %456 : vector<8x128xf32>
    %467 = vector.broadcast %458 : f32 to vector<8x128xf32>
    %468 = arith.mulf %467, %453 : vector<8x128xf32>
    %469 = arith.addf %466, %468 : vector<8x128xf32>
    %470 = arith.addf %376, %469 : vector<8x128xf32>
    %c6_328 = arith.constant 6 : index
    %c0_329 = arith.constant 0 : index
    %c0_330 = arith.constant 0 : index
    %471 = vector.load %arg4[%c6_328, %c0_329, %c0_330] : memref<22x8x128xf32, #tpu.memory_space<vmem>>, vector<1x8x128xf32>
    %472 = vector.shape_cast %471 : vector<1x8x128xf32> to vector<8x128xf32>
    %c2_331 = arith.constant 2 : index
    %c0_332 = arith.constant 0 : index
    %c0_333 = arith.constant 0 : index
    %473 = vector.load %arg4[%c2_331, %c0_332, %c0_333] : memref<22x8x128xf32, #tpu.memory_space<vmem>>, vector<1x8x128xf32>
    %474 = vector.shape_cast %473 : vector<1x8x128xf32> to vector<8x128xf32>
    %475 = arith.mulf %472, %474 : vector<8x128xf32>
    %c6_334 = arith.constant 6 : index
    %c0_335 = arith.constant 0 : index
    %c0_336 = arith.constant 0 : index
    %476 = vector.load %arg5[%c6_334, %c0_335, %c0_336] : memref<22x8x128xf32, #tpu.memory_space<vmem>>, vector<1x8x128xf32>
    %477 = vector.shape_cast %476 : vector<1x8x128xf32> to vector<8x128xf32>
    %c2_337 = arith.constant 2 : index
    %c0_338 = arith.constant 0 : index
    %c0_339 = arith.constant 0 : index
    %478 = vector.load %arg5[%c2_337, %c0_338, %c0_339] : memref<22x8x128xf32, #tpu.memory_space<vmem>>, vector<1x8x128xf32>
    %479 = vector.shape_cast %478 : vector<1x8x128xf32> to vector<8x128xf32>
    %480 = arith.mulf %477, %479 : vector<8x128xf32>
    %481 = arith.addf %475, %480 : vector<8x128xf32>
    %c7_340 = arith.constant 7 : index
    %c0_341 = arith.constant 0 : index
    %c0_342 = arith.constant 0 : index
    %482 = vector.load %arg4[%c7_340, %c0_341, %c0_342] : memref<22x8x128xf32, #tpu.memory_space<vmem>>, vector<1x8x128xf32>
    %483 = vector.shape_cast %482 : vector<1x8x128xf32> to vector<8x128xf32>
    %c3_343 = arith.constant 3 : index
    %c0_344 = arith.constant 0 : index
    %c0_345 = arith.constant 0 : index
    %484 = vector.load %arg4[%c3_343, %c0_344, %c0_345] : memref<22x8x128xf32, #tpu.memory_space<vmem>>, vector<1x8x128xf32>
    %485 = vector.shape_cast %484 : vector<1x8x128xf32> to vector<8x128xf32>
    %486 = arith.mulf %483, %485 : vector<8x128xf32>
    %487 = arith.addf %481, %486 : vector<8x128xf32>
    %c7_346 = arith.constant 7 : index
    %c0_347 = arith.constant 0 : index
    %c0_348 = arith.constant 0 : index
    %488 = vector.load %arg5[%c7_346, %c0_347, %c0_348] : memref<22x8x128xf32, #tpu.memory_space<vmem>>, vector<1x8x128xf32>
    %489 = vector.shape_cast %488 : vector<1x8x128xf32> to vector<8x128xf32>
    %c3_349 = arith.constant 3 : index
    %c0_350 = arith.constant 0 : index
    %c0_351 = arith.constant 0 : index
    %490 = vector.load %arg5[%c3_349, %c0_350, %c0_351] : memref<22x8x128xf32, #tpu.memory_space<vmem>>, vector<1x8x128xf32>
    %491 = vector.shape_cast %490 : vector<1x8x128xf32> to vector<8x128xf32>
    %492 = arith.mulf %489, %491 : vector<8x128xf32>
    %493 = arith.addf %487, %492 : vector<8x128xf32>
    %c6_352 = arith.constant 6 : index
    %c0_353 = arith.constant 0 : index
    %c0_354 = arith.constant 0 : index
    %494 = vector.load %arg5[%c6_352, %c0_353, %c0_354] : memref<22x8x128xf32, #tpu.memory_space<vmem>>, vector<1x8x128xf32>
    %495 = vector.shape_cast %494 : vector<1x8x128xf32> to vector<8x128xf32>
    %c2_355 = arith.constant 2 : index
    %c0_356 = arith.constant 0 : index
    %c0_357 = arith.constant 0 : index
    %496 = vector.load %arg4[%c2_355, %c0_356, %c0_357] : memref<22x8x128xf32, #tpu.memory_space<vmem>>, vector<1x8x128xf32>
    %497 = vector.shape_cast %496 : vector<1x8x128xf32> to vector<8x128xf32>
    %498 = arith.mulf %495, %497 : vector<8x128xf32>
    %c6_358 = arith.constant 6 : index
    %c0_359 = arith.constant 0 : index
    %c0_360 = arith.constant 0 : index
    %499 = vector.load %arg4[%c6_358, %c0_359, %c0_360] : memref<22x8x128xf32, #tpu.memory_space<vmem>>, vector<1x8x128xf32>
    %500 = vector.shape_cast %499 : vector<1x8x128xf32> to vector<8x128xf32>
    %c2_361 = arith.constant 2 : index
    %c0_362 = arith.constant 0 : index
    %c0_363 = arith.constant 0 : index
    %501 = vector.load %arg5[%c2_361, %c0_362, %c0_363] : memref<22x8x128xf32, #tpu.memory_space<vmem>>, vector<1x8x128xf32>
    %502 = vector.shape_cast %501 : vector<1x8x128xf32> to vector<8x128xf32>
    %503 = arith.mulf %500, %502 : vector<8x128xf32>
    %504 = arith.subf %498, %503 : vector<8x128xf32>
    %c7_364 = arith.constant 7 : index
    %c0_365 = arith.constant 0 : index
    %c0_366 = arith.constant 0 : index
    %505 = vector.load %arg5[%c7_364, %c0_365, %c0_366] : memref<22x8x128xf32, #tpu.memory_space<vmem>>, vector<1x8x128xf32>
    %506 = vector.shape_cast %505 : vector<1x8x128xf32> to vector<8x128xf32>
    %c3_367 = arith.constant 3 : index
    %c0_368 = arith.constant 0 : index
    %c0_369 = arith.constant 0 : index
    %507 = vector.load %arg4[%c3_367, %c0_368, %c0_369] : memref<22x8x128xf32, #tpu.memory_space<vmem>>, vector<1x8x128xf32>
    %508 = vector.shape_cast %507 : vector<1x8x128xf32> to vector<8x128xf32>
    %509 = arith.mulf %506, %508 : vector<8x128xf32>
    %510 = arith.addf %504, %509 : vector<8x128xf32>
    %c7_370 = arith.constant 7 : index
    %c0_371 = arith.constant 0 : index
    %c0_372 = arith.constant 0 : index
    %511 = vector.load %arg4[%c7_370, %c0_371, %c0_372] : memref<22x8x128xf32, #tpu.memory_space<vmem>>, vector<1x8x128xf32>
    %512 = vector.shape_cast %511 : vector<1x8x128xf32> to vector<8x128xf32>
    %c3_373 = arith.constant 3 : index
    %c0_374 = arith.constant 0 : index
    %c0_375 = arith.constant 0 : index
    %513 = vector.load %arg5[%c3_373, %c0_374, %c0_375] : memref<22x8x128xf32, #tpu.memory_space<vmem>>, vector<1x8x128xf32>
    %514 = vector.shape_cast %513 : vector<1x8x128xf32> to vector<8x128xf32>
    %515 = arith.mulf %512, %514 : vector<8x128xf32>
    %516 = arith.subf %510, %515 : vector<8x128xf32>
    %c6_376 = arith.constant 6 : index
    %c0_377 = arith.constant 0 : index
    %c0_378 = arith.constant 0 : index
    %517 = vector.load %arg4[%c6_376, %c0_377, %c0_378] : memref<22x8x128xf32, #tpu.memory_space<vmem>>, vector<1x8x128xf32>
    %518 = vector.shape_cast %517 : vector<1x8x128xf32> to vector<8x128xf32>
    %c6_379 = arith.constant 6 : index
    %c0_380 = arith.constant 0 : index
    %c0_381 = arith.constant 0 : index
    %519 = vector.load %arg5[%c6_379, %c0_380, %c0_381] : memref<22x8x128xf32, #tpu.memory_space<vmem>>, vector<1x8x128xf32>
    %520 = vector.shape_cast %519 : vector<1x8x128xf32> to vector<8x128xf32>
    %521 = arith.mulf %493, %518 : vector<8x128xf32>
    %522 = arith.mulf %516, %520 : vector<8x128xf32>
    %523 = arith.subf %521, %522 : vector<8x128xf32>
    %524 = arith.mulf %493, %520 : vector<8x128xf32>
    %525 = arith.mulf %516, %518 : vector<8x128xf32>
    %526 = arith.addf %524, %525 : vector<8x128xf32>
    %c0_382 = arith.constant 0 : index
    %c5_383 = arith.constant 5 : index
    %527 = memref.load %arg1[%c0_382, %c5_383] : memref<2x20xf32, #tpu.memory_space<smem>>
    %c0_384 = arith.constant 0 : index
    %c5_385 = arith.constant 5 : index
    %528 = memref.load %arg2[%c0_384, %c5_385] : memref<2x20xf32, #tpu.memory_space<smem>>
    %529 = vector.broadcast %527 : f32 to vector<8x128xf32>
    %530 = arith.mulf %529, %523 : vector<8x128xf32>
    %531 = vector.broadcast %528 : f32 to vector<8x128xf32>
    %532 = arith.mulf %531, %526 : vector<8x128xf32>
    %533 = arith.subf %530, %532 : vector<8x128xf32>
    %534 = arith.addf %440, %533 : vector<8x128xf32>
    %535 = vector.broadcast %527 : f32 to vector<8x128xf32>
    %536 = arith.mulf %535, %526 : vector<8x128xf32>
    %537 = vector.broadcast %528 : f32 to vector<8x128xf32>
    %538 = arith.mulf %537, %523 : vector<8x128xf32>
    %539 = arith.addf %536, %538 : vector<8x128xf32>
    %540 = arith.addf %446, %539 : vector<8x128xf32>
    %c7_386 = arith.constant 7 : index
    %c0_387 = arith.constant 0 : index
    %c0_388 = arith.constant 0 : index
    %541 = vector.load %arg4[%c7_386, %c0_387, %c0_388] : memref<22x8x128xf32, #tpu.memory_space<vmem>>, vector<1x8x128xf32>
    %542 = vector.shape_cast %541 : vector<1x8x128xf32> to vector<8x128xf32>
    %c7_389 = arith.constant 7 : index
    %c0_390 = arith.constant 0 : index
    %c0_391 = arith.constant 0 : index
    %543 = vector.load %arg5[%c7_389, %c0_390, %c0_391] : memref<22x8x128xf32, #tpu.memory_space<vmem>>, vector<1x8x128xf32>
    %544 = vector.shape_cast %543 : vector<1x8x128xf32> to vector<8x128xf32>
    %545 = arith.mulf %493, %542 : vector<8x128xf32>
    %546 = arith.mulf %516, %544 : vector<8x128xf32>
    %547 = arith.subf %545, %546 : vector<8x128xf32>
    %548 = arith.mulf %493, %544 : vector<8x128xf32>
    %549 = arith.mulf %516, %542 : vector<8x128xf32>
    %550 = arith.addf %548, %549 : vector<8x128xf32>
    %c1_392 = arith.constant 1 : index
    %c5_393 = arith.constant 5 : index
    %551 = memref.load %arg1[%c1_392, %c5_393] : memref<2x20xf32, #tpu.memory_space<smem>>
    %c1_394 = arith.constant 1 : index
    %c5_395 = arith.constant 5 : index
    %552 = memref.load %arg2[%c1_394, %c5_395] : memref<2x20xf32, #tpu.memory_space<smem>>
    %553 = vector.broadcast %551 : f32 to vector<8x128xf32>
    %554 = arith.mulf %553, %547 : vector<8x128xf32>
    %555 = vector.broadcast %552 : f32 to vector<8x128xf32>
    %556 = arith.mulf %555, %550 : vector<8x128xf32>
    %557 = arith.subf %554, %556 : vector<8x128xf32>
    %558 = arith.addf %464, %557 : vector<8x128xf32>
    %559 = vector.broadcast %551 : f32 to vector<8x128xf32>
    %560 = arith.mulf %559, %550 : vector<8x128xf32>
    %561 = vector.broadcast %552 : f32 to vector<8x128xf32>
    %562 = arith.mulf %561, %547 : vector<8x128xf32>
    %563 = arith.addf %560, %562 : vector<8x128xf32>
    %564 = arith.addf %470, %563 : vector<8x128xf32>
    %c8_396 = arith.constant 8 : index
    %c0_397 = arith.constant 0 : index
    %c0_398 = arith.constant 0 : index
    %565 = vector.load %arg4[%c8_396, %c0_397, %c0_398] : memref<22x8x128xf32, #tpu.memory_space<vmem>>, vector<1x8x128xf32>
    %566 = vector.shape_cast %565 : vector<1x8x128xf32> to vector<8x128xf32>
    %c4_399 = arith.constant 4 : index
    %c0_400 = arith.constant 0 : index
    %c0_401 = arith.constant 0 : index
    %567 = vector.load %arg4[%c4_399, %c0_400, %c0_401] : memref<22x8x128xf32, #tpu.memory_space<vmem>>, vector<1x8x128xf32>
    %568 = vector.shape_cast %567 : vector<1x8x128xf32> to vector<8x128xf32>
    %569 = arith.mulf %566, %568 : vector<8x128xf32>
    %c8_402 = arith.constant 8 : index
    %c0_403 = arith.constant 0 : index
    %c0_404 = arith.constant 0 : index
    %570 = vector.load %arg5[%c8_402, %c0_403, %c0_404] : memref<22x8x128xf32, #tpu.memory_space<vmem>>, vector<1x8x128xf32>
    %571 = vector.shape_cast %570 : vector<1x8x128xf32> to vector<8x128xf32>
    %c4_405 = arith.constant 4 : index
    %c0_406 = arith.constant 0 : index
    %c0_407 = arith.constant 0 : index
    %572 = vector.load %arg5[%c4_405, %c0_406, %c0_407] : memref<22x8x128xf32, #tpu.memory_space<vmem>>, vector<1x8x128xf32>
    %573 = vector.shape_cast %572 : vector<1x8x128xf32> to vector<8x128xf32>
    %574 = arith.mulf %571, %573 : vector<8x128xf32>
    %575 = arith.addf %569, %574 : vector<8x128xf32>
    %c9_408 = arith.constant 9 : index
    %c0_409 = arith.constant 0 : index
    %c0_410 = arith.constant 0 : index
    %576 = vector.load %arg4[%c9_408, %c0_409, %c0_410] : memref<22x8x128xf32, #tpu.memory_space<vmem>>, vector<1x8x128xf32>
    %577 = vector.shape_cast %576 : vector<1x8x128xf32> to vector<8x128xf32>
    %c5_411 = arith.constant 5 : index
    %c0_412 = arith.constant 0 : index
    %c0_413 = arith.constant 0 : index
    %578 = vector.load %arg4[%c5_411, %c0_412, %c0_413] : memref<22x8x128xf32, #tpu.memory_space<vmem>>, vector<1x8x128xf32>
    %579 = vector.shape_cast %578 : vector<1x8x128xf32> to vector<8x128xf32>
    %580 = arith.mulf %577, %579 : vector<8x128xf32>
    %581 = arith.addf %575, %580 : vector<8x128xf32>
    %c9_414 = arith.constant 9 : index
    %c0_415 = arith.constant 0 : index
    %c0_416 = arith.constant 0 : index
    %582 = vector.load %arg5[%c9_414, %c0_415, %c0_416] : memref<22x8x128xf32, #tpu.memory_space<vmem>>, vector<1x8x128xf32>
    %583 = vector.shape_cast %582 : vector<1x8x128xf32> to vector<8x128xf32>
    %c5_417 = arith.constant 5 : index
    %c0_418 = arith.constant 0 : index
    %c0_419 = arith.constant 0 : index
    %584 = vector.load %arg5[%c5_417, %c0_418, %c0_419] : memref<22x8x128xf32, #tpu.memory_space<vmem>>, vector<1x8x128xf32>
    %585 = vector.shape_cast %584 : vector<1x8x128xf32> to vector<8x128xf32>
    %586 = arith.mulf %583, %585 : vector<8x128xf32>
    %587 = arith.addf %581, %586 : vector<8x128xf32>
    %c8_420 = arith.constant 8 : index
    %c0_421 = arith.constant 0 : index
    %c0_422 = arith.constant 0 : index
    %588 = vector.load %arg5[%c8_420, %c0_421, %c0_422] : memref<22x8x128xf32, #tpu.memory_space<vmem>>, vector<1x8x128xf32>
    %589 = vector.shape_cast %588 : vector<1x8x128xf32> to vector<8x128xf32>
    %c4_423 = arith.constant 4 : index
    %c0_424 = arith.constant 0 : index
    %c0_425 = arith.constant 0 : index
    %590 = vector.load %arg4[%c4_423, %c0_424, %c0_425] : memref<22x8x128xf32, #tpu.memory_space<vmem>>, vector<1x8x128xf32>
    %591 = vector.shape_cast %590 : vector<1x8x128xf32> to vector<8x128xf32>
    %592 = arith.mulf %589, %591 : vector<8x128xf32>
    %c8_426 = arith.constant 8 : index
    %c0_427 = arith.constant 0 : index
    %c0_428 = arith.constant 0 : index
    %593 = vector.load %arg4[%c8_426, %c0_427, %c0_428] : memref<22x8x128xf32, #tpu.memory_space<vmem>>, vector<1x8x128xf32>
    %594 = vector.shape_cast %593 : vector<1x8x128xf32> to vector<8x128xf32>
    %c4_429 = arith.constant 4 : index
    %c0_430 = arith.constant 0 : index
    %c0_431 = arith.constant 0 : index
    %595 = vector.load %arg5[%c4_429, %c0_430, %c0_431] : memref<22x8x128xf32, #tpu.memory_space<vmem>>, vector<1x8x128xf32>
    %596 = vector.shape_cast %595 : vector<1x8x128xf32> to vector<8x128xf32>
    %597 = arith.mulf %594, %596 : vector<8x128xf32>
    %598 = arith.subf %592, %597 : vector<8x128xf32>
    %c9_432 = arith.constant 9 : index
    %c0_433 = arith.constant 0 : index
    %c0_434 = arith.constant 0 : index
    %599 = vector.load %arg5[%c9_432, %c0_433, %c0_434] : memref<22x8x128xf32, #tpu.memory_space<vmem>>, vector<1x8x128xf32>
    %600 = vector.shape_cast %599 : vector<1x8x128xf32> to vector<8x128xf32>
    %c5_435 = arith.constant 5 : index
    %c0_436 = arith.constant 0 : index
    %c0_437 = arith.constant 0 : index
    %601 = vector.load %arg4[%c5_435, %c0_436, %c0_437] : memref<22x8x128xf32, #tpu.memory_space<vmem>>, vector<1x8x128xf32>
    %602 = vector.shape_cast %601 : vector<1x8x128xf32> to vector<8x128xf32>
    %603 = arith.mulf %600, %602 : vector<8x128xf32>
    %604 = arith.addf %598, %603 : vector<8x128xf32>
    %c9_438 = arith.constant 9 : index
    %c0_439 = arith.constant 0 : index
    %c0_440 = arith.constant 0 : index
    %605 = vector.load %arg4[%c9_438, %c0_439, %c0_440] : memref<22x8x128xf32, #tpu.memory_space<vmem>>, vector<1x8x128xf32>
    %606 = vector.shape_cast %605 : vector<1x8x128xf32> to vector<8x128xf32>
    %c5_441 = arith.constant 5 : index
    %c0_442 = arith.constant 0 : index
    %c0_443 = arith.constant 0 : index
    %607 = vector.load %arg5[%c5_441, %c0_442, %c0_443] : memref<22x8x128xf32, #tpu.memory_space<vmem>>, vector<1x8x128xf32>
    %608 = vector.shape_cast %607 : vector<1x8x128xf32> to vector<8x128xf32>
    %609 = arith.mulf %606, %608 : vector<8x128xf32>
    %610 = arith.subf %604, %609 : vector<8x128xf32>
    %c6_444 = arith.constant 6 : index
    %c0_445 = arith.constant 0 : index
    %c0_446 = arith.constant 0 : index
    %611 = vector.load %arg4[%c6_444, %c0_445, %c0_446] : memref<22x8x128xf32, #tpu.memory_space<vmem>>, vector<1x8x128xf32>
    %612 = vector.shape_cast %611 : vector<1x8x128xf32> to vector<8x128xf32>
    %c6_447 = arith.constant 6 : index
    %c0_448 = arith.constant 0 : index
    %c0_449 = arith.constant 0 : index
    %613 = vector.load %arg5[%c6_447, %c0_448, %c0_449] : memref<22x8x128xf32, #tpu.memory_space<vmem>>, vector<1x8x128xf32>
    %614 = vector.shape_cast %613 : vector<1x8x128xf32> to vector<8x128xf32>
    %615 = arith.mulf %587, %612 : vector<8x128xf32>
    %616 = arith.mulf %610, %614 : vector<8x128xf32>
    %617 = arith.subf %615, %616 : vector<8x128xf32>
    %618 = arith.mulf %587, %614 : vector<8x128xf32>
    %619 = arith.mulf %610, %612 : vector<8x128xf32>
    %620 = arith.addf %618, %619 : vector<8x128xf32>
    %c0_450 = arith.constant 0 : index
    %c6_451 = arith.constant 6 : index
    %621 = memref.load %arg1[%c0_450, %c6_451] : memref<2x20xf32, #tpu.memory_space<smem>>
    %c0_452 = arith.constant 0 : index
    %c6_453 = arith.constant 6 : index
    %622 = memref.load %arg2[%c0_452, %c6_453] : memref<2x20xf32, #tpu.memory_space<smem>>
    %623 = vector.broadcast %621 : f32 to vector<8x128xf32>
    %624 = arith.mulf %623, %617 : vector<8x128xf32>
    %625 = vector.broadcast %622 : f32 to vector<8x128xf32>
    %626 = arith.mulf %625, %620 : vector<8x128xf32>
    %627 = arith.subf %624, %626 : vector<8x128xf32>
    %628 = arith.addf %534, %627 : vector<8x128xf32>
    %629 = vector.broadcast %621 : f32 to vector<8x128xf32>
    %630 = arith.mulf %629, %620 : vector<8x128xf32>
    %631 = vector.broadcast %622 : f32 to vector<8x128xf32>
    %632 = arith.mulf %631, %617 : vector<8x128xf32>
    %633 = arith.addf %630, %632 : vector<8x128xf32>
    %634 = arith.addf %540, %633 : vector<8x128xf32>
    %c7_454 = arith.constant 7 : index
    %c0_455 = arith.constant 0 : index
    %c0_456 = arith.constant 0 : index
    %635 = vector.load %arg4[%c7_454, %c0_455, %c0_456] : memref<22x8x128xf32, #tpu.memory_space<vmem>>, vector<1x8x128xf32>
    %636 = vector.shape_cast %635 : vector<1x8x128xf32> to vector<8x128xf32>
    %c7_457 = arith.constant 7 : index
    %c0_458 = arith.constant 0 : index
    %c0_459 = arith.constant 0 : index
    %637 = vector.load %arg5[%c7_457, %c0_458, %c0_459] : memref<22x8x128xf32, #tpu.memory_space<vmem>>, vector<1x8x128xf32>
    %638 = vector.shape_cast %637 : vector<1x8x128xf32> to vector<8x128xf32>
    %639 = arith.mulf %587, %636 : vector<8x128xf32>
    %640 = arith.mulf %610, %638 : vector<8x128xf32>
    %641 = arith.subf %639, %640 : vector<8x128xf32>
    %642 = arith.mulf %587, %638 : vector<8x128xf32>
    %643 = arith.mulf %610, %636 : vector<8x128xf32>
    %644 = arith.addf %642, %643 : vector<8x128xf32>
    %c1_460 = arith.constant 1 : index
    %c6_461 = arith.constant 6 : index
    %645 = memref.load %arg1[%c1_460, %c6_461] : memref<2x20xf32, #tpu.memory_space<smem>>
    %c1_462 = arith.constant 1 : index
    %c6_463 = arith.constant 6 : index
    %646 = memref.load %arg2[%c1_462, %c6_463] : memref<2x20xf32, #tpu.memory_space<smem>>
    %647 = vector.broadcast %645 : f32 to vector<8x128xf32>
    %648 = arith.mulf %647, %641 : vector<8x128xf32>
    %649 = vector.broadcast %646 : f32 to vector<8x128xf32>
    %650 = arith.mulf %649, %644 : vector<8x128xf32>
    %651 = arith.subf %648, %650 : vector<8x128xf32>
    %652 = arith.addf %558, %651 : vector<8x128xf32>
    %653 = vector.broadcast %645 : f32 to vector<8x128xf32>
    %654 = arith.mulf %653, %644 : vector<8x128xf32>
    %655 = vector.broadcast %646 : f32 to vector<8x128xf32>
    %656 = arith.mulf %655, %641 : vector<8x128xf32>
    %657 = arith.addf %654, %656 : vector<8x128xf32>
    %658 = arith.addf %564, %657 : vector<8x128xf32>
    %c12_464 = arith.constant 12 : index
    %c0_465 = arith.constant 0 : index
    %c0_466 = arith.constant 0 : index
    %659 = vector.load %arg4[%c12_464, %c0_465, %c0_466] : memref<22x8x128xf32, #tpu.memory_space<vmem>>, vector<1x8x128xf32>
    %660 = vector.shape_cast %659 : vector<1x8x128xf32> to vector<8x128xf32>
    %c8_467 = arith.constant 8 : index
    %c0_468 = arith.constant 0 : index
    %c0_469 = arith.constant 0 : index
    %661 = vector.load %arg4[%c8_467, %c0_468, %c0_469] : memref<22x8x128xf32, #tpu.memory_space<vmem>>, vector<1x8x128xf32>
    %662 = vector.shape_cast %661 : vector<1x8x128xf32> to vector<8x128xf32>
    %663 = arith.mulf %660, %662 : vector<8x128xf32>
    %c12_470 = arith.constant 12 : index
    %c0_471 = arith.constant 0 : index
    %c0_472 = arith.constant 0 : index
    %664 = vector.load %arg5[%c12_470, %c0_471, %c0_472] : memref<22x8x128xf32, #tpu.memory_space<vmem>>, vector<1x8x128xf32>
    %665 = vector.shape_cast %664 : vector<1x8x128xf32> to vector<8x128xf32>
    %c8_473 = arith.constant 8 : index
    %c0_474 = arith.constant 0 : index
    %c0_475 = arith.constant 0 : index
    %666 = vector.load %arg5[%c8_473, %c0_474, %c0_475] : memref<22x8x128xf32, #tpu.memory_space<vmem>>, vector<1x8x128xf32>
    %667 = vector.shape_cast %666 : vector<1x8x128xf32> to vector<8x128xf32>
    %668 = arith.mulf %665, %667 : vector<8x128xf32>
    %669 = arith.addf %663, %668 : vector<8x128xf32>
    %c13_476 = arith.constant 13 : index
    %c0_477 = arith.constant 0 : index
    %c0_478 = arith.constant 0 : index
    %670 = vector.load %arg4[%c13_476, %c0_477, %c0_478] : memref<22x8x128xf32, #tpu.memory_space<vmem>>, vector<1x8x128xf32>
    %671 = vector.shape_cast %670 : vector<1x8x128xf32> to vector<8x128xf32>
    %c9_479 = arith.constant 9 : index
    %c0_480 = arith.constant 0 : index
    %c0_481 = arith.constant 0 : index
    %672 = vector.load %arg4[%c9_479, %c0_480, %c0_481] : memref<22x8x128xf32, #tpu.memory_space<vmem>>, vector<1x8x128xf32>
    %673 = vector.shape_cast %672 : vector<1x8x128xf32> to vector<8x128xf32>
    %674 = arith.mulf %671, %673 : vector<8x128xf32>
    %675 = arith.addf %669, %674 : vector<8x128xf32>
    %c13_482 = arith.constant 13 : index
    %c0_483 = arith.constant 0 : index
    %c0_484 = arith.constant 0 : index
    %676 = vector.load %arg5[%c13_482, %c0_483, %c0_484] : memref<22x8x128xf32, #tpu.memory_space<vmem>>, vector<1x8x128xf32>
    %677 = vector.shape_cast %676 : vector<1x8x128xf32> to vector<8x128xf32>
    %c9_485 = arith.constant 9 : index
    %c0_486 = arith.constant 0 : index
    %c0_487 = arith.constant 0 : index
    %678 = vector.load %arg5[%c9_485, %c0_486, %c0_487] : memref<22x8x128xf32, #tpu.memory_space<vmem>>, vector<1x8x128xf32>
    %679 = vector.shape_cast %678 : vector<1x8x128xf32> to vector<8x128xf32>
    %680 = arith.mulf %677, %679 : vector<8x128xf32>
    %681 = arith.addf %675, %680 : vector<8x128xf32>
    %c12_488 = arith.constant 12 : index
    %c0_489 = arith.constant 0 : index
    %c0_490 = arith.constant 0 : index
    %682 = vector.load %arg5[%c12_488, %c0_489, %c0_490] : memref<22x8x128xf32, #tpu.memory_space<vmem>>, vector<1x8x128xf32>
    %683 = vector.shape_cast %682 : vector<1x8x128xf32> to vector<8x128xf32>
    %c8_491 = arith.constant 8 : index
    %c0_492 = arith.constant 0 : index
    %c0_493 = arith.constant 0 : index
    %684 = vector.load %arg4[%c8_491, %c0_492, %c0_493] : memref<22x8x128xf32, #tpu.memory_space<vmem>>, vector<1x8x128xf32>
    %685 = vector.shape_cast %684 : vector<1x8x128xf32> to vector<8x128xf32>
    %686 = arith.mulf %683, %685 : vector<8x128xf32>
    %c12_494 = arith.constant 12 : index
    %c0_495 = arith.constant 0 : index
    %c0_496 = arith.constant 0 : index
    %687 = vector.load %arg4[%c12_494, %c0_495, %c0_496] : memref<22x8x128xf32, #tpu.memory_space<vmem>>, vector<1x8x128xf32>
    %688 = vector.shape_cast %687 : vector<1x8x128xf32> to vector<8x128xf32>
    %c8_497 = arith.constant 8 : index
    %c0_498 = arith.constant 0 : index
    %c0_499 = arith.constant 0 : index
    %689 = vector.load %arg5[%c8_497, %c0_498, %c0_499] : memref<22x8x128xf32, #tpu.memory_space<vmem>>, vector<1x8x128xf32>
    %690 = vector.shape_cast %689 : vector<1x8x128xf32> to vector<8x128xf32>
    %691 = arith.mulf %688, %690 : vector<8x128xf32>
    %692 = arith.subf %686, %691 : vector<8x128xf32>
    %c13_500 = arith.constant 13 : index
    %c0_501 = arith.constant 0 : index
    %c0_502 = arith.constant 0 : index
    %693 = vector.load %arg5[%c13_500, %c0_501, %c0_502] : memref<22x8x128xf32, #tpu.memory_space<vmem>>, vector<1x8x128xf32>
    %694 = vector.shape_cast %693 : vector<1x8x128xf32> to vector<8x128xf32>
    %c9_503 = arith.constant 9 : index
    %c0_504 = arith.constant 0 : index
    %c0_505 = arith.constant 0 : index
    %695 = vector.load %arg4[%c9_503, %c0_504, %c0_505] : memref<22x8x128xf32, #tpu.memory_space<vmem>>, vector<1x8x128xf32>
    %696 = vector.shape_cast %695 : vector<1x8x128xf32> to vector<8x128xf32>
    %697 = arith.mulf %694, %696 : vector<8x128xf32>
    %698 = arith.addf %692, %697 : vector<8x128xf32>
    %c13_506 = arith.constant 13 : index
    %c0_507 = arith.constant 0 : index
    %c0_508 = arith.constant 0 : index
    %699 = vector.load %arg4[%c13_506, %c0_507, %c0_508] : memref<22x8x128xf32, #tpu.memory_space<vmem>>, vector<1x8x128xf32>
    %700 = vector.shape_cast %699 : vector<1x8x128xf32> to vector<8x128xf32>
    %c9_509 = arith.constant 9 : index
    %c0_510 = arith.constant 0 : index
    %c0_511 = arith.constant 0 : index
    %701 = vector.load %arg5[%c9_509, %c0_510, %c0_511] : memref<22x8x128xf32, #tpu.memory_space<vmem>>, vector<1x8x128xf32>
    %702 = vector.shape_cast %701 : vector<1x8x128xf32> to vector<8x128xf32>
    %703 = arith.mulf %700, %702 : vector<8x128xf32>
    %704 = arith.subf %698, %703 : vector<8x128xf32>
    %c6_512 = arith.constant 6 : index
    %c0_513 = arith.constant 0 : index
    %c0_514 = arith.constant 0 : index
    %705 = vector.load %arg4[%c6_512, %c0_513, %c0_514] : memref<22x8x128xf32, #tpu.memory_space<vmem>>, vector<1x8x128xf32>
    %706 = vector.shape_cast %705 : vector<1x8x128xf32> to vector<8x128xf32>
    %c6_515 = arith.constant 6 : index
    %c0_516 = arith.constant 0 : index
    %c0_517 = arith.constant 0 : index
    %707 = vector.load %arg5[%c6_515, %c0_516, %c0_517] : memref<22x8x128xf32, #tpu.memory_space<vmem>>, vector<1x8x128xf32>
    %708 = vector.shape_cast %707 : vector<1x8x128xf32> to vector<8x128xf32>
    %709 = arith.mulf %681, %706 : vector<8x128xf32>
    %710 = arith.mulf %704, %708 : vector<8x128xf32>
    %711 = arith.subf %709, %710 : vector<8x128xf32>
    %712 = arith.mulf %681, %708 : vector<8x128xf32>
    %713 = arith.mulf %704, %706 : vector<8x128xf32>
    %714 = arith.addf %712, %713 : vector<8x128xf32>
    %c0_518 = arith.constant 0 : index
    %c7_519 = arith.constant 7 : index
    %715 = memref.load %arg1[%c0_518, %c7_519] : memref<2x20xf32, #tpu.memory_space<smem>>
    %c0_520 = arith.constant 0 : index
    %c7_521 = arith.constant 7 : index
    %716 = memref.load %arg2[%c0_520, %c7_521] : memref<2x20xf32, #tpu.memory_space<smem>>
    %717 = vector.broadcast %715 : f32 to vector<8x128xf32>
    %718 = arith.mulf %717, %711 : vector<8x128xf32>
    %719 = vector.broadcast %716 : f32 to vector<8x128xf32>
    %720 = arith.mulf %719, %714 : vector<8x128xf32>
    %721 = arith.subf %718, %720 : vector<8x128xf32>
    %722 = arith.addf %628, %721 : vector<8x128xf32>
    %723 = vector.broadcast %715 : f32 to vector<8x128xf32>
    %724 = arith.mulf %723, %714 : vector<8x128xf32>
    %725 = vector.broadcast %716 : f32 to vector<8x128xf32>
    %726 = arith.mulf %725, %711 : vector<8x128xf32>
    %727 = arith.addf %724, %726 : vector<8x128xf32>
    %728 = arith.addf %634, %727 : vector<8x128xf32>
    %c7_522 = arith.constant 7 : index
    %c0_523 = arith.constant 0 : index
    %c0_524 = arith.constant 0 : index
    %729 = vector.load %arg4[%c7_522, %c0_523, %c0_524] : memref<22x8x128xf32, #tpu.memory_space<vmem>>, vector<1x8x128xf32>
    %730 = vector.shape_cast %729 : vector<1x8x128xf32> to vector<8x128xf32>
    %c7_525 = arith.constant 7 : index
    %c0_526 = arith.constant 0 : index
    %c0_527 = arith.constant 0 : index
    %731 = vector.load %arg5[%c7_525, %c0_526, %c0_527] : memref<22x8x128xf32, #tpu.memory_space<vmem>>, vector<1x8x128xf32>
    %732 = vector.shape_cast %731 : vector<1x8x128xf32> to vector<8x128xf32>
    %733 = arith.mulf %681, %730 : vector<8x128xf32>
    %734 = arith.mulf %704, %732 : vector<8x128xf32>
    %735 = arith.subf %733, %734 : vector<8x128xf32>
    %736 = arith.mulf %681, %732 : vector<8x128xf32>
    %737 = arith.mulf %704, %730 : vector<8x128xf32>
    %738 = arith.addf %736, %737 : vector<8x128xf32>
    %c1_528 = arith.constant 1 : index
    %c7_529 = arith.constant 7 : index
    %739 = memref.load %arg1[%c1_528, %c7_529] : memref<2x20xf32, #tpu.memory_space<smem>>
    %c1_530 = arith.constant 1 : index
    %c7_531 = arith.constant 7 : index
    %740 = memref.load %arg2[%c1_530, %c7_531] : memref<2x20xf32, #tpu.memory_space<smem>>
    %741 = vector.broadcast %739 : f32 to vector<8x128xf32>
    %742 = arith.mulf %741, %735 : vector<8x128xf32>
    %743 = vector.broadcast %740 : f32 to vector<8x128xf32>
    %744 = arith.mulf %743, %738 : vector<8x128xf32>
    %745 = arith.subf %742, %744 : vector<8x128xf32>
    %746 = arith.addf %652, %745 : vector<8x128xf32>
    %747 = vector.broadcast %739 : f32 to vector<8x128xf32>
    %748 = arith.mulf %747, %738 : vector<8x128xf32>
    %749 = vector.broadcast %740 : f32 to vector<8x128xf32>
    %750 = arith.mulf %749, %735 : vector<8x128xf32>
    %751 = arith.addf %748, %750 : vector<8x128xf32>
    %752 = arith.addf %658, %751 : vector<8x128xf32>
    %c14 = arith.constant 14 : index
    %c0_532 = arith.constant 0 : index
    %c0_533 = arith.constant 0 : index
    %753 = vector.load %arg4[%c14, %c0_532, %c0_533] : memref<22x8x128xf32, #tpu.memory_space<vmem>>, vector<1x8x128xf32>
    %754 = vector.shape_cast %753 : vector<1x8x128xf32> to vector<8x128xf32>
    %c10 = arith.constant 10 : index
    %c0_534 = arith.constant 0 : index
    %c0_535 = arith.constant 0 : index
    %755 = vector.load %arg4[%c10, %c0_534, %c0_535] : memref<22x8x128xf32, #tpu.memory_space<vmem>>, vector<1x8x128xf32>
    %756 = vector.shape_cast %755 : vector<1x8x128xf32> to vector<8x128xf32>
    %757 = arith.mulf %754, %756 : vector<8x128xf32>
    %c14_536 = arith.constant 14 : index
    %c0_537 = arith.constant 0 : index
    %c0_538 = arith.constant 0 : index
    %758 = vector.load %arg5[%c14_536, %c0_537, %c0_538] : memref<22x8x128xf32, #tpu.memory_space<vmem>>, vector<1x8x128xf32>
    %759 = vector.shape_cast %758 : vector<1x8x128xf32> to vector<8x128xf32>
    %c10_539 = arith.constant 10 : index
    %c0_540 = arith.constant 0 : index
    %c0_541 = arith.constant 0 : index
    %760 = vector.load %arg5[%c10_539, %c0_540, %c0_541] : memref<22x8x128xf32, #tpu.memory_space<vmem>>, vector<1x8x128xf32>
    %761 = vector.shape_cast %760 : vector<1x8x128xf32> to vector<8x128xf32>
    %762 = arith.mulf %759, %761 : vector<8x128xf32>
    %763 = arith.addf %757, %762 : vector<8x128xf32>
    %c15 = arith.constant 15 : index
    %c0_542 = arith.constant 0 : index
    %c0_543 = arith.constant 0 : index
    %764 = vector.load %arg4[%c15, %c0_542, %c0_543] : memref<22x8x128xf32, #tpu.memory_space<vmem>>, vector<1x8x128xf32>
    %765 = vector.shape_cast %764 : vector<1x8x128xf32> to vector<8x128xf32>
    %c11 = arith.constant 11 : index
    %c0_544 = arith.constant 0 : index
    %c0_545 = arith.constant 0 : index
    %766 = vector.load %arg4[%c11, %c0_544, %c0_545] : memref<22x8x128xf32, #tpu.memory_space<vmem>>, vector<1x8x128xf32>
    %767 = vector.shape_cast %766 : vector<1x8x128xf32> to vector<8x128xf32>
    %768 = arith.mulf %765, %767 : vector<8x128xf32>
    %769 = arith.addf %763, %768 : vector<8x128xf32>
    %c15_546 = arith.constant 15 : index
    %c0_547 = arith.constant 0 : index
    %c0_548 = arith.constant 0 : index
    %770 = vector.load %arg5[%c15_546, %c0_547, %c0_548] : memref<22x8x128xf32, #tpu.memory_space<vmem>>, vector<1x8x128xf32>
    %771 = vector.shape_cast %770 : vector<1x8x128xf32> to vector<8x128xf32>
    %c11_549 = arith.constant 11 : index
    %c0_550 = arith.constant 0 : index
    %c0_551 = arith.constant 0 : index
    %772 = vector.load %arg5[%c11_549, %c0_550, %c0_551] : memref<22x8x128xf32, #tpu.memory_space<vmem>>, vector<1x8x128xf32>
    %773 = vector.shape_cast %772 : vector<1x8x128xf32> to vector<8x128xf32>
    %774 = arith.mulf %771, %773 : vector<8x128xf32>
    %775 = arith.addf %769, %774 : vector<8x128xf32>
    %c14_552 = arith.constant 14 : index
    %c0_553 = arith.constant 0 : index
    %c0_554 = arith.constant 0 : index
    %776 = vector.load %arg5[%c14_552, %c0_553, %c0_554] : memref<22x8x128xf32, #tpu.memory_space<vmem>>, vector<1x8x128xf32>
    %777 = vector.shape_cast %776 : vector<1x8x128xf32> to vector<8x128xf32>
    %c10_555 = arith.constant 10 : index
    %c0_556 = arith.constant 0 : index
    %c0_557 = arith.constant 0 : index
    %778 = vector.load %arg4[%c10_555, %c0_556, %c0_557] : memref<22x8x128xf32, #tpu.memory_space<vmem>>, vector<1x8x128xf32>
    %779 = vector.shape_cast %778 : vector<1x8x128xf32> to vector<8x128xf32>
    %780 = arith.mulf %777, %779 : vector<8x128xf32>
    %c14_558 = arith.constant 14 : index
    %c0_559 = arith.constant 0 : index
    %c0_560 = arith.constant 0 : index
    %781 = vector.load %arg4[%c14_558, %c0_559, %c0_560] : memref<22x8x128xf32, #tpu.memory_space<vmem>>, vector<1x8x128xf32>
    %782 = vector.shape_cast %781 : vector<1x8x128xf32> to vector<8x128xf32>
    %c10_561 = arith.constant 10 : index
    %c0_562 = arith.constant 0 : index
    %c0_563 = arith.constant 0 : index
    %783 = vector.load %arg5[%c10_561, %c0_562, %c0_563] : memref<22x8x128xf32, #tpu.memory_space<vmem>>, vector<1x8x128xf32>
    %784 = vector.shape_cast %783 : vector<1x8x128xf32> to vector<8x128xf32>
    %785 = arith.mulf %782, %784 : vector<8x128xf32>
    %786 = arith.subf %780, %785 : vector<8x128xf32>
    %c15_564 = arith.constant 15 : index
    %c0_565 = arith.constant 0 : index
    %c0_566 = arith.constant 0 : index
    %787 = vector.load %arg5[%c15_564, %c0_565, %c0_566] : memref<22x8x128xf32, #tpu.memory_space<vmem>>, vector<1x8x128xf32>
    %788 = vector.shape_cast %787 : vector<1x8x128xf32> to vector<8x128xf32>
    %c11_567 = arith.constant 11 : index
    %c0_568 = arith.constant 0 : index
    %c0_569 = arith.constant 0 : index
    %789 = vector.load %arg4[%c11_567, %c0_568, %c0_569] : memref<22x8x128xf32, #tpu.memory_space<vmem>>, vector<1x8x128xf32>
    %790 = vector.shape_cast %789 : vector<1x8x128xf32> to vector<8x128xf32>
    %791 = arith.mulf %788, %790 : vector<8x128xf32>
    %792 = arith.addf %786, %791 : vector<8x128xf32>
    %c15_570 = arith.constant 15 : index
    %c0_571 = arith.constant 0 : index
    %c0_572 = arith.constant 0 : index
    %793 = vector.load %arg4[%c15_570, %c0_571, %c0_572] : memref<22x8x128xf32, #tpu.memory_space<vmem>>, vector<1x8x128xf32>
    %794 = vector.shape_cast %793 : vector<1x8x128xf32> to vector<8x128xf32>
    %c11_573 = arith.constant 11 : index
    %c0_574 = arith.constant 0 : index
    %c0_575 = arith.constant 0 : index
    %795 = vector.load %arg5[%c11_573, %c0_574, %c0_575] : memref<22x8x128xf32, #tpu.memory_space<vmem>>, vector<1x8x128xf32>
    %796 = vector.shape_cast %795 : vector<1x8x128xf32> to vector<8x128xf32>
    %797 = arith.mulf %794, %796 : vector<8x128xf32>
    %798 = arith.subf %792, %797 : vector<8x128xf32>
    %c6_576 = arith.constant 6 : index
    %c0_577 = arith.constant 0 : index
    %c0_578 = arith.constant 0 : index
    %799 = vector.load %arg4[%c6_576, %c0_577, %c0_578] : memref<22x8x128xf32, #tpu.memory_space<vmem>>, vector<1x8x128xf32>
    %800 = vector.shape_cast %799 : vector<1x8x128xf32> to vector<8x128xf32>
    %c6_579 = arith.constant 6 : index
    %c0_580 = arith.constant 0 : index
    %c0_581 = arith.constant 0 : index
    %801 = vector.load %arg5[%c6_579, %c0_580, %c0_581] : memref<22x8x128xf32, #tpu.memory_space<vmem>>, vector<1x8x128xf32>
    %802 = vector.shape_cast %801 : vector<1x8x128xf32> to vector<8x128xf32>
    %803 = arith.mulf %775, %800 : vector<8x128xf32>
    %804 = arith.mulf %798, %802 : vector<8x128xf32>
    %805 = arith.subf %803, %804 : vector<8x128xf32>
    %806 = arith.mulf %775, %802 : vector<8x128xf32>
    %807 = arith.mulf %798, %800 : vector<8x128xf32>
    %808 = arith.addf %806, %807 : vector<8x128xf32>
    %c0_582 = arith.constant 0 : index
    %c8_583 = arith.constant 8 : index
    %809 = memref.load %arg1[%c0_582, %c8_583] : memref<2x20xf32, #tpu.memory_space<smem>>
    %c0_584 = arith.constant 0 : index
    %c8_585 = arith.constant 8 : index
    %810 = memref.load %arg2[%c0_584, %c8_585] : memref<2x20xf32, #tpu.memory_space<smem>>
    %811 = vector.broadcast %809 : f32 to vector<8x128xf32>
    %812 = arith.mulf %811, %805 : vector<8x128xf32>
    %813 = vector.broadcast %810 : f32 to vector<8x128xf32>
    %814 = arith.mulf %813, %808 : vector<8x128xf32>
    %815 = arith.subf %812, %814 : vector<8x128xf32>
    %816 = arith.addf %722, %815 : vector<8x128xf32>
    %817 = vector.broadcast %809 : f32 to vector<8x128xf32>
    %818 = arith.mulf %817, %808 : vector<8x128xf32>
    %819 = vector.broadcast %810 : f32 to vector<8x128xf32>
    %820 = arith.mulf %819, %805 : vector<8x128xf32>
    %821 = arith.addf %818, %820 : vector<8x128xf32>
    %822 = arith.addf %728, %821 : vector<8x128xf32>
    %c7_586 = arith.constant 7 : index
    %c0_587 = arith.constant 0 : index
    %c0_588 = arith.constant 0 : index
    %823 = vector.load %arg4[%c7_586, %c0_587, %c0_588] : memref<22x8x128xf32, #tpu.memory_space<vmem>>, vector<1x8x128xf32>
    %824 = vector.shape_cast %823 : vector<1x8x128xf32> to vector<8x128xf32>
    %c7_589 = arith.constant 7 : index
    %c0_590 = arith.constant 0 : index
    %c0_591 = arith.constant 0 : index
    %825 = vector.load %arg5[%c7_589, %c0_590, %c0_591] : memref<22x8x128xf32, #tpu.memory_space<vmem>>, vector<1x8x128xf32>
    %826 = vector.shape_cast %825 : vector<1x8x128xf32> to vector<8x128xf32>
    %827 = arith.mulf %775, %824 : vector<8x128xf32>
    %828 = arith.mulf %798, %826 : vector<8x128xf32>
    %829 = arith.subf %827, %828 : vector<8x128xf32>
    %830 = arith.mulf %775, %826 : vector<8x128xf32>
    %831 = arith.mulf %798, %824 : vector<8x128xf32>
    %832 = arith.addf %830, %831 : vector<8x128xf32>
    %c1_592 = arith.constant 1 : index
    %c8_593 = arith.constant 8 : index
    %833 = memref.load %arg1[%c1_592, %c8_593] : memref<2x20xf32, #tpu.memory_space<smem>>
    %c1_594 = arith.constant 1 : index
    %c8_595 = arith.constant 8 : index
    %834 = memref.load %arg2[%c1_594, %c8_595] : memref<2x20xf32, #tpu.memory_space<smem>>
    %835 = vector.broadcast %833 : f32 to vector<8x128xf32>
    %836 = arith.mulf %835, %829 : vector<8x128xf32>
    %837 = vector.broadcast %834 : f32 to vector<8x128xf32>
    %838 = arith.mulf %837, %832 : vector<8x128xf32>
    %839 = arith.subf %836, %838 : vector<8x128xf32>
    %840 = arith.addf %746, %839 : vector<8x128xf32>
    %841 = vector.broadcast %833 : f32 to vector<8x128xf32>
    %842 = arith.mulf %841, %832 : vector<8x128xf32>
    %843 = vector.broadcast %834 : f32 to vector<8x128xf32>
    %844 = arith.mulf %843, %829 : vector<8x128xf32>
    %845 = arith.addf %842, %844 : vector<8x128xf32>
    %846 = arith.addf %752, %845 : vector<8x128xf32>
    %c8_596 = arith.constant 8 : index
    %c0_597 = arith.constant 0 : index
    %c0_598 = arith.constant 0 : index
    %847 = vector.load %arg4[%c8_596, %c0_597, %c0_598] : memref<22x8x128xf32, #tpu.memory_space<vmem>>, vector<1x8x128xf32>
    %848 = vector.shape_cast %847 : vector<1x8x128xf32> to vector<8x128xf32>
    %c6_599 = arith.constant 6 : index
    %c0_600 = arith.constant 0 : index
    %c0_601 = arith.constant 0 : index
    %849 = vector.load %arg4[%c6_599, %c0_600, %c0_601] : memref<22x8x128xf32, #tpu.memory_space<vmem>>, vector<1x8x128xf32>
    %850 = vector.shape_cast %849 : vector<1x8x128xf32> to vector<8x128xf32>
    %851 = arith.mulf %848, %850 : vector<8x128xf32>
    %c8_602 = arith.constant 8 : index
    %c0_603 = arith.constant 0 : index
    %c0_604 = arith.constant 0 : index
    %852 = vector.load %arg5[%c8_602, %c0_603, %c0_604] : memref<22x8x128xf32, #tpu.memory_space<vmem>>, vector<1x8x128xf32>
    %853 = vector.shape_cast %852 : vector<1x8x128xf32> to vector<8x128xf32>
    %c6_605 = arith.constant 6 : index
    %c0_606 = arith.constant 0 : index
    %c0_607 = arith.constant 0 : index
    %854 = vector.load %arg5[%c6_605, %c0_606, %c0_607] : memref<22x8x128xf32, #tpu.memory_space<vmem>>, vector<1x8x128xf32>
    %855 = vector.shape_cast %854 : vector<1x8x128xf32> to vector<8x128xf32>
    %856 = arith.mulf %853, %855 : vector<8x128xf32>
    %857 = arith.addf %851, %856 : vector<8x128xf32>
    %c9_608 = arith.constant 9 : index
    %c0_609 = arith.constant 0 : index
    %c0_610 = arith.constant 0 : index
    %858 = vector.load %arg4[%c9_608, %c0_609, %c0_610] : memref<22x8x128xf32, #tpu.memory_space<vmem>>, vector<1x8x128xf32>
    %859 = vector.shape_cast %858 : vector<1x8x128xf32> to vector<8x128xf32>
    %c7_611 = arith.constant 7 : index
    %c0_612 = arith.constant 0 : index
    %c0_613 = arith.constant 0 : index
    %860 = vector.load %arg4[%c7_611, %c0_612, %c0_613] : memref<22x8x128xf32, #tpu.memory_space<vmem>>, vector<1x8x128xf32>
    %861 = vector.shape_cast %860 : vector<1x8x128xf32> to vector<8x128xf32>
    %862 = arith.mulf %859, %861 : vector<8x128xf32>
    %863 = arith.addf %857, %862 : vector<8x128xf32>
    %c9_614 = arith.constant 9 : index
    %c0_615 = arith.constant 0 : index
    %c0_616 = arith.constant 0 : index
    %864 = vector.load %arg5[%c9_614, %c0_615, %c0_616] : memref<22x8x128xf32, #tpu.memory_space<vmem>>, vector<1x8x128xf32>
    %865 = vector.shape_cast %864 : vector<1x8x128xf32> to vector<8x128xf32>
    %c7_617 = arith.constant 7 : index
    %c0_618 = arith.constant 0 : index
    %c0_619 = arith.constant 0 : index
    %866 = vector.load %arg5[%c7_617, %c0_618, %c0_619] : memref<22x8x128xf32, #tpu.memory_space<vmem>>, vector<1x8x128xf32>
    %867 = vector.shape_cast %866 : vector<1x8x128xf32> to vector<8x128xf32>
    %868 = arith.mulf %865, %867 : vector<8x128xf32>
    %869 = arith.addf %863, %868 : vector<8x128xf32>
    %c8_620 = arith.constant 8 : index
    %c0_621 = arith.constant 0 : index
    %c0_622 = arith.constant 0 : index
    %870 = vector.load %arg5[%c8_620, %c0_621, %c0_622] : memref<22x8x128xf32, #tpu.memory_space<vmem>>, vector<1x8x128xf32>
    %871 = vector.shape_cast %870 : vector<1x8x128xf32> to vector<8x128xf32>
    %c6_623 = arith.constant 6 : index
    %c0_624 = arith.constant 0 : index
    %c0_625 = arith.constant 0 : index
    %872 = vector.load %arg4[%c6_623, %c0_624, %c0_625] : memref<22x8x128xf32, #tpu.memory_space<vmem>>, vector<1x8x128xf32>
    %873 = vector.shape_cast %872 : vector<1x8x128xf32> to vector<8x128xf32>
    %874 = arith.mulf %871, %873 : vector<8x128xf32>
    %c8_626 = arith.constant 8 : index
    %c0_627 = arith.constant 0 : index
    %c0_628 = arith.constant 0 : index
    %875 = vector.load %arg4[%c8_626, %c0_627, %c0_628] : memref<22x8x128xf32, #tpu.memory_space<vmem>>, vector<1x8x128xf32>
    %876 = vector.shape_cast %875 : vector<1x8x128xf32> to vector<8x128xf32>
    %c6_629 = arith.constant 6 : index
    %c0_630 = arith.constant 0 : index
    %c0_631 = arith.constant 0 : index
    %877 = vector.load %arg5[%c6_629, %c0_630, %c0_631] : memref<22x8x128xf32, #tpu.memory_space<vmem>>, vector<1x8x128xf32>
    %878 = vector.shape_cast %877 : vector<1x8x128xf32> to vector<8x128xf32>
    %879 = arith.mulf %876, %878 : vector<8x128xf32>
    %880 = arith.subf %874, %879 : vector<8x128xf32>
    %c9_632 = arith.constant 9 : index
    %c0_633 = arith.constant 0 : index
    %c0_634 = arith.constant 0 : index
    %881 = vector.load %arg5[%c9_632, %c0_633, %c0_634] : memref<22x8x128xf32, #tpu.memory_space<vmem>>, vector<1x8x128xf32>
    %882 = vector.shape_cast %881 : vector<1x8x128xf32> to vector<8x128xf32>
    %c7_635 = arith.constant 7 : index
    %c0_636 = arith.constant 0 : index
    %c0_637 = arith.constant 0 : index
    %883 = vector.load %arg4[%c7_635, %c0_636, %c0_637] : memref<22x8x128xf32, #tpu.memory_space<vmem>>, vector<1x8x128xf32>
    %884 = vector.shape_cast %883 : vector<1x8x128xf32> to vector<8x128xf32>
    %885 = arith.mulf %882, %884 : vector<8x128xf32>
    %886 = arith.addf %880, %885 : vector<8x128xf32>
    %c9_638 = arith.constant 9 : index
    %c0_639 = arith.constant 0 : index
    %c0_640 = arith.constant 0 : index
    %887 = vector.load %arg4[%c9_638, %c0_639, %c0_640] : memref<22x8x128xf32, #tpu.memory_space<vmem>>, vector<1x8x128xf32>
    %888 = vector.shape_cast %887 : vector<1x8x128xf32> to vector<8x128xf32>
    %c7_641 = arith.constant 7 : index
    %c0_642 = arith.constant 0 : index
    %c0_643 = arith.constant 0 : index
    %889 = vector.load %arg5[%c7_641, %c0_642, %c0_643] : memref<22x8x128xf32, #tpu.memory_space<vmem>>, vector<1x8x128xf32>
    %890 = vector.shape_cast %889 : vector<1x8x128xf32> to vector<8x128xf32>
    %891 = arith.mulf %888, %890 : vector<8x128xf32>
    %892 = arith.subf %886, %891 : vector<8x128xf32>
    %c8_644 = arith.constant 8 : index
    %c0_645 = arith.constant 0 : index
    %c0_646 = arith.constant 0 : index
    %893 = vector.load %arg4[%c8_644, %c0_645, %c0_646] : memref<22x8x128xf32, #tpu.memory_space<vmem>>, vector<1x8x128xf32>
    %894 = vector.shape_cast %893 : vector<1x8x128xf32> to vector<8x128xf32>
    %c8_647 = arith.constant 8 : index
    %c0_648 = arith.constant 0 : index
    %c0_649 = arith.constant 0 : index
    %895 = vector.load %arg5[%c8_647, %c0_648, %c0_649] : memref<22x8x128xf32, #tpu.memory_space<vmem>>, vector<1x8x128xf32>
    %896 = vector.shape_cast %895 : vector<1x8x128xf32> to vector<8x128xf32>
    %897 = arith.mulf %869, %894 : vector<8x128xf32>
    %898 = arith.mulf %892, %896 : vector<8x128xf32>
    %899 = arith.subf %897, %898 : vector<8x128xf32>
    %900 = arith.mulf %869, %896 : vector<8x128xf32>
    %901 = arith.mulf %892, %894 : vector<8x128xf32>
    %902 = arith.addf %900, %901 : vector<8x128xf32>
    %c0_650 = arith.constant 0 : index
    %c9_651 = arith.constant 9 : index
    %903 = memref.load %arg1[%c0_650, %c9_651] : memref<2x20xf32, #tpu.memory_space<smem>>
    %c0_652 = arith.constant 0 : index
    %c9_653 = arith.constant 9 : index
    %904 = memref.load %arg2[%c0_652, %c9_653] : memref<2x20xf32, #tpu.memory_space<smem>>
    %905 = vector.broadcast %903 : f32 to vector<8x128xf32>
    %906 = arith.mulf %905, %899 : vector<8x128xf32>
    %907 = vector.broadcast %904 : f32 to vector<8x128xf32>
    %908 = arith.mulf %907, %902 : vector<8x128xf32>
    %909 = arith.subf %906, %908 : vector<8x128xf32>
    %910 = arith.addf %816, %909 : vector<8x128xf32>
    %911 = vector.broadcast %903 : f32 to vector<8x128xf32>
    %912 = arith.mulf %911, %902 : vector<8x128xf32>
    %913 = vector.broadcast %904 : f32 to vector<8x128xf32>
    %914 = arith.mulf %913, %899 : vector<8x128xf32>
    %915 = arith.addf %912, %914 : vector<8x128xf32>
    %916 = arith.addf %822, %915 : vector<8x128xf32>
    %c9_654 = arith.constant 9 : index
    %c0_655 = arith.constant 0 : index
    %c0_656 = arith.constant 0 : index
    %917 = vector.load %arg4[%c9_654, %c0_655, %c0_656] : memref<22x8x128xf32, #tpu.memory_space<vmem>>, vector<1x8x128xf32>
    %918 = vector.shape_cast %917 : vector<1x8x128xf32> to vector<8x128xf32>
    %c9_657 = arith.constant 9 : index
    %c0_658 = arith.constant 0 : index
    %c0_659 = arith.constant 0 : index
    %919 = vector.load %arg5[%c9_657, %c0_658, %c0_659] : memref<22x8x128xf32, #tpu.memory_space<vmem>>, vector<1x8x128xf32>
    %920 = vector.shape_cast %919 : vector<1x8x128xf32> to vector<8x128xf32>
    %921 = arith.mulf %869, %918 : vector<8x128xf32>
    %922 = arith.mulf %892, %920 : vector<8x128xf32>
    %923 = arith.subf %921, %922 : vector<8x128xf32>
    %924 = arith.mulf %869, %920 : vector<8x128xf32>
    %925 = arith.mulf %892, %918 : vector<8x128xf32>
    %926 = arith.addf %924, %925 : vector<8x128xf32>
    %c1_660 = arith.constant 1 : index
    %c9_661 = arith.constant 9 : index
    %927 = memref.load %arg1[%c1_660, %c9_661] : memref<2x20xf32, #tpu.memory_space<smem>>
    %c1_662 = arith.constant 1 : index
    %c9_663 = arith.constant 9 : index
    %928 = memref.load %arg2[%c1_662, %c9_663] : memref<2x20xf32, #tpu.memory_space<smem>>
    %929 = vector.broadcast %927 : f32 to vector<8x128xf32>
    %930 = arith.mulf %929, %923 : vector<8x128xf32>
    %931 = vector.broadcast %928 : f32 to vector<8x128xf32>
    %932 = arith.mulf %931, %926 : vector<8x128xf32>
    %933 = arith.subf %930, %932 : vector<8x128xf32>
    %934 = arith.addf %840, %933 : vector<8x128xf32>
    %935 = vector.broadcast %927 : f32 to vector<8x128xf32>
    %936 = arith.mulf %935, %926 : vector<8x128xf32>
    %937 = vector.broadcast %928 : f32 to vector<8x128xf32>
    %938 = arith.mulf %937, %923 : vector<8x128xf32>
    %939 = arith.addf %936, %938 : vector<8x128xf32>
    %940 = arith.addf %846, %939 : vector<8x128xf32>
    %c12_664 = arith.constant 12 : index
    %c0_665 = arith.constant 0 : index
    %c0_666 = arith.constant 0 : index
    %941 = vector.load %arg4[%c12_664, %c0_665, %c0_666] : memref<22x8x128xf32, #tpu.memory_space<vmem>>, vector<1x8x128xf32>
    %942 = vector.shape_cast %941 : vector<1x8x128xf32> to vector<8x128xf32>
    %c10_667 = arith.constant 10 : index
    %c0_668 = arith.constant 0 : index
    %c0_669 = arith.constant 0 : index
    %943 = vector.load %arg4[%c10_667, %c0_668, %c0_669] : memref<22x8x128xf32, #tpu.memory_space<vmem>>, vector<1x8x128xf32>
    %944 = vector.shape_cast %943 : vector<1x8x128xf32> to vector<8x128xf32>
    %945 = arith.mulf %942, %944 : vector<8x128xf32>
    %c12_670 = arith.constant 12 : index
    %c0_671 = arith.constant 0 : index
    %c0_672 = arith.constant 0 : index
    %946 = vector.load %arg5[%c12_670, %c0_671, %c0_672] : memref<22x8x128xf32, #tpu.memory_space<vmem>>, vector<1x8x128xf32>
    %947 = vector.shape_cast %946 : vector<1x8x128xf32> to vector<8x128xf32>
    %c10_673 = arith.constant 10 : index
    %c0_674 = arith.constant 0 : index
    %c0_675 = arith.constant 0 : index
    %948 = vector.load %arg5[%c10_673, %c0_674, %c0_675] : memref<22x8x128xf32, #tpu.memory_space<vmem>>, vector<1x8x128xf32>
    %949 = vector.shape_cast %948 : vector<1x8x128xf32> to vector<8x128xf32>
    %950 = arith.mulf %947, %949 : vector<8x128xf32>
    %951 = arith.addf %945, %950 : vector<8x128xf32>
    %c13_676 = arith.constant 13 : index
    %c0_677 = arith.constant 0 : index
    %c0_678 = arith.constant 0 : index
    %952 = vector.load %arg4[%c13_676, %c0_677, %c0_678] : memref<22x8x128xf32, #tpu.memory_space<vmem>>, vector<1x8x128xf32>
    %953 = vector.shape_cast %952 : vector<1x8x128xf32> to vector<8x128xf32>
    %c11_679 = arith.constant 11 : index
    %c0_680 = arith.constant 0 : index
    %c0_681 = arith.constant 0 : index
    %954 = vector.load %arg4[%c11_679, %c0_680, %c0_681] : memref<22x8x128xf32, #tpu.memory_space<vmem>>, vector<1x8x128xf32>
    %955 = vector.shape_cast %954 : vector<1x8x128xf32> to vector<8x128xf32>
    %956 = arith.mulf %953, %955 : vector<8x128xf32>
    %957 = arith.addf %951, %956 : vector<8x128xf32>
    %c13_682 = arith.constant 13 : index
    %c0_683 = arith.constant 0 : index
    %c0_684 = arith.constant 0 : index
    %958 = vector.load %arg5[%c13_682, %c0_683, %c0_684] : memref<22x8x128xf32, #tpu.memory_space<vmem>>, vector<1x8x128xf32>
    %959 = vector.shape_cast %958 : vector<1x8x128xf32> to vector<8x128xf32>
    %c11_685 = arith.constant 11 : index
    %c0_686 = arith.constant 0 : index
    %c0_687 = arith.constant 0 : index
    %960 = vector.load %arg5[%c11_685, %c0_686, %c0_687] : memref<22x8x128xf32, #tpu.memory_space<vmem>>, vector<1x8x128xf32>
    %961 = vector.shape_cast %960 : vector<1x8x128xf32> to vector<8x128xf32>
    %962 = arith.mulf %959, %961 : vector<8x128xf32>
    %963 = arith.addf %957, %962 : vector<8x128xf32>
    %c12_688 = arith.constant 12 : index
    %c0_689 = arith.constant 0 : index
    %c0_690 = arith.constant 0 : index
    %964 = vector.load %arg5[%c12_688, %c0_689, %c0_690] : memref<22x8x128xf32, #tpu.memory_space<vmem>>, vector<1x8x128xf32>
    %965 = vector.shape_cast %964 : vector<1x8x128xf32> to vector<8x128xf32>
    %c10_691 = arith.constant 10 : index
    %c0_692 = arith.constant 0 : index
    %c0_693 = arith.constant 0 : index
    %966 = vector.load %arg4[%c10_691, %c0_692, %c0_693] : memref<22x8x128xf32, #tpu.memory_space<vmem>>, vector<1x8x128xf32>
    %967 = vector.shape_cast %966 : vector<1x8x128xf32> to vector<8x128xf32>
    %968 = arith.mulf %965, %967 : vector<8x128xf32>
    %c12_694 = arith.constant 12 : index
    %c0_695 = arith.constant 0 : index
    %c0_696 = arith.constant 0 : index
    %969 = vector.load %arg4[%c12_694, %c0_695, %c0_696] : memref<22x8x128xf32, #tpu.memory_space<vmem>>, vector<1x8x128xf32>
    %970 = vector.shape_cast %969 : vector<1x8x128xf32> to vector<8x128xf32>
    %c10_697 = arith.constant 10 : index
    %c0_698 = arith.constant 0 : index
    %c0_699 = arith.constant 0 : index
    %971 = vector.load %arg5[%c10_697, %c0_698, %c0_699] : memref<22x8x128xf32, #tpu.memory_space<vmem>>, vector<1x8x128xf32>
    %972 = vector.shape_cast %971 : vector<1x8x128xf32> to vector<8x128xf32>
    %973 = arith.mulf %970, %972 : vector<8x128xf32>
    %974 = arith.subf %968, %973 : vector<8x128xf32>
    %c13_700 = arith.constant 13 : index
    %c0_701 = arith.constant 0 : index
    %c0_702 = arith.constant 0 : index
    %975 = vector.load %arg5[%c13_700, %c0_701, %c0_702] : memref<22x8x128xf32, #tpu.memory_space<vmem>>, vector<1x8x128xf32>
    %976 = vector.shape_cast %975 : vector<1x8x128xf32> to vector<8x128xf32>
    %c11_703 = arith.constant 11 : index
    %c0_704 = arith.constant 0 : index
    %c0_705 = arith.constant 0 : index
    %977 = vector.load %arg4[%c11_703, %c0_704, %c0_705] : memref<22x8x128xf32, #tpu.memory_space<vmem>>, vector<1x8x128xf32>
    %978 = vector.shape_cast %977 : vector<1x8x128xf32> to vector<8x128xf32>
    %979 = arith.mulf %976, %978 : vector<8x128xf32>
    %980 = arith.addf %974, %979 : vector<8x128xf32>
    %c13_706 = arith.constant 13 : index
    %c0_707 = arith.constant 0 : index
    %c0_708 = arith.constant 0 : index
    %981 = vector.load %arg4[%c13_706, %c0_707, %c0_708] : memref<22x8x128xf32, #tpu.memory_space<vmem>>, vector<1x8x128xf32>
    %982 = vector.shape_cast %981 : vector<1x8x128xf32> to vector<8x128xf32>
    %c11_709 = arith.constant 11 : index
    %c0_710 = arith.constant 0 : index
    %c0_711 = arith.constant 0 : index
    %983 = vector.load %arg5[%c11_709, %c0_710, %c0_711] : memref<22x8x128xf32, #tpu.memory_space<vmem>>, vector<1x8x128xf32>
    %984 = vector.shape_cast %983 : vector<1x8x128xf32> to vector<8x128xf32>
    %985 = arith.mulf %982, %984 : vector<8x128xf32>
    %986 = arith.subf %980, %985 : vector<8x128xf32>
    %c8_712 = arith.constant 8 : index
    %c0_713 = arith.constant 0 : index
    %c0_714 = arith.constant 0 : index
    %987 = vector.load %arg4[%c8_712, %c0_713, %c0_714] : memref<22x8x128xf32, #tpu.memory_space<vmem>>, vector<1x8x128xf32>
    %988 = vector.shape_cast %987 : vector<1x8x128xf32> to vector<8x128xf32>
    %c8_715 = arith.constant 8 : index
    %c0_716 = arith.constant 0 : index
    %c0_717 = arith.constant 0 : index
    %989 = vector.load %arg5[%c8_715, %c0_716, %c0_717] : memref<22x8x128xf32, #tpu.memory_space<vmem>>, vector<1x8x128xf32>
    %990 = vector.shape_cast %989 : vector<1x8x128xf32> to vector<8x128xf32>
    %991 = arith.mulf %963, %988 : vector<8x128xf32>
    %992 = arith.mulf %986, %990 : vector<8x128xf32>
    %993 = arith.subf %991, %992 : vector<8x128xf32>
    %994 = arith.mulf %963, %990 : vector<8x128xf32>
    %995 = arith.mulf %986, %988 : vector<8x128xf32>
    %996 = arith.addf %994, %995 : vector<8x128xf32>
    %c0_718 = arith.constant 0 : index
    %c10_719 = arith.constant 10 : index
    %997 = memref.load %arg1[%c0_718, %c10_719] : memref<2x20xf32, #tpu.memory_space<smem>>
    %c0_720 = arith.constant 0 : index
    %c10_721 = arith.constant 10 : index
    %998 = memref.load %arg2[%c0_720, %c10_721] : memref<2x20xf32, #tpu.memory_space<smem>>
    %999 = vector.broadcast %997 : f32 to vector<8x128xf32>
    %1000 = arith.mulf %999, %993 : vector<8x128xf32>
    %1001 = vector.broadcast %998 : f32 to vector<8x128xf32>
    %1002 = arith.mulf %1001, %996 : vector<8x128xf32>
    %1003 = arith.subf %1000, %1002 : vector<8x128xf32>
    %1004 = arith.addf %910, %1003 : vector<8x128xf32>
    %1005 = vector.broadcast %997 : f32 to vector<8x128xf32>
    %1006 = arith.mulf %1005, %996 : vector<8x128xf32>
    %1007 = vector.broadcast %998 : f32 to vector<8x128xf32>
    %1008 = arith.mulf %1007, %993 : vector<8x128xf32>
    %1009 = arith.addf %1006, %1008 : vector<8x128xf32>
    %1010 = arith.addf %916, %1009 : vector<8x128xf32>
    %c9_722 = arith.constant 9 : index
    %c0_723 = arith.constant 0 : index
    %c0_724 = arith.constant 0 : index
    %1011 = vector.load %arg4[%c9_722, %c0_723, %c0_724] : memref<22x8x128xf32, #tpu.memory_space<vmem>>, vector<1x8x128xf32>
    %1012 = vector.shape_cast %1011 : vector<1x8x128xf32> to vector<8x128xf32>
    %c9_725 = arith.constant 9 : index
    %c0_726 = arith.constant 0 : index
    %c0_727 = arith.constant 0 : index
    %1013 = vector.load %arg5[%c9_725, %c0_726, %c0_727] : memref<22x8x128xf32, #tpu.memory_space<vmem>>, vector<1x8x128xf32>
    %1014 = vector.shape_cast %1013 : vector<1x8x128xf32> to vector<8x128xf32>
    %1015 = arith.mulf %963, %1012 : vector<8x128xf32>
    %1016 = arith.mulf %986, %1014 : vector<8x128xf32>
    %1017 = arith.subf %1015, %1016 : vector<8x128xf32>
    %1018 = arith.mulf %963, %1014 : vector<8x128xf32>
    %1019 = arith.mulf %986, %1012 : vector<8x128xf32>
    %1020 = arith.addf %1018, %1019 : vector<8x128xf32>
    %c1_728 = arith.constant 1 : index
    %c10_729 = arith.constant 10 : index
    %1021 = memref.load %arg1[%c1_728, %c10_729] : memref<2x20xf32, #tpu.memory_space<smem>>
    %c1_730 = arith.constant 1 : index
    %c10_731 = arith.constant 10 : index
    %1022 = memref.load %arg2[%c1_730, %c10_731] : memref<2x20xf32, #tpu.memory_space<smem>>
    %1023 = vector.broadcast %1021 : f32 to vector<8x128xf32>
    %1024 = arith.mulf %1023, %1017 : vector<8x128xf32>
    %1025 = vector.broadcast %1022 : f32 to vector<8x128xf32>
    %1026 = arith.mulf %1025, %1020 : vector<8x128xf32>
    %1027 = arith.subf %1024, %1026 : vector<8x128xf32>
    %1028 = arith.addf %934, %1027 : vector<8x128xf32>
    %1029 = vector.broadcast %1021 : f32 to vector<8x128xf32>
    %1030 = arith.mulf %1029, %1020 : vector<8x128xf32>
    %1031 = vector.broadcast %1022 : f32 to vector<8x128xf32>
    %1032 = arith.mulf %1031, %1017 : vector<8x128xf32>
    %1033 = arith.addf %1030, %1032 : vector<8x128xf32>
    %1034 = arith.addf %940, %1033 : vector<8x128xf32>
    %c14_732 = arith.constant 14 : index
    %c0_733 = arith.constant 0 : index
    %c0_734 = arith.constant 0 : index
    %1035 = vector.load %arg4[%c14_732, %c0_733, %c0_734] : memref<22x8x128xf32, #tpu.memory_space<vmem>>, vector<1x8x128xf32>
    %1036 = vector.shape_cast %1035 : vector<1x8x128xf32> to vector<8x128xf32>
    %c12_735 = arith.constant 12 : index
    %c0_736 = arith.constant 0 : index
    %c0_737 = arith.constant 0 : index
    %1037 = vector.load %arg4[%c12_735, %c0_736, %c0_737] : memref<22x8x128xf32, #tpu.memory_space<vmem>>, vector<1x8x128xf32>
    %1038 = vector.shape_cast %1037 : vector<1x8x128xf32> to vector<8x128xf32>
    %1039 = arith.mulf %1036, %1038 : vector<8x128xf32>
    %c14_738 = arith.constant 14 : index
    %c0_739 = arith.constant 0 : index
    %c0_740 = arith.constant 0 : index
    %1040 = vector.load %arg5[%c14_738, %c0_739, %c0_740] : memref<22x8x128xf32, #tpu.memory_space<vmem>>, vector<1x8x128xf32>
    %1041 = vector.shape_cast %1040 : vector<1x8x128xf32> to vector<8x128xf32>
    %c12_741 = arith.constant 12 : index
    %c0_742 = arith.constant 0 : index
    %c0_743 = arith.constant 0 : index
    %1042 = vector.load %arg5[%c12_741, %c0_742, %c0_743] : memref<22x8x128xf32, #tpu.memory_space<vmem>>, vector<1x8x128xf32>
    %1043 = vector.shape_cast %1042 : vector<1x8x128xf32> to vector<8x128xf32>
    %1044 = arith.mulf %1041, %1043 : vector<8x128xf32>
    %1045 = arith.addf %1039, %1044 : vector<8x128xf32>
    %c15_744 = arith.constant 15 : index
    %c0_745 = arith.constant 0 : index
    %c0_746 = arith.constant 0 : index
    %1046 = vector.load %arg4[%c15_744, %c0_745, %c0_746] : memref<22x8x128xf32, #tpu.memory_space<vmem>>, vector<1x8x128xf32>
    %1047 = vector.shape_cast %1046 : vector<1x8x128xf32> to vector<8x128xf32>
    %c13_747 = arith.constant 13 : index
    %c0_748 = arith.constant 0 : index
    %c0_749 = arith.constant 0 : index
    %1048 = vector.load %arg4[%c13_747, %c0_748, %c0_749] : memref<22x8x128xf32, #tpu.memory_space<vmem>>, vector<1x8x128xf32>
    %1049 = vector.shape_cast %1048 : vector<1x8x128xf32> to vector<8x128xf32>
    %1050 = arith.mulf %1047, %1049 : vector<8x128xf32>
    %1051 = arith.addf %1045, %1050 : vector<8x128xf32>
    %c15_750 = arith.constant 15 : index
    %c0_751 = arith.constant 0 : index
    %c0_752 = arith.constant 0 : index
    %1052 = vector.load %arg5[%c15_750, %c0_751, %c0_752] : memref<22x8x128xf32, #tpu.memory_space<vmem>>, vector<1x8x128xf32>
    %1053 = vector.shape_cast %1052 : vector<1x8x128xf32> to vector<8x128xf32>
    %c13_753 = arith.constant 13 : index
    %c0_754 = arith.constant 0 : index
    %c0_755 = arith.constant 0 : index
    %1054 = vector.load %arg5[%c13_753, %c0_754, %c0_755] : memref<22x8x128xf32, #tpu.memory_space<vmem>>, vector<1x8x128xf32>
    %1055 = vector.shape_cast %1054 : vector<1x8x128xf32> to vector<8x128xf32>
    %1056 = arith.mulf %1053, %1055 : vector<8x128xf32>
    %1057 = arith.addf %1051, %1056 : vector<8x128xf32>
    %c14_756 = arith.constant 14 : index
    %c0_757 = arith.constant 0 : index
    %c0_758 = arith.constant 0 : index
    %1058 = vector.load %arg5[%c14_756, %c0_757, %c0_758] : memref<22x8x128xf32, #tpu.memory_space<vmem>>, vector<1x8x128xf32>
    %1059 = vector.shape_cast %1058 : vector<1x8x128xf32> to vector<8x128xf32>
    %c12_759 = arith.constant 12 : index
    %c0_760 = arith.constant 0 : index
    %c0_761 = arith.constant 0 : index
    %1060 = vector.load %arg4[%c12_759, %c0_760, %c0_761] : memref<22x8x128xf32, #tpu.memory_space<vmem>>, vector<1x8x128xf32>
    %1061 = vector.shape_cast %1060 : vector<1x8x128xf32> to vector<8x128xf32>
    %1062 = arith.mulf %1059, %1061 : vector<8x128xf32>
    %c14_762 = arith.constant 14 : index
    %c0_763 = arith.constant 0 : index
    %c0_764 = arith.constant 0 : index
    %1063 = vector.load %arg4[%c14_762, %c0_763, %c0_764] : memref<22x8x128xf32, #tpu.memory_space<vmem>>, vector<1x8x128xf32>
    %1064 = vector.shape_cast %1063 : vector<1x8x128xf32> to vector<8x128xf32>
    %c12_765 = arith.constant 12 : index
    %c0_766 = arith.constant 0 : index
    %c0_767 = arith.constant 0 : index
    %1065 = vector.load %arg5[%c12_765, %c0_766, %c0_767] : memref<22x8x128xf32, #tpu.memory_space<vmem>>, vector<1x8x128xf32>
    %1066 = vector.shape_cast %1065 : vector<1x8x128xf32> to vector<8x128xf32>
    %1067 = arith.mulf %1064, %1066 : vector<8x128xf32>
    %1068 = arith.subf %1062, %1067 : vector<8x128xf32>
    %c15_768 = arith.constant 15 : index
    %c0_769 = arith.constant 0 : index
    %c0_770 = arith.constant 0 : index
    %1069 = vector.load %arg5[%c15_768, %c0_769, %c0_770] : memref<22x8x128xf32, #tpu.memory_space<vmem>>, vector<1x8x128xf32>
    %1070 = vector.shape_cast %1069 : vector<1x8x128xf32> to vector<8x128xf32>
    %c13_771 = arith.constant 13 : index
    %c0_772 = arith.constant 0 : index
    %c0_773 = arith.constant 0 : index
    %1071 = vector.load %arg4[%c13_771, %c0_772, %c0_773] : memref<22x8x128xf32, #tpu.memory_space<vmem>>, vector<1x8x128xf32>
    %1072 = vector.shape_cast %1071 : vector<1x8x128xf32> to vector<8x128xf32>
    %1073 = arith.mulf %1070, %1072 : vector<8x128xf32>
    %1074 = arith.addf %1068, %1073 : vector<8x128xf32>
    %c15_774 = arith.constant 15 : index
    %c0_775 = arith.constant 0 : index
    %c0_776 = arith.constant 0 : index
    %1075 = vector.load %arg4[%c15_774, %c0_775, %c0_776] : memref<22x8x128xf32, #tpu.memory_space<vmem>>, vector<1x8x128xf32>
    %1076 = vector.shape_cast %1075 : vector<1x8x128xf32> to vector<8x128xf32>
    %c13_777 = arith.constant 13 : index
    %c0_778 = arith.constant 0 : index
    %c0_779 = arith.constant 0 : index
    %1077 = vector.load %arg5[%c13_777, %c0_778, %c0_779] : memref<22x8x128xf32, #tpu.memory_space<vmem>>, vector<1x8x128xf32>
    %1078 = vector.shape_cast %1077 : vector<1x8x128xf32> to vector<8x128xf32>
    %1079 = arith.mulf %1076, %1078 : vector<8x128xf32>
    %1080 = arith.subf %1074, %1079 : vector<8x128xf32>
    %c8_780 = arith.constant 8 : index
    %c0_781 = arith.constant 0 : index
    %c0_782 = arith.constant 0 : index
    %1081 = vector.load %arg4[%c8_780, %c0_781, %c0_782] : memref<22x8x128xf32, #tpu.memory_space<vmem>>, vector<1x8x128xf32>
    %1082 = vector.shape_cast %1081 : vector<1x8x128xf32> to vector<8x128xf32>
    %c8_783 = arith.constant 8 : index
    %c0_784 = arith.constant 0 : index
    %c0_785 = arith.constant 0 : index
    %1083 = vector.load %arg5[%c8_783, %c0_784, %c0_785] : memref<22x8x128xf32, #tpu.memory_space<vmem>>, vector<1x8x128xf32>
    %1084 = vector.shape_cast %1083 : vector<1x8x128xf32> to vector<8x128xf32>
    %1085 = arith.mulf %1057, %1082 : vector<8x128xf32>
    %1086 = arith.mulf %1080, %1084 : vector<8x128xf32>
    %1087 = arith.subf %1085, %1086 : vector<8x128xf32>
    %1088 = arith.mulf %1057, %1084 : vector<8x128xf32>
    %1089 = arith.mulf %1080, %1082 : vector<8x128xf32>
    %1090 = arith.addf %1088, %1089 : vector<8x128xf32>
    %c0_786 = arith.constant 0 : index
    %c11_787 = arith.constant 11 : index
    %1091 = memref.load %arg1[%c0_786, %c11_787] : memref<2x20xf32, #tpu.memory_space<smem>>
    %c0_788 = arith.constant 0 : index
    %c11_789 = arith.constant 11 : index
    %1092 = memref.load %arg2[%c0_788, %c11_789] : memref<2x20xf32, #tpu.memory_space<smem>>
    %1093 = vector.broadcast %1091 : f32 to vector<8x128xf32>
    %1094 = arith.mulf %1093, %1087 : vector<8x128xf32>
    %1095 = vector.broadcast %1092 : f32 to vector<8x128xf32>
    %1096 = arith.mulf %1095, %1090 : vector<8x128xf32>
    %1097 = arith.subf %1094, %1096 : vector<8x128xf32>
    %1098 = arith.addf %1004, %1097 : vector<8x128xf32>
    %1099 = vector.broadcast %1091 : f32 to vector<8x128xf32>
    %1100 = arith.mulf %1099, %1090 : vector<8x128xf32>
    %1101 = vector.broadcast %1092 : f32 to vector<8x128xf32>
    %1102 = arith.mulf %1101, %1087 : vector<8x128xf32>
    %1103 = arith.addf %1100, %1102 : vector<8x128xf32>
    %1104 = arith.addf %1010, %1103 : vector<8x128xf32>
    %c9_790 = arith.constant 9 : index
    %c0_791 = arith.constant 0 : index
    %c0_792 = arith.constant 0 : index
    %1105 = vector.load %arg4[%c9_790, %c0_791, %c0_792] : memref<22x8x128xf32, #tpu.memory_space<vmem>>, vector<1x8x128xf32>
    %1106 = vector.shape_cast %1105 : vector<1x8x128xf32> to vector<8x128xf32>
    %c9_793 = arith.constant 9 : index
    %c0_794 = arith.constant 0 : index
    %c0_795 = arith.constant 0 : index
    %1107 = vector.load %arg5[%c9_793, %c0_794, %c0_795] : memref<22x8x128xf32, #tpu.memory_space<vmem>>, vector<1x8x128xf32>
    %1108 = vector.shape_cast %1107 : vector<1x8x128xf32> to vector<8x128xf32>
    %1109 = arith.mulf %1057, %1106 : vector<8x128xf32>
    %1110 = arith.mulf %1080, %1108 : vector<8x128xf32>
    %1111 = arith.subf %1109, %1110 : vector<8x128xf32>
    %1112 = arith.mulf %1057, %1108 : vector<8x128xf32>
    %1113 = arith.mulf %1080, %1106 : vector<8x128xf32>
    %1114 = arith.addf %1112, %1113 : vector<8x128xf32>
    %c1_796 = arith.constant 1 : index
    %c11_797 = arith.constant 11 : index
    %1115 = memref.load %arg1[%c1_796, %c11_797] : memref<2x20xf32, #tpu.memory_space<smem>>
    %c1_798 = arith.constant 1 : index
    %c11_799 = arith.constant 11 : index
    %1116 = memref.load %arg2[%c1_798, %c11_799] : memref<2x20xf32, #tpu.memory_space<smem>>
    %1117 = vector.broadcast %1115 : f32 to vector<8x128xf32>
    %1118 = arith.mulf %1117, %1111 : vector<8x128xf32>
    %1119 = vector.broadcast %1116 : f32 to vector<8x128xf32>
    %1120 = arith.mulf %1119, %1114 : vector<8x128xf32>
    %1121 = arith.subf %1118, %1120 : vector<8x128xf32>
    %1122 = arith.addf %1028, %1121 : vector<8x128xf32>
    %1123 = vector.broadcast %1115 : f32 to vector<8x128xf32>
    %1124 = arith.mulf %1123, %1114 : vector<8x128xf32>
    %1125 = vector.broadcast %1116 : f32 to vector<8x128xf32>
    %1126 = arith.mulf %1125, %1111 : vector<8x128xf32>
    %1127 = arith.addf %1124, %1126 : vector<8x128xf32>
    %1128 = arith.addf %1034, %1127 : vector<8x128xf32>
    %c16 = arith.constant 16 : index
    %c0_800 = arith.constant 0 : index
    %c0_801 = arith.constant 0 : index
    %1129 = vector.load %arg4[%c16, %c0_800, %c0_801] : memref<22x8x128xf32, #tpu.memory_space<vmem>>, vector<1x8x128xf32>
    %1130 = vector.shape_cast %1129 : vector<1x8x128xf32> to vector<8x128xf32>
    %c14_802 = arith.constant 14 : index
    %c0_803 = arith.constant 0 : index
    %c0_804 = arith.constant 0 : index
    %1131 = vector.load %arg4[%c14_802, %c0_803, %c0_804] : memref<22x8x128xf32, #tpu.memory_space<vmem>>, vector<1x8x128xf32>
    %1132 = vector.shape_cast %1131 : vector<1x8x128xf32> to vector<8x128xf32>
    %1133 = arith.mulf %1130, %1132 : vector<8x128xf32>
    %c16_805 = arith.constant 16 : index
    %c0_806 = arith.constant 0 : index
    %c0_807 = arith.constant 0 : index
    %1134 = vector.load %arg5[%c16_805, %c0_806, %c0_807] : memref<22x8x128xf32, #tpu.memory_space<vmem>>, vector<1x8x128xf32>
    %1135 = vector.shape_cast %1134 : vector<1x8x128xf32> to vector<8x128xf32>
    %c14_808 = arith.constant 14 : index
    %c0_809 = arith.constant 0 : index
    %c0_810 = arith.constant 0 : index
    %1136 = vector.load %arg5[%c14_808, %c0_809, %c0_810] : memref<22x8x128xf32, #tpu.memory_space<vmem>>, vector<1x8x128xf32>
    %1137 = vector.shape_cast %1136 : vector<1x8x128xf32> to vector<8x128xf32>
    %1138 = arith.mulf %1135, %1137 : vector<8x128xf32>
    %1139 = arith.addf %1133, %1138 : vector<8x128xf32>
    %c17 = arith.constant 17 : index
    %c0_811 = arith.constant 0 : index
    %c0_812 = arith.constant 0 : index
    %1140 = vector.load %arg4[%c17, %c0_811, %c0_812] : memref<22x8x128xf32, #tpu.memory_space<vmem>>, vector<1x8x128xf32>
    %1141 = vector.shape_cast %1140 : vector<1x8x128xf32> to vector<8x128xf32>
    %c15_813 = arith.constant 15 : index
    %c0_814 = arith.constant 0 : index
    %c0_815 = arith.constant 0 : index
    %1142 = vector.load %arg4[%c15_813, %c0_814, %c0_815] : memref<22x8x128xf32, #tpu.memory_space<vmem>>, vector<1x8x128xf32>
    %1143 = vector.shape_cast %1142 : vector<1x8x128xf32> to vector<8x128xf32>
    %1144 = arith.mulf %1141, %1143 : vector<8x128xf32>
    %1145 = arith.addf %1139, %1144 : vector<8x128xf32>
    %c17_816 = arith.constant 17 : index
    %c0_817 = arith.constant 0 : index
    %c0_818 = arith.constant 0 : index
    %1146 = vector.load %arg5[%c17_816, %c0_817, %c0_818] : memref<22x8x128xf32, #tpu.memory_space<vmem>>, vector<1x8x128xf32>
    %1147 = vector.shape_cast %1146 : vector<1x8x128xf32> to vector<8x128xf32>
    %c15_819 = arith.constant 15 : index
    %c0_820 = arith.constant 0 : index
    %c0_821 = arith.constant 0 : index
    %1148 = vector.load %arg5[%c15_819, %c0_820, %c0_821] : memref<22x8x128xf32, #tpu.memory_space<vmem>>, vector<1x8x128xf32>
    %1149 = vector.shape_cast %1148 : vector<1x8x128xf32> to vector<8x128xf32>
    %1150 = arith.mulf %1147, %1149 : vector<8x128xf32>
    %1151 = arith.addf %1145, %1150 : vector<8x128xf32>
    %c16_822 = arith.constant 16 : index
    %c0_823 = arith.constant 0 : index
    %c0_824 = arith.constant 0 : index
    %1152 = vector.load %arg5[%c16_822, %c0_823, %c0_824] : memref<22x8x128xf32, #tpu.memory_space<vmem>>, vector<1x8x128xf32>
    %1153 = vector.shape_cast %1152 : vector<1x8x128xf32> to vector<8x128xf32>
    %c14_825 = arith.constant 14 : index
    %c0_826 = arith.constant 0 : index
    %c0_827 = arith.constant 0 : index
    %1154 = vector.load %arg4[%c14_825, %c0_826, %c0_827] : memref<22x8x128xf32, #tpu.memory_space<vmem>>, vector<1x8x128xf32>
    %1155 = vector.shape_cast %1154 : vector<1x8x128xf32> to vector<8x128xf32>
    %1156 = arith.mulf %1153, %1155 : vector<8x128xf32>
    %c16_828 = arith.constant 16 : index
    %c0_829 = arith.constant 0 : index
    %c0_830 = arith.constant 0 : index
    %1157 = vector.load %arg4[%c16_828, %c0_829, %c0_830] : memref<22x8x128xf32, #tpu.memory_space<vmem>>, vector<1x8x128xf32>
    %1158 = vector.shape_cast %1157 : vector<1x8x128xf32> to vector<8x128xf32>
    %c14_831 = arith.constant 14 : index
    %c0_832 = arith.constant 0 : index
    %c0_833 = arith.constant 0 : index
    %1159 = vector.load %arg5[%c14_831, %c0_832, %c0_833] : memref<22x8x128xf32, #tpu.memory_space<vmem>>, vector<1x8x128xf32>
    %1160 = vector.shape_cast %1159 : vector<1x8x128xf32> to vector<8x128xf32>
    %1161 = arith.mulf %1158, %1160 : vector<8x128xf32>
    %1162 = arith.subf %1156, %1161 : vector<8x128xf32>
    %c17_834 = arith.constant 17 : index
    %c0_835 = arith.constant 0 : index
    %c0_836 = arith.constant 0 : index
    %1163 = vector.load %arg5[%c17_834, %c0_835, %c0_836] : memref<22x8x128xf32, #tpu.memory_space<vmem>>, vector<1x8x128xf32>
    %1164 = vector.shape_cast %1163 : vector<1x8x128xf32> to vector<8x128xf32>
    %c15_837 = arith.constant 15 : index
    %c0_838 = arith.constant 0 : index
    %c0_839 = arith.constant 0 : index
    %1165 = vector.load %arg4[%c15_837, %c0_838, %c0_839] : memref<22x8x128xf32, #tpu.memory_space<vmem>>, vector<1x8x128xf32>
    %1166 = vector.shape_cast %1165 : vector<1x8x128xf32> to vector<8x128xf32>
    %1167 = arith.mulf %1164, %1166 : vector<8x128xf32>
    %1168 = arith.addf %1162, %1167 : vector<8x128xf32>
    %c17_840 = arith.constant 17 : index
    %c0_841 = arith.constant 0 : index
    %c0_842 = arith.constant 0 : index
    %1169 = vector.load %arg4[%c17_840, %c0_841, %c0_842] : memref<22x8x128xf32, #tpu.memory_space<vmem>>, vector<1x8x128xf32>
    %1170 = vector.shape_cast %1169 : vector<1x8x128xf32> to vector<8x128xf32>
    %c15_843 = arith.constant 15 : index
    %c0_844 = arith.constant 0 : index
    %c0_845 = arith.constant 0 : index
    %1171 = vector.load %arg5[%c15_843, %c0_844, %c0_845] : memref<22x8x128xf32, #tpu.memory_space<vmem>>, vector<1x8x128xf32>
    %1172 = vector.shape_cast %1171 : vector<1x8x128xf32> to vector<8x128xf32>
    %1173 = arith.mulf %1170, %1172 : vector<8x128xf32>
    %1174 = arith.subf %1168, %1173 : vector<8x128xf32>
    %c8_846 = arith.constant 8 : index
    %c0_847 = arith.constant 0 : index
    %c0_848 = arith.constant 0 : index
    %1175 = vector.load %arg4[%c8_846, %c0_847, %c0_848] : memref<22x8x128xf32, #tpu.memory_space<vmem>>, vector<1x8x128xf32>
    %1176 = vector.shape_cast %1175 : vector<1x8x128xf32> to vector<8x128xf32>
    %c8_849 = arith.constant 8 : index
    %c0_850 = arith.constant 0 : index
    %c0_851 = arith.constant 0 : index
    %1177 = vector.load %arg5[%c8_849, %c0_850, %c0_851] : memref<22x8x128xf32, #tpu.memory_space<vmem>>, vector<1x8x128xf32>
    %1178 = vector.shape_cast %1177 : vector<1x8x128xf32> to vector<8x128xf32>
    %1179 = arith.mulf %1151, %1176 : vector<8x128xf32>
    %1180 = arith.mulf %1174, %1178 : vector<8x128xf32>
    %1181 = arith.subf %1179, %1180 : vector<8x128xf32>
    %1182 = arith.mulf %1151, %1178 : vector<8x128xf32>
    %1183 = arith.mulf %1174, %1176 : vector<8x128xf32>
    %1184 = arith.addf %1182, %1183 : vector<8x128xf32>
    %c0_852 = arith.constant 0 : index
    %c12_853 = arith.constant 12 : index
    %1185 = memref.load %arg1[%c0_852, %c12_853] : memref<2x20xf32, #tpu.memory_space<smem>>
    %c0_854 = arith.constant 0 : index
    %c12_855 = arith.constant 12 : index
    %1186 = memref.load %arg2[%c0_854, %c12_855] : memref<2x20xf32, #tpu.memory_space<smem>>
    %1187 = vector.broadcast %1185 : f32 to vector<8x128xf32>
    %1188 = arith.mulf %1187, %1181 : vector<8x128xf32>
    %1189 = vector.broadcast %1186 : f32 to vector<8x128xf32>
    %1190 = arith.mulf %1189, %1184 : vector<8x128xf32>
    %1191 = arith.subf %1188, %1190 : vector<8x128xf32>
    %1192 = arith.addf %1098, %1191 : vector<8x128xf32>
    %1193 = vector.broadcast %1185 : f32 to vector<8x128xf32>
    %1194 = arith.mulf %1193, %1184 : vector<8x128xf32>
    %1195 = vector.broadcast %1186 : f32 to vector<8x128xf32>
    %1196 = arith.mulf %1195, %1181 : vector<8x128xf32>
    %1197 = arith.addf %1194, %1196 : vector<8x128xf32>
    %1198 = arith.addf %1104, %1197 : vector<8x128xf32>
    %c9_856 = arith.constant 9 : index
    %c0_857 = arith.constant 0 : index
    %c0_858 = arith.constant 0 : index
    %1199 = vector.load %arg4[%c9_856, %c0_857, %c0_858] : memref<22x8x128xf32, #tpu.memory_space<vmem>>, vector<1x8x128xf32>
    %1200 = vector.shape_cast %1199 : vector<1x8x128xf32> to vector<8x128xf32>
    %c9_859 = arith.constant 9 : index
    %c0_860 = arith.constant 0 : index
    %c0_861 = arith.constant 0 : index
    %1201 = vector.load %arg5[%c9_859, %c0_860, %c0_861] : memref<22x8x128xf32, #tpu.memory_space<vmem>>, vector<1x8x128xf32>
    %1202 = vector.shape_cast %1201 : vector<1x8x128xf32> to vector<8x128xf32>
    %1203 = arith.mulf %1151, %1200 : vector<8x128xf32>
    %1204 = arith.mulf %1174, %1202 : vector<8x128xf32>
    %1205 = arith.subf %1203, %1204 : vector<8x128xf32>
    %1206 = arith.mulf %1151, %1202 : vector<8x128xf32>
    %1207 = arith.mulf %1174, %1200 : vector<8x128xf32>
    %1208 = arith.addf %1206, %1207 : vector<8x128xf32>
    %c1_862 = arith.constant 1 : index
    %c12_863 = arith.constant 12 : index
    %1209 = memref.load %arg1[%c1_862, %c12_863] : memref<2x20xf32, #tpu.memory_space<smem>>
    %c1_864 = arith.constant 1 : index
    %c12_865 = arith.constant 12 : index
    %1210 = memref.load %arg2[%c1_864, %c12_865] : memref<2x20xf32, #tpu.memory_space<smem>>
    %1211 = vector.broadcast %1209 : f32 to vector<8x128xf32>
    %1212 = arith.mulf %1211, %1205 : vector<8x128xf32>
    %1213 = vector.broadcast %1210 : f32 to vector<8x128xf32>
    %1214 = arith.mulf %1213, %1208 : vector<8x128xf32>
    %1215 = arith.subf %1212, %1214 : vector<8x128xf32>
    %1216 = arith.addf %1122, %1215 : vector<8x128xf32>
    %1217 = vector.broadcast %1209 : f32 to vector<8x128xf32>
    %1218 = arith.mulf %1217, %1208 : vector<8x128xf32>
    %1219 = vector.broadcast %1210 : f32 to vector<8x128xf32>
    %1220 = arith.mulf %1219, %1205 : vector<8x128xf32>
    %1221 = arith.addf %1218, %1220 : vector<8x128xf32>
    %1222 = arith.addf %1128, %1221 : vector<8x128xf32>
    %c18 = arith.constant 18 : index
    %c0_866 = arith.constant 0 : index
    %c0_867 = arith.constant 0 : index
    %1223 = vector.load %arg4[%c18, %c0_866, %c0_867] : memref<22x8x128xf32, #tpu.memory_space<vmem>>, vector<1x8x128xf32>
    %1224 = vector.shape_cast %1223 : vector<1x8x128xf32> to vector<8x128xf32>
    %c16_868 = arith.constant 16 : index
    %c0_869 = arith.constant 0 : index
    %c0_870 = arith.constant 0 : index
    %1225 = vector.load %arg4[%c16_868, %c0_869, %c0_870] : memref<22x8x128xf32, #tpu.memory_space<vmem>>, vector<1x8x128xf32>
    %1226 = vector.shape_cast %1225 : vector<1x8x128xf32> to vector<8x128xf32>
    %1227 = arith.mulf %1224, %1226 : vector<8x128xf32>
    %c18_871 = arith.constant 18 : index
    %c0_872 = arith.constant 0 : index
    %c0_873 = arith.constant 0 : index
    %1228 = vector.load %arg5[%c18_871, %c0_872, %c0_873] : memref<22x8x128xf32, #tpu.memory_space<vmem>>, vector<1x8x128xf32>
    %1229 = vector.shape_cast %1228 : vector<1x8x128xf32> to vector<8x128xf32>
    %c16_874 = arith.constant 16 : index
    %c0_875 = arith.constant 0 : index
    %c0_876 = arith.constant 0 : index
    %1230 = vector.load %arg5[%c16_874, %c0_875, %c0_876] : memref<22x8x128xf32, #tpu.memory_space<vmem>>, vector<1x8x128xf32>
    %1231 = vector.shape_cast %1230 : vector<1x8x128xf32> to vector<8x128xf32>
    %1232 = arith.mulf %1229, %1231 : vector<8x128xf32>
    %1233 = arith.addf %1227, %1232 : vector<8x128xf32>
    %c19 = arith.constant 19 : index
    %c0_877 = arith.constant 0 : index
    %c0_878 = arith.constant 0 : index
    %1234 = vector.load %arg4[%c19, %c0_877, %c0_878] : memref<22x8x128xf32, #tpu.memory_space<vmem>>, vector<1x8x128xf32>
    %1235 = vector.shape_cast %1234 : vector<1x8x128xf32> to vector<8x128xf32>
    %c17_879 = arith.constant 17 : index
    %c0_880 = arith.constant 0 : index
    %c0_881 = arith.constant 0 : index
    %1236 = vector.load %arg4[%c17_879, %c0_880, %c0_881] : memref<22x8x128xf32, #tpu.memory_space<vmem>>, vector<1x8x128xf32>
    %1237 = vector.shape_cast %1236 : vector<1x8x128xf32> to vector<8x128xf32>
    %1238 = arith.mulf %1235, %1237 : vector<8x128xf32>
    %1239 = arith.addf %1233, %1238 : vector<8x128xf32>
    %c19_882 = arith.constant 19 : index
    %c0_883 = arith.constant 0 : index
    %c0_884 = arith.constant 0 : index
    %1240 = vector.load %arg5[%c19_882, %c0_883, %c0_884] : memref<22x8x128xf32, #tpu.memory_space<vmem>>, vector<1x8x128xf32>
    %1241 = vector.shape_cast %1240 : vector<1x8x128xf32> to vector<8x128xf32>
    %c17_885 = arith.constant 17 : index
    %c0_886 = arith.constant 0 : index
    %c0_887 = arith.constant 0 : index
    %1242 = vector.load %arg5[%c17_885, %c0_886, %c0_887] : memref<22x8x128xf32, #tpu.memory_space<vmem>>, vector<1x8x128xf32>
    %1243 = vector.shape_cast %1242 : vector<1x8x128xf32> to vector<8x128xf32>
    %1244 = arith.mulf %1241, %1243 : vector<8x128xf32>
    %1245 = arith.addf %1239, %1244 : vector<8x128xf32>
    %c18_888 = arith.constant 18 : index
    %c0_889 = arith.constant 0 : index
    %c0_890 = arith.constant 0 : index
    %1246 = vector.load %arg5[%c18_888, %c0_889, %c0_890] : memref<22x8x128xf32, #tpu.memory_space<vmem>>, vector<1x8x128xf32>
    %1247 = vector.shape_cast %1246 : vector<1x8x128xf32> to vector<8x128xf32>
    %c16_891 = arith.constant 16 : index
    %c0_892 = arith.constant 0 : index
    %c0_893 = arith.constant 0 : index
    %1248 = vector.load %arg4[%c16_891, %c0_892, %c0_893] : memref<22x8x128xf32, #tpu.memory_space<vmem>>, vector<1x8x128xf32>
    %1249 = vector.shape_cast %1248 : vector<1x8x128xf32> to vector<8x128xf32>
    %1250 = arith.mulf %1247, %1249 : vector<8x128xf32>
    %c18_894 = arith.constant 18 : index
    %c0_895 = arith.constant 0 : index
    %c0_896 = arith.constant 0 : index
    %1251 = vector.load %arg4[%c18_894, %c0_895, %c0_896] : memref<22x8x128xf32, #tpu.memory_space<vmem>>, vector<1x8x128xf32>
    %1252 = vector.shape_cast %1251 : vector<1x8x128xf32> to vector<8x128xf32>
    %c16_897 = arith.constant 16 : index
    %c0_898 = arith.constant 0 : index
    %c0_899 = arith.constant 0 : index
    %1253 = vector.load %arg5[%c16_897, %c0_898, %c0_899] : memref<22x8x128xf32, #tpu.memory_space<vmem>>, vector<1x8x128xf32>
    %1254 = vector.shape_cast %1253 : vector<1x8x128xf32> to vector<8x128xf32>
    %1255 = arith.mulf %1252, %1254 : vector<8x128xf32>
    %1256 = arith.subf %1250, %1255 : vector<8x128xf32>
    %c19_900 = arith.constant 19 : index
    %c0_901 = arith.constant 0 : index
    %c0_902 = arith.constant 0 : index
    %1257 = vector.load %arg5[%c19_900, %c0_901, %c0_902] : memref<22x8x128xf32, #tpu.memory_space<vmem>>, vector<1x8x128xf32>
    %1258 = vector.shape_cast %1257 : vector<1x8x128xf32> to vector<8x128xf32>
    %c17_903 = arith.constant 17 : index
    %c0_904 = arith.constant 0 : index
    %c0_905 = arith.constant 0 : index
    %1259 = vector.load %arg4[%c17_903, %c0_904, %c0_905] : memref<22x8x128xf32, #tpu.memory_space<vmem>>, vector<1x8x128xf32>
    %1260 = vector.shape_cast %1259 : vector<1x8x128xf32> to vector<8x128xf32>
    %1261 = arith.mulf %1258, %1260 : vector<8x128xf32>
    %1262 = arith.addf %1256, %1261 : vector<8x128xf32>
    %c19_906 = arith.constant 19 : index
    %c0_907 = arith.constant 0 : index
    %c0_908 = arith.constant 0 : index
    %1263 = vector.load %arg4[%c19_906, %c0_907, %c0_908] : memref<22x8x128xf32, #tpu.memory_space<vmem>>, vector<1x8x128xf32>
    %1264 = vector.shape_cast %1263 : vector<1x8x128xf32> to vector<8x128xf32>
    %c17_909 = arith.constant 17 : index
    %c0_910 = arith.constant 0 : index
    %c0_911 = arith.constant 0 : index
    %1265 = vector.load %arg5[%c17_909, %c0_910, %c0_911] : memref<22x8x128xf32, #tpu.memory_space<vmem>>, vector<1x8x128xf32>
    %1266 = vector.shape_cast %1265 : vector<1x8x128xf32> to vector<8x128xf32>
    %1267 = arith.mulf %1264, %1266 : vector<8x128xf32>
    %1268 = arith.subf %1262, %1267 : vector<8x128xf32>
    %c8_912 = arith.constant 8 : index
    %c0_913 = arith.constant 0 : index
    %c0_914 = arith.constant 0 : index
    %1269 = vector.load %arg4[%c8_912, %c0_913, %c0_914] : memref<22x8x128xf32, #tpu.memory_space<vmem>>, vector<1x8x128xf32>
    %1270 = vector.shape_cast %1269 : vector<1x8x128xf32> to vector<8x128xf32>
    %c8_915 = arith.constant 8 : index
    %c0_916 = arith.constant 0 : index
    %c0_917 = arith.constant 0 : index
    %1271 = vector.load %arg5[%c8_915, %c0_916, %c0_917] : memref<22x8x128xf32, #tpu.memory_space<vmem>>, vector<1x8x128xf32>
    %1272 = vector.shape_cast %1271 : vector<1x8x128xf32> to vector<8x128xf32>
    %1273 = arith.mulf %1245, %1270 : vector<8x128xf32>
    %1274 = arith.mulf %1268, %1272 : vector<8x128xf32>
    %1275 = arith.subf %1273, %1274 : vector<8x128xf32>
    %1276 = arith.mulf %1245, %1272 : vector<8x128xf32>
    %1277 = arith.mulf %1268, %1270 : vector<8x128xf32>
    %1278 = arith.addf %1276, %1277 : vector<8x128xf32>
    %c0_918 = arith.constant 0 : index
    %c13_919 = arith.constant 13 : index
    %1279 = memref.load %arg1[%c0_918, %c13_919] : memref<2x20xf32, #tpu.memory_space<smem>>
    %c0_920 = arith.constant 0 : index
    %c13_921 = arith.constant 13 : index
    %1280 = memref.load %arg2[%c0_920, %c13_921] : memref<2x20xf32, #tpu.memory_space<smem>>
    %1281 = vector.broadcast %1279 : f32 to vector<8x128xf32>
    %1282 = arith.mulf %1281, %1275 : vector<8x128xf32>
    %1283 = vector.broadcast %1280 : f32 to vector<8x128xf32>
    %1284 = arith.mulf %1283, %1278 : vector<8x128xf32>
    %1285 = arith.subf %1282, %1284 : vector<8x128xf32>
    %1286 = arith.addf %1192, %1285 : vector<8x128xf32>
    %1287 = vector.broadcast %1279 : f32 to vector<8x128xf32>
    %1288 = arith.mulf %1287, %1278 : vector<8x128xf32>
    %1289 = vector.broadcast %1280 : f32 to vector<8x128xf32>
    %1290 = arith.mulf %1289, %1275 : vector<8x128xf32>
    %1291 = arith.addf %1288, %1290 : vector<8x128xf32>
    %1292 = arith.addf %1198, %1291 : vector<8x128xf32>
    %c9_922 = arith.constant 9 : index
    %c0_923 = arith.constant 0 : index
    %c0_924 = arith.constant 0 : index
    %1293 = vector.load %arg4[%c9_922, %c0_923, %c0_924] : memref<22x8x128xf32, #tpu.memory_space<vmem>>, vector<1x8x128xf32>
    %1294 = vector.shape_cast %1293 : vector<1x8x128xf32> to vector<8x128xf32>
    %c9_925 = arith.constant 9 : index
    %c0_926 = arith.constant 0 : index
    %c0_927 = arith.constant 0 : index
    %1295 = vector.load %arg5[%c9_925, %c0_926, %c0_927] : memref<22x8x128xf32, #tpu.memory_space<vmem>>, vector<1x8x128xf32>
    %1296 = vector.shape_cast %1295 : vector<1x8x128xf32> to vector<8x128xf32>
    %1297 = arith.mulf %1245, %1294 : vector<8x128xf32>
    %1298 = arith.mulf %1268, %1296 : vector<8x128xf32>
    %1299 = arith.subf %1297, %1298 : vector<8x128xf32>
    %1300 = arith.mulf %1245, %1296 : vector<8x128xf32>
    %1301 = arith.mulf %1268, %1294 : vector<8x128xf32>
    %1302 = arith.addf %1300, %1301 : vector<8x128xf32>
    %c1_928 = arith.constant 1 : index
    %c13_929 = arith.constant 13 : index
    %1303 = memref.load %arg1[%c1_928, %c13_929] : memref<2x20xf32, #tpu.memory_space<smem>>
    %c1_930 = arith.constant 1 : index
    %c13_931 = arith.constant 13 : index
    %1304 = memref.load %arg2[%c1_930, %c13_931] : memref<2x20xf32, #tpu.memory_space<smem>>
    %1305 = vector.broadcast %1303 : f32 to vector<8x128xf32>
    %1306 = arith.mulf %1305, %1299 : vector<8x128xf32>
    %1307 = vector.broadcast %1304 : f32 to vector<8x128xf32>
    %1308 = arith.mulf %1307, %1302 : vector<8x128xf32>
    %1309 = arith.subf %1306, %1308 : vector<8x128xf32>
    %1310 = arith.addf %1216, %1309 : vector<8x128xf32>
    %1311 = vector.broadcast %1303 : f32 to vector<8x128xf32>
    %1312 = arith.mulf %1311, %1302 : vector<8x128xf32>
    %1313 = vector.broadcast %1304 : f32 to vector<8x128xf32>
    %1314 = arith.mulf %1313, %1299 : vector<8x128xf32>
    %1315 = arith.addf %1312, %1314 : vector<8x128xf32>
    %1316 = arith.addf %1222, %1315 : vector<8x128xf32>
    %c20 = arith.constant 20 : index
    %c0_932 = arith.constant 0 : index
    %c0_933 = arith.constant 0 : index
    %1317 = vector.load %arg4[%c20, %c0_932, %c0_933] : memref<22x8x128xf32, #tpu.memory_space<vmem>>, vector<1x8x128xf32>
    %1318 = vector.shape_cast %1317 : vector<1x8x128xf32> to vector<8x128xf32>
    %c18_934 = arith.constant 18 : index
    %c0_935 = arith.constant 0 : index
    %c0_936 = arith.constant 0 : index
    %1319 = vector.load %arg4[%c18_934, %c0_935, %c0_936] : memref<22x8x128xf32, #tpu.memory_space<vmem>>, vector<1x8x128xf32>
    %1320 = vector.shape_cast %1319 : vector<1x8x128xf32> to vector<8x128xf32>
    %1321 = arith.mulf %1318, %1320 : vector<8x128xf32>
    %c20_937 = arith.constant 20 : index
    %c0_938 = arith.constant 0 : index
    %c0_939 = arith.constant 0 : index
    %1322 = vector.load %arg5[%c20_937, %c0_938, %c0_939] : memref<22x8x128xf32, #tpu.memory_space<vmem>>, vector<1x8x128xf32>
    %1323 = vector.shape_cast %1322 : vector<1x8x128xf32> to vector<8x128xf32>
    %c18_940 = arith.constant 18 : index
    %c0_941 = arith.constant 0 : index
    %c0_942 = arith.constant 0 : index
    %1324 = vector.load %arg5[%c18_940, %c0_941, %c0_942] : memref<22x8x128xf32, #tpu.memory_space<vmem>>, vector<1x8x128xf32>
    %1325 = vector.shape_cast %1324 : vector<1x8x128xf32> to vector<8x128xf32>
    %1326 = arith.mulf %1323, %1325 : vector<8x128xf32>
    %1327 = arith.addf %1321, %1326 : vector<8x128xf32>
    %c21 = arith.constant 21 : index
    %c0_943 = arith.constant 0 : index
    %c0_944 = arith.constant 0 : index
    %1328 = vector.load %arg4[%c21, %c0_943, %c0_944] : memref<22x8x128xf32, #tpu.memory_space<vmem>>, vector<1x8x128xf32>
    %1329 = vector.shape_cast %1328 : vector<1x8x128xf32> to vector<8x128xf32>
    %c19_945 = arith.constant 19 : index
    %c0_946 = arith.constant 0 : index
    %c0_947 = arith.constant 0 : index
    %1330 = vector.load %arg4[%c19_945, %c0_946, %c0_947] : memref<22x8x128xf32, #tpu.memory_space<vmem>>, vector<1x8x128xf32>
    %1331 = vector.shape_cast %1330 : vector<1x8x128xf32> to vector<8x128xf32>
    %1332 = arith.mulf %1329, %1331 : vector<8x128xf32>
    %1333 = arith.addf %1327, %1332 : vector<8x128xf32>
    %c21_948 = arith.constant 21 : index
    %c0_949 = arith.constant 0 : index
    %c0_950 = arith.constant 0 : index
    %1334 = vector.load %arg5[%c21_948, %c0_949, %c0_950] : memref<22x8x128xf32, #tpu.memory_space<vmem>>, vector<1x8x128xf32>
    %1335 = vector.shape_cast %1334 : vector<1x8x128xf32> to vector<8x128xf32>
    %c19_951 = arith.constant 19 : index
    %c0_952 = arith.constant 0 : index
    %c0_953 = arith.constant 0 : index
    %1336 = vector.load %arg5[%c19_951, %c0_952, %c0_953] : memref<22x8x128xf32, #tpu.memory_space<vmem>>, vector<1x8x128xf32>
    %1337 = vector.shape_cast %1336 : vector<1x8x128xf32> to vector<8x128xf32>
    %1338 = arith.mulf %1335, %1337 : vector<8x128xf32>
    %1339 = arith.addf %1333, %1338 : vector<8x128xf32>
    %c20_954 = arith.constant 20 : index
    %c0_955 = arith.constant 0 : index
    %c0_956 = arith.constant 0 : index
    %1340 = vector.load %arg5[%c20_954, %c0_955, %c0_956] : memref<22x8x128xf32, #tpu.memory_space<vmem>>, vector<1x8x128xf32>
    %1341 = vector.shape_cast %1340 : vector<1x8x128xf32> to vector<8x128xf32>
    %c18_957 = arith.constant 18 : index
    %c0_958 = arith.constant 0 : index
    %c0_959 = arith.constant 0 : index
    %1342 = vector.load %arg4[%c18_957, %c0_958, %c0_959] : memref<22x8x128xf32, #tpu.memory_space<vmem>>, vector<1x8x128xf32>
    %1343 = vector.shape_cast %1342 : vector<1x8x128xf32> to vector<8x128xf32>
    %1344 = arith.mulf %1341, %1343 : vector<8x128xf32>
    %c20_960 = arith.constant 20 : index
    %c0_961 = arith.constant 0 : index
    %c0_962 = arith.constant 0 : index
    %1345 = vector.load %arg4[%c20_960, %c0_961, %c0_962] : memref<22x8x128xf32, #tpu.memory_space<vmem>>, vector<1x8x128xf32>
    %1346 = vector.shape_cast %1345 : vector<1x8x128xf32> to vector<8x128xf32>
    %c18_963 = arith.constant 18 : index
    %c0_964 = arith.constant 0 : index
    %c0_965 = arith.constant 0 : index
    %1347 = vector.load %arg5[%c18_963, %c0_964, %c0_965] : memref<22x8x128xf32, #tpu.memory_space<vmem>>, vector<1x8x128xf32>
    %1348 = vector.shape_cast %1347 : vector<1x8x128xf32> to vector<8x128xf32>
    %1349 = arith.mulf %1346, %1348 : vector<8x128xf32>
    %1350 = arith.subf %1344, %1349 : vector<8x128xf32>
    %c21_966 = arith.constant 21 : index
    %c0_967 = arith.constant 0 : index
    %c0_968 = arith.constant 0 : index
    %1351 = vector.load %arg5[%c21_966, %c0_967, %c0_968] : memref<22x8x128xf32, #tpu.memory_space<vmem>>, vector<1x8x128xf32>
    %1352 = vector.shape_cast %1351 : vector<1x8x128xf32> to vector<8x128xf32>
    %c19_969 = arith.constant 19 : index
    %c0_970 = arith.constant 0 : index
    %c0_971 = arith.constant 0 : index
    %1353 = vector.load %arg4[%c19_969, %c0_970, %c0_971] : memref<22x8x128xf32, #tpu.memory_space<vmem>>, vector<1x8x128xf32>
    %1354 = vector.shape_cast %1353 : vector<1x8x128xf32> to vector<8x128xf32>
    %1355 = arith.mulf %1352, %1354 : vector<8x128xf32>
    %1356 = arith.addf %1350, %1355 : vector<8x128xf32>
    %c21_972 = arith.constant 21 : index
    %c0_973 = arith.constant 0 : index
    %c0_974 = arith.constant 0 : index
    %1357 = vector.load %arg4[%c21_972, %c0_973, %c0_974] : memref<22x8x128xf32, #tpu.memory_space<vmem>>, vector<1x8x128xf32>
    %1358 = vector.shape_cast %1357 : vector<1x8x128xf32> to vector<8x128xf32>
    %c19_975 = arith.constant 19 : index
    %c0_976 = arith.constant 0 : index
    %c0_977 = arith.constant 0 : index
    %1359 = vector.load %arg5[%c19_975, %c0_976, %c0_977] : memref<22x8x128xf32, #tpu.memory_space<vmem>>, vector<1x8x128xf32>
    %1360 = vector.shape_cast %1359 : vector<1x8x128xf32> to vector<8x128xf32>
    %1361 = arith.mulf %1358, %1360 : vector<8x128xf32>
    %1362 = arith.subf %1356, %1361 : vector<8x128xf32>
    %c8_978 = arith.constant 8 : index
    %c0_979 = arith.constant 0 : index
    %c0_980 = arith.constant 0 : index
    %1363 = vector.load %arg4[%c8_978, %c0_979, %c0_980] : memref<22x8x128xf32, #tpu.memory_space<vmem>>, vector<1x8x128xf32>
    %1364 = vector.shape_cast %1363 : vector<1x8x128xf32> to vector<8x128xf32>
    %c8_981 = arith.constant 8 : index
    %c0_982 = arith.constant 0 : index
    %c0_983 = arith.constant 0 : index
    %1365 = vector.load %arg5[%c8_981, %c0_982, %c0_983] : memref<22x8x128xf32, #tpu.memory_space<vmem>>, vector<1x8x128xf32>
    %1366 = vector.shape_cast %1365 : vector<1x8x128xf32> to vector<8x128xf32>
    %1367 = arith.mulf %1339, %1364 : vector<8x128xf32>
    %1368 = arith.mulf %1362, %1366 : vector<8x128xf32>
    %1369 = arith.subf %1367, %1368 : vector<8x128xf32>
    %1370 = arith.mulf %1339, %1366 : vector<8x128xf32>
    %1371 = arith.mulf %1362, %1364 : vector<8x128xf32>
    %1372 = arith.addf %1370, %1371 : vector<8x128xf32>
    %c0_984 = arith.constant 0 : index
    %c14_985 = arith.constant 14 : index
    %1373 = memref.load %arg1[%c0_984, %c14_985] : memref<2x20xf32, #tpu.memory_space<smem>>
    %c0_986 = arith.constant 0 : index
    %c14_987 = arith.constant 14 : index
    %1374 = memref.load %arg2[%c0_986, %c14_987] : memref<2x20xf32, #tpu.memory_space<smem>>
    %1375 = vector.broadcast %1373 : f32 to vector<8x128xf32>
    %1376 = arith.mulf %1375, %1369 : vector<8x128xf32>
    %1377 = vector.broadcast %1374 : f32 to vector<8x128xf32>
    %1378 = arith.mulf %1377, %1372 : vector<8x128xf32>
    %1379 = arith.subf %1376, %1378 : vector<8x128xf32>
    %1380 = arith.addf %1286, %1379 : vector<8x128xf32>
    %1381 = vector.broadcast %1373 : f32 to vector<8x128xf32>
    %1382 = arith.mulf %1381, %1372 : vector<8x128xf32>
    %1383 = vector.broadcast %1374 : f32 to vector<8x128xf32>
    %1384 = arith.mulf %1383, %1369 : vector<8x128xf32>
    %1385 = arith.addf %1382, %1384 : vector<8x128xf32>
    %1386 = arith.addf %1292, %1385 : vector<8x128xf32>
    %c9_988 = arith.constant 9 : index
    %c0_989 = arith.constant 0 : index
    %c0_990 = arith.constant 0 : index
    %1387 = vector.load %arg4[%c9_988, %c0_989, %c0_990] : memref<22x8x128xf32, #tpu.memory_space<vmem>>, vector<1x8x128xf32>
    %1388 = vector.shape_cast %1387 : vector<1x8x128xf32> to vector<8x128xf32>
    %c9_991 = arith.constant 9 : index
    %c0_992 = arith.constant 0 : index
    %c0_993 = arith.constant 0 : index
    %1389 = vector.load %arg5[%c9_991, %c0_992, %c0_993] : memref<22x8x128xf32, #tpu.memory_space<vmem>>, vector<1x8x128xf32>
    %1390 = vector.shape_cast %1389 : vector<1x8x128xf32> to vector<8x128xf32>
    %1391 = arith.mulf %1339, %1388 : vector<8x128xf32>
    %1392 = arith.mulf %1362, %1390 : vector<8x128xf32>
    %1393 = arith.subf %1391, %1392 : vector<8x128xf32>
    %1394 = arith.mulf %1339, %1390 : vector<8x128xf32>
    %1395 = arith.mulf %1362, %1388 : vector<8x128xf32>
    %1396 = arith.addf %1394, %1395 : vector<8x128xf32>
    %c1_994 = arith.constant 1 : index
    %c14_995 = arith.constant 14 : index
    %1397 = memref.load %arg1[%c1_994, %c14_995] : memref<2x20xf32, #tpu.memory_space<smem>>
    %c1_996 = arith.constant 1 : index
    %c14_997 = arith.constant 14 : index
    %1398 = memref.load %arg2[%c1_996, %c14_997] : memref<2x20xf32, #tpu.memory_space<smem>>
    %1399 = vector.broadcast %1397 : f32 to vector<8x128xf32>
    %1400 = arith.mulf %1399, %1393 : vector<8x128xf32>
    %1401 = vector.broadcast %1398 : f32 to vector<8x128xf32>
    %1402 = arith.mulf %1401, %1396 : vector<8x128xf32>
    %1403 = arith.subf %1400, %1402 : vector<8x128xf32>
    %1404 = arith.addf %1310, %1403 : vector<8x128xf32>
    %1405 = vector.broadcast %1397 : f32 to vector<8x128xf32>
    %1406 = arith.mulf %1405, %1396 : vector<8x128xf32>
    %1407 = vector.broadcast %1398 : f32 to vector<8x128xf32>
    %1408 = arith.mulf %1407, %1393 : vector<8x128xf32>
    %1409 = arith.addf %1406, %1408 : vector<8x128xf32>
    %1410 = arith.addf %1316, %1409 : vector<8x128xf32>
    %c12_998 = arith.constant 12 : index
    %c0_999 = arith.constant 0 : index
    %c0_1000 = arith.constant 0 : index
    %1411 = vector.load %arg4[%c12_998, %c0_999, %c0_1000] : memref<22x8x128xf32, #tpu.memory_space<vmem>>, vector<1x8x128xf32>
    %1412 = vector.shape_cast %1411 : vector<1x8x128xf32> to vector<8x128xf32>
    %c14_1001 = arith.constant 14 : index
    %c0_1002 = arith.constant 0 : index
    %c0_1003 = arith.constant 0 : index
    %1413 = vector.load %arg4[%c14_1001, %c0_1002, %c0_1003] : memref<22x8x128xf32, #tpu.memory_space<vmem>>, vector<1x8x128xf32>
    %1414 = vector.shape_cast %1413 : vector<1x8x128xf32> to vector<8x128xf32>
    %1415 = arith.mulf %1412, %1414 : vector<8x128xf32>
    %c12_1004 = arith.constant 12 : index
    %c0_1005 = arith.constant 0 : index
    %c0_1006 = arith.constant 0 : index
    %1416 = vector.load %arg5[%c12_1004, %c0_1005, %c0_1006] : memref<22x8x128xf32, #tpu.memory_space<vmem>>, vector<1x8x128xf32>
    %1417 = vector.shape_cast %1416 : vector<1x8x128xf32> to vector<8x128xf32>
    %c14_1007 = arith.constant 14 : index
    %c0_1008 = arith.constant 0 : index
    %c0_1009 = arith.constant 0 : index
    %1418 = vector.load %arg5[%c14_1007, %c0_1008, %c0_1009] : memref<22x8x128xf32, #tpu.memory_space<vmem>>, vector<1x8x128xf32>
    %1419 = vector.shape_cast %1418 : vector<1x8x128xf32> to vector<8x128xf32>
    %1420 = arith.mulf %1417, %1419 : vector<8x128xf32>
    %1421 = arith.addf %1415, %1420 : vector<8x128xf32>
    %c13_1010 = arith.constant 13 : index
    %c0_1011 = arith.constant 0 : index
    %c0_1012 = arith.constant 0 : index
    %1422 = vector.load %arg4[%c13_1010, %c0_1011, %c0_1012] : memref<22x8x128xf32, #tpu.memory_space<vmem>>, vector<1x8x128xf32>
    %1423 = vector.shape_cast %1422 : vector<1x8x128xf32> to vector<8x128xf32>
    %c15_1013 = arith.constant 15 : index
    %c0_1014 = arith.constant 0 : index
    %c0_1015 = arith.constant 0 : index
    %1424 = vector.load %arg4[%c15_1013, %c0_1014, %c0_1015] : memref<22x8x128xf32, #tpu.memory_space<vmem>>, vector<1x8x128xf32>
    %1425 = vector.shape_cast %1424 : vector<1x8x128xf32> to vector<8x128xf32>
    %1426 = arith.mulf %1423, %1425 : vector<8x128xf32>
    %1427 = arith.addf %1421, %1426 : vector<8x128xf32>
    %c13_1016 = arith.constant 13 : index
    %c0_1017 = arith.constant 0 : index
    %c0_1018 = arith.constant 0 : index
    %1428 = vector.load %arg5[%c13_1016, %c0_1017, %c0_1018] : memref<22x8x128xf32, #tpu.memory_space<vmem>>, vector<1x8x128xf32>
    %1429 = vector.shape_cast %1428 : vector<1x8x128xf32> to vector<8x128xf32>
    %c15_1019 = arith.constant 15 : index
    %c0_1020 = arith.constant 0 : index
    %c0_1021 = arith.constant 0 : index
    %1430 = vector.load %arg5[%c15_1019, %c0_1020, %c0_1021] : memref<22x8x128xf32, #tpu.memory_space<vmem>>, vector<1x8x128xf32>
    %1431 = vector.shape_cast %1430 : vector<1x8x128xf32> to vector<8x128xf32>
    %1432 = arith.mulf %1429, %1431 : vector<8x128xf32>
    %1433 = arith.addf %1427, %1432 : vector<8x128xf32>
    %c12_1022 = arith.constant 12 : index
    %c0_1023 = arith.constant 0 : index
    %c0_1024 = arith.constant 0 : index
    %1434 = vector.load %arg5[%c12_1022, %c0_1023, %c0_1024] : memref<22x8x128xf32, #tpu.memory_space<vmem>>, vector<1x8x128xf32>
    %1435 = vector.shape_cast %1434 : vector<1x8x128xf32> to vector<8x128xf32>
    %c14_1025 = arith.constant 14 : index
    %c0_1026 = arith.constant 0 : index
    %c0_1027 = arith.constant 0 : index
    %1436 = vector.load %arg4[%c14_1025, %c0_1026, %c0_1027] : memref<22x8x128xf32, #tpu.memory_space<vmem>>, vector<1x8x128xf32>
    %1437 = vector.shape_cast %1436 : vector<1x8x128xf32> to vector<8x128xf32>
    %1438 = arith.mulf %1435, %1437 : vector<8x128xf32>
    %c12_1028 = arith.constant 12 : index
    %c0_1029 = arith.constant 0 : index
    %c0_1030 = arith.constant 0 : index
    %1439 = vector.load %arg4[%c12_1028, %c0_1029, %c0_1030] : memref<22x8x128xf32, #tpu.memory_space<vmem>>, vector<1x8x128xf32>
    %1440 = vector.shape_cast %1439 : vector<1x8x128xf32> to vector<8x128xf32>
    %c14_1031 = arith.constant 14 : index
    %c0_1032 = arith.constant 0 : index
    %c0_1033 = arith.constant 0 : index
    %1441 = vector.load %arg5[%c14_1031, %c0_1032, %c0_1033] : memref<22x8x128xf32, #tpu.memory_space<vmem>>, vector<1x8x128xf32>
    %1442 = vector.shape_cast %1441 : vector<1x8x128xf32> to vector<8x128xf32>
    %1443 = arith.mulf %1440, %1442 : vector<8x128xf32>
    %1444 = arith.subf %1438, %1443 : vector<8x128xf32>
    %c13_1034 = arith.constant 13 : index
    %c0_1035 = arith.constant 0 : index
    %c0_1036 = arith.constant 0 : index
    %1445 = vector.load %arg5[%c13_1034, %c0_1035, %c0_1036] : memref<22x8x128xf32, #tpu.memory_space<vmem>>, vector<1x8x128xf32>
    %1446 = vector.shape_cast %1445 : vector<1x8x128xf32> to vector<8x128xf32>
    %c15_1037 = arith.constant 15 : index
    %c0_1038 = arith.constant 0 : index
    %c0_1039 = arith.constant 0 : index
    %1447 = vector.load %arg4[%c15_1037, %c0_1038, %c0_1039] : memref<22x8x128xf32, #tpu.memory_space<vmem>>, vector<1x8x128xf32>
    %1448 = vector.shape_cast %1447 : vector<1x8x128xf32> to vector<8x128xf32>
    %1449 = arith.mulf %1446, %1448 : vector<8x128xf32>
    %1450 = arith.addf %1444, %1449 : vector<8x128xf32>
    %c13_1040 = arith.constant 13 : index
    %c0_1041 = arith.constant 0 : index
    %c0_1042 = arith.constant 0 : index
    %1451 = vector.load %arg4[%c13_1040, %c0_1041, %c0_1042] : memref<22x8x128xf32, #tpu.memory_space<vmem>>, vector<1x8x128xf32>
    %1452 = vector.shape_cast %1451 : vector<1x8x128xf32> to vector<8x128xf32>
    %c15_1043 = arith.constant 15 : index
    %c0_1044 = arith.constant 0 : index
    %c0_1045 = arith.constant 0 : index
    %1453 = vector.load %arg5[%c15_1043, %c0_1044, %c0_1045] : memref<22x8x128xf32, #tpu.memory_space<vmem>>, vector<1x8x128xf32>
    %1454 = vector.shape_cast %1453 : vector<1x8x128xf32> to vector<8x128xf32>
    %1455 = arith.mulf %1452, %1454 : vector<8x128xf32>
    %1456 = arith.subf %1450, %1455 : vector<8x128xf32>
    %c12_1046 = arith.constant 12 : index
    %c0_1047 = arith.constant 0 : index
    %c0_1048 = arith.constant 0 : index
    %1457 = vector.load %arg4[%c12_1046, %c0_1047, %c0_1048] : memref<22x8x128xf32, #tpu.memory_space<vmem>>, vector<1x8x128xf32>
    %1458 = vector.shape_cast %1457 : vector<1x8x128xf32> to vector<8x128xf32>
    %c12_1049 = arith.constant 12 : index
    %c0_1050 = arith.constant 0 : index
    %c0_1051 = arith.constant 0 : index
    %1459 = vector.load %arg5[%c12_1049, %c0_1050, %c0_1051] : memref<22x8x128xf32, #tpu.memory_space<vmem>>, vector<1x8x128xf32>
    %1460 = vector.shape_cast %1459 : vector<1x8x128xf32> to vector<8x128xf32>
    %1461 = arith.mulf %1433, %1458 : vector<8x128xf32>
    %1462 = arith.mulf %1456, %1460 : vector<8x128xf32>
    %1463 = arith.subf %1461, %1462 : vector<8x128xf32>
    %1464 = arith.mulf %1433, %1460 : vector<8x128xf32>
    %1465 = arith.mulf %1456, %1458 : vector<8x128xf32>
    %1466 = arith.addf %1464, %1465 : vector<8x128xf32>
    %c0_1052 = arith.constant 0 : index
    %c15_1053 = arith.constant 15 : index
    %1467 = memref.load %arg1[%c0_1052, %c15_1053] : memref<2x20xf32, #tpu.memory_space<smem>>
    %c0_1054 = arith.constant 0 : index
    %c15_1055 = arith.constant 15 : index
    %1468 = memref.load %arg2[%c0_1054, %c15_1055] : memref<2x20xf32, #tpu.memory_space<smem>>
    %1469 = vector.broadcast %1467 : f32 to vector<8x128xf32>
    %1470 = arith.mulf %1469, %1463 : vector<8x128xf32>
    %1471 = vector.broadcast %1468 : f32 to vector<8x128xf32>
    %1472 = arith.mulf %1471, %1466 : vector<8x128xf32>
    %1473 = arith.subf %1470, %1472 : vector<8x128xf32>
    %1474 = arith.addf %1380, %1473 : vector<8x128xf32>
    %1475 = vector.broadcast %1467 : f32 to vector<8x128xf32>
    %1476 = arith.mulf %1475, %1466 : vector<8x128xf32>
    %1477 = vector.broadcast %1468 : f32 to vector<8x128xf32>
    %1478 = arith.mulf %1477, %1463 : vector<8x128xf32>
    %1479 = arith.addf %1476, %1478 : vector<8x128xf32>
    %1480 = arith.addf %1386, %1479 : vector<8x128xf32>
    %c13_1056 = arith.constant 13 : index
    %c0_1057 = arith.constant 0 : index
    %c0_1058 = arith.constant 0 : index
    %1481 = vector.load %arg4[%c13_1056, %c0_1057, %c0_1058] : memref<22x8x128xf32, #tpu.memory_space<vmem>>, vector<1x8x128xf32>
    %1482 = vector.shape_cast %1481 : vector<1x8x128xf32> to vector<8x128xf32>
    %c13_1059 = arith.constant 13 : index
    %c0_1060 = arith.constant 0 : index
    %c0_1061 = arith.constant 0 : index
    %1483 = vector.load %arg5[%c13_1059, %c0_1060, %c0_1061] : memref<22x8x128xf32, #tpu.memory_space<vmem>>, vector<1x8x128xf32>
    %1484 = vector.shape_cast %1483 : vector<1x8x128xf32> to vector<8x128xf32>
    %1485 = arith.mulf %1433, %1482 : vector<8x128xf32>
    %1486 = arith.mulf %1456, %1484 : vector<8x128xf32>
    %1487 = arith.subf %1485, %1486 : vector<8x128xf32>
    %1488 = arith.mulf %1433, %1484 : vector<8x128xf32>
    %1489 = arith.mulf %1456, %1482 : vector<8x128xf32>
    %1490 = arith.addf %1488, %1489 : vector<8x128xf32>
    %c1_1062 = arith.constant 1 : index
    %c15_1063 = arith.constant 15 : index
    %1491 = memref.load %arg1[%c1_1062, %c15_1063] : memref<2x20xf32, #tpu.memory_space<smem>>
    %c1_1064 = arith.constant 1 : index
    %c15_1065 = arith.constant 15 : index
    %1492 = memref.load %arg2[%c1_1064, %c15_1065] : memref<2x20xf32, #tpu.memory_space<smem>>
    %1493 = vector.broadcast %1491 : f32 to vector<8x128xf32>
    %1494 = arith.mulf %1493, %1487 : vector<8x128xf32>
    %1495 = vector.broadcast %1492 : f32 to vector<8x128xf32>
    %1496 = arith.mulf %1495, %1490 : vector<8x128xf32>
    %1497 = arith.subf %1494, %1496 : vector<8x128xf32>
    %1498 = arith.addf %1404, %1497 : vector<8x128xf32>
    %1499 = vector.broadcast %1491 : f32 to vector<8x128xf32>
    %1500 = arith.mulf %1499, %1490 : vector<8x128xf32>
    %1501 = vector.broadcast %1492 : f32 to vector<8x128xf32>
    %1502 = arith.mulf %1501, %1487 : vector<8x128xf32>
    %1503 = arith.addf %1500, %1502 : vector<8x128xf32>
    %1504 = arith.addf %1410, %1503 : vector<8x128xf32>
    %c14_1066 = arith.constant 14 : index
    %c0_1067 = arith.constant 0 : index
    %c0_1068 = arith.constant 0 : index
    %1505 = vector.load %arg4[%c14_1066, %c0_1067, %c0_1068] : memref<22x8x128xf32, #tpu.memory_space<vmem>>, vector<1x8x128xf32>
    %1506 = vector.shape_cast %1505 : vector<1x8x128xf32> to vector<8x128xf32>
    %c16_1069 = arith.constant 16 : index
    %c0_1070 = arith.constant 0 : index
    %c0_1071 = arith.constant 0 : index
    %1507 = vector.load %arg4[%c16_1069, %c0_1070, %c0_1071] : memref<22x8x128xf32, #tpu.memory_space<vmem>>, vector<1x8x128xf32>
    %1508 = vector.shape_cast %1507 : vector<1x8x128xf32> to vector<8x128xf32>
    %1509 = arith.mulf %1506, %1508 : vector<8x128xf32>
    %c14_1072 = arith.constant 14 : index
    %c0_1073 = arith.constant 0 : index
    %c0_1074 = arith.constant 0 : index
    %1510 = vector.load %arg5[%c14_1072, %c0_1073, %c0_1074] : memref<22x8x128xf32, #tpu.memory_space<vmem>>, vector<1x8x128xf32>
    %1511 = vector.shape_cast %1510 : vector<1x8x128xf32> to vector<8x128xf32>
    %c16_1075 = arith.constant 16 : index
    %c0_1076 = arith.constant 0 : index
    %c0_1077 = arith.constant 0 : index
    %1512 = vector.load %arg5[%c16_1075, %c0_1076, %c0_1077] : memref<22x8x128xf32, #tpu.memory_space<vmem>>, vector<1x8x128xf32>
    %1513 = vector.shape_cast %1512 : vector<1x8x128xf32> to vector<8x128xf32>
    %1514 = arith.mulf %1511, %1513 : vector<8x128xf32>
    %1515 = arith.addf %1509, %1514 : vector<8x128xf32>
    %c15_1078 = arith.constant 15 : index
    %c0_1079 = arith.constant 0 : index
    %c0_1080 = arith.constant 0 : index
    %1516 = vector.load %arg4[%c15_1078, %c0_1079, %c0_1080] : memref<22x8x128xf32, #tpu.memory_space<vmem>>, vector<1x8x128xf32>
    %1517 = vector.shape_cast %1516 : vector<1x8x128xf32> to vector<8x128xf32>
    %c17_1081 = arith.constant 17 : index
    %c0_1082 = arith.constant 0 : index
    %c0_1083 = arith.constant 0 : index
    %1518 = vector.load %arg4[%c17_1081, %c0_1082, %c0_1083] : memref<22x8x128xf32, #tpu.memory_space<vmem>>, vector<1x8x128xf32>
    %1519 = vector.shape_cast %1518 : vector<1x8x128xf32> to vector<8x128xf32>
    %1520 = arith.mulf %1517, %1519 : vector<8x128xf32>
    %1521 = arith.addf %1515, %1520 : vector<8x128xf32>
    %c15_1084 = arith.constant 15 : index
    %c0_1085 = arith.constant 0 : index
    %c0_1086 = arith.constant 0 : index
    %1522 = vector.load %arg5[%c15_1084, %c0_1085, %c0_1086] : memref<22x8x128xf32, #tpu.memory_space<vmem>>, vector<1x8x128xf32>
    %1523 = vector.shape_cast %1522 : vector<1x8x128xf32> to vector<8x128xf32>
    %c17_1087 = arith.constant 17 : index
    %c0_1088 = arith.constant 0 : index
    %c0_1089 = arith.constant 0 : index
    %1524 = vector.load %arg5[%c17_1087, %c0_1088, %c0_1089] : memref<22x8x128xf32, #tpu.memory_space<vmem>>, vector<1x8x128xf32>
    %1525 = vector.shape_cast %1524 : vector<1x8x128xf32> to vector<8x128xf32>
    %1526 = arith.mulf %1523, %1525 : vector<8x128xf32>
    %1527 = arith.addf %1521, %1526 : vector<8x128xf32>
    %c14_1090 = arith.constant 14 : index
    %c0_1091 = arith.constant 0 : index
    %c0_1092 = arith.constant 0 : index
    %1528 = vector.load %arg5[%c14_1090, %c0_1091, %c0_1092] : memref<22x8x128xf32, #tpu.memory_space<vmem>>, vector<1x8x128xf32>
    %1529 = vector.shape_cast %1528 : vector<1x8x128xf32> to vector<8x128xf32>
    %c16_1093 = arith.constant 16 : index
    %c0_1094 = arith.constant 0 : index
    %c0_1095 = arith.constant 0 : index
    %1530 = vector.load %arg4[%c16_1093, %c0_1094, %c0_1095] : memref<22x8x128xf32, #tpu.memory_space<vmem>>, vector<1x8x128xf32>
    %1531 = vector.shape_cast %1530 : vector<1x8x128xf32> to vector<8x128xf32>
    %1532 = arith.mulf %1529, %1531 : vector<8x128xf32>
    %c14_1096 = arith.constant 14 : index
    %c0_1097 = arith.constant 0 : index
    %c0_1098 = arith.constant 0 : index
    %1533 = vector.load %arg4[%c14_1096, %c0_1097, %c0_1098] : memref<22x8x128xf32, #tpu.memory_space<vmem>>, vector<1x8x128xf32>
    %1534 = vector.shape_cast %1533 : vector<1x8x128xf32> to vector<8x128xf32>
    %c16_1099 = arith.constant 16 : index
    %c0_1100 = arith.constant 0 : index
    %c0_1101 = arith.constant 0 : index
    %1535 = vector.load %arg5[%c16_1099, %c0_1100, %c0_1101] : memref<22x8x128xf32, #tpu.memory_space<vmem>>, vector<1x8x128xf32>
    %1536 = vector.shape_cast %1535 : vector<1x8x128xf32> to vector<8x128xf32>
    %1537 = arith.mulf %1534, %1536 : vector<8x128xf32>
    %1538 = arith.subf %1532, %1537 : vector<8x128xf32>
    %c15_1102 = arith.constant 15 : index
    %c0_1103 = arith.constant 0 : index
    %c0_1104 = arith.constant 0 : index
    %1539 = vector.load %arg5[%c15_1102, %c0_1103, %c0_1104] : memref<22x8x128xf32, #tpu.memory_space<vmem>>, vector<1x8x128xf32>
    %1540 = vector.shape_cast %1539 : vector<1x8x128xf32> to vector<8x128xf32>
    %c17_1105 = arith.constant 17 : index
    %c0_1106 = arith.constant 0 : index
    %c0_1107 = arith.constant 0 : index
    %1541 = vector.load %arg4[%c17_1105, %c0_1106, %c0_1107] : memref<22x8x128xf32, #tpu.memory_space<vmem>>, vector<1x8x128xf32>
    %1542 = vector.shape_cast %1541 : vector<1x8x128xf32> to vector<8x128xf32>
    %1543 = arith.mulf %1540, %1542 : vector<8x128xf32>
    %1544 = arith.addf %1538, %1543 : vector<8x128xf32>
    %c15_1108 = arith.constant 15 : index
    %c0_1109 = arith.constant 0 : index
    %c0_1110 = arith.constant 0 : index
    %1545 = vector.load %arg4[%c15_1108, %c0_1109, %c0_1110] : memref<22x8x128xf32, #tpu.memory_space<vmem>>, vector<1x8x128xf32>
    %1546 = vector.shape_cast %1545 : vector<1x8x128xf32> to vector<8x128xf32>
    %c17_1111 = arith.constant 17 : index
    %c0_1112 = arith.constant 0 : index
    %c0_1113 = arith.constant 0 : index
    %1547 = vector.load %arg5[%c17_1111, %c0_1112, %c0_1113] : memref<22x8x128xf32, #tpu.memory_space<vmem>>, vector<1x8x128xf32>
    %1548 = vector.shape_cast %1547 : vector<1x8x128xf32> to vector<8x128xf32>
    %1549 = arith.mulf %1546, %1548 : vector<8x128xf32>
    %1550 = arith.subf %1544, %1549 : vector<8x128xf32>
    %c12_1114 = arith.constant 12 : index
    %c0_1115 = arith.constant 0 : index
    %c0_1116 = arith.constant 0 : index
    %1551 = vector.load %arg4[%c12_1114, %c0_1115, %c0_1116] : memref<22x8x128xf32, #tpu.memory_space<vmem>>, vector<1x8x128xf32>
    %1552 = vector.shape_cast %1551 : vector<1x8x128xf32> to vector<8x128xf32>
    %c12_1117 = arith.constant 12 : index
    %c0_1118 = arith.constant 0 : index
    %c0_1119 = arith.constant 0 : index
    %1553 = vector.load %arg5[%c12_1117, %c0_1118, %c0_1119] : memref<22x8x128xf32, #tpu.memory_space<vmem>>, vector<1x8x128xf32>
    %1554 = vector.shape_cast %1553 : vector<1x8x128xf32> to vector<8x128xf32>
    %1555 = arith.mulf %1527, %1552 : vector<8x128xf32>
    %1556 = arith.mulf %1550, %1554 : vector<8x128xf32>
    %1557 = arith.subf %1555, %1556 : vector<8x128xf32>
    %1558 = arith.mulf %1527, %1554 : vector<8x128xf32>
    %1559 = arith.mulf %1550, %1552 : vector<8x128xf32>
    %1560 = arith.addf %1558, %1559 : vector<8x128xf32>
    %c0_1120 = arith.constant 0 : index
    %c16_1121 = arith.constant 16 : index
    %1561 = memref.load %arg1[%c0_1120, %c16_1121] : memref<2x20xf32, #tpu.memory_space<smem>>
    %c0_1122 = arith.constant 0 : index
    %c16_1123 = arith.constant 16 : index
    %1562 = memref.load %arg2[%c0_1122, %c16_1123] : memref<2x20xf32, #tpu.memory_space<smem>>
    %1563 = vector.broadcast %1561 : f32 to vector<8x128xf32>
    %1564 = arith.mulf %1563, %1557 : vector<8x128xf32>
    %1565 = vector.broadcast %1562 : f32 to vector<8x128xf32>
    %1566 = arith.mulf %1565, %1560 : vector<8x128xf32>
    %1567 = arith.subf %1564, %1566 : vector<8x128xf32>
    %1568 = arith.addf %1474, %1567 : vector<8x128xf32>
    %1569 = vector.broadcast %1561 : f32 to vector<8x128xf32>
    %1570 = arith.mulf %1569, %1560 : vector<8x128xf32>
    %1571 = vector.broadcast %1562 : f32 to vector<8x128xf32>
    %1572 = arith.mulf %1571, %1557 : vector<8x128xf32>
    %1573 = arith.addf %1570, %1572 : vector<8x128xf32>
    %1574 = arith.addf %1480, %1573 : vector<8x128xf32>
    %c13_1124 = arith.constant 13 : index
    %c0_1125 = arith.constant 0 : index
    %c0_1126 = arith.constant 0 : index
    %1575 = vector.load %arg4[%c13_1124, %c0_1125, %c0_1126] : memref<22x8x128xf32, #tpu.memory_space<vmem>>, vector<1x8x128xf32>
    %1576 = vector.shape_cast %1575 : vector<1x8x128xf32> to vector<8x128xf32>
    %c13_1127 = arith.constant 13 : index
    %c0_1128 = arith.constant 0 : index
    %c0_1129 = arith.constant 0 : index
    %1577 = vector.load %arg5[%c13_1127, %c0_1128, %c0_1129] : memref<22x8x128xf32, #tpu.memory_space<vmem>>, vector<1x8x128xf32>
    %1578 = vector.shape_cast %1577 : vector<1x8x128xf32> to vector<8x128xf32>
    %1579 = arith.mulf %1527, %1576 : vector<8x128xf32>
    %1580 = arith.mulf %1550, %1578 : vector<8x128xf32>
    %1581 = arith.subf %1579, %1580 : vector<8x128xf32>
    %1582 = arith.mulf %1527, %1578 : vector<8x128xf32>
    %1583 = arith.mulf %1550, %1576 : vector<8x128xf32>
    %1584 = arith.addf %1582, %1583 : vector<8x128xf32>
    %c1_1130 = arith.constant 1 : index
    %c16_1131 = arith.constant 16 : index
    %1585 = memref.load %arg1[%c1_1130, %c16_1131] : memref<2x20xf32, #tpu.memory_space<smem>>
    %c1_1132 = arith.constant 1 : index
    %c16_1133 = arith.constant 16 : index
    %1586 = memref.load %arg2[%c1_1132, %c16_1133] : memref<2x20xf32, #tpu.memory_space<smem>>
    %1587 = vector.broadcast %1585 : f32 to vector<8x128xf32>
    %1588 = arith.mulf %1587, %1581 : vector<8x128xf32>
    %1589 = vector.broadcast %1586 : f32 to vector<8x128xf32>
    %1590 = arith.mulf %1589, %1584 : vector<8x128xf32>
    %1591 = arith.subf %1588, %1590 : vector<8x128xf32>
    %1592 = arith.addf %1498, %1591 : vector<8x128xf32>
    %1593 = vector.broadcast %1585 : f32 to vector<8x128xf32>
    %1594 = arith.mulf %1593, %1584 : vector<8x128xf32>
    %1595 = vector.broadcast %1586 : f32 to vector<8x128xf32>
    %1596 = arith.mulf %1595, %1581 : vector<8x128xf32>
    %1597 = arith.addf %1594, %1596 : vector<8x128xf32>
    %1598 = arith.addf %1504, %1597 : vector<8x128xf32>
    %c16_1134 = arith.constant 16 : index
    %c0_1135 = arith.constant 0 : index
    %c0_1136 = arith.constant 0 : index
    %1599 = vector.load %arg4[%c16_1134, %c0_1135, %c0_1136] : memref<22x8x128xf32, #tpu.memory_space<vmem>>, vector<1x8x128xf32>
    %1600 = vector.shape_cast %1599 : vector<1x8x128xf32> to vector<8x128xf32>
    %c18_1137 = arith.constant 18 : index
    %c0_1138 = arith.constant 0 : index
    %c0_1139 = arith.constant 0 : index
    %1601 = vector.load %arg4[%c18_1137, %c0_1138, %c0_1139] : memref<22x8x128xf32, #tpu.memory_space<vmem>>, vector<1x8x128xf32>
    %1602 = vector.shape_cast %1601 : vector<1x8x128xf32> to vector<8x128xf32>
    %1603 = arith.mulf %1600, %1602 : vector<8x128xf32>
    %c16_1140 = arith.constant 16 : index
    %c0_1141 = arith.constant 0 : index
    %c0_1142 = arith.constant 0 : index
    %1604 = vector.load %arg5[%c16_1140, %c0_1141, %c0_1142] : memref<22x8x128xf32, #tpu.memory_space<vmem>>, vector<1x8x128xf32>
    %1605 = vector.shape_cast %1604 : vector<1x8x128xf32> to vector<8x128xf32>
    %c18_1143 = arith.constant 18 : index
    %c0_1144 = arith.constant 0 : index
    %c0_1145 = arith.constant 0 : index
    %1606 = vector.load %arg5[%c18_1143, %c0_1144, %c0_1145] : memref<22x8x128xf32, #tpu.memory_space<vmem>>, vector<1x8x128xf32>
    %1607 = vector.shape_cast %1606 : vector<1x8x128xf32> to vector<8x128xf32>
    %1608 = arith.mulf %1605, %1607 : vector<8x128xf32>
    %1609 = arith.addf %1603, %1608 : vector<8x128xf32>
    %c17_1146 = arith.constant 17 : index
    %c0_1147 = arith.constant 0 : index
    %c0_1148 = arith.constant 0 : index
    %1610 = vector.load %arg4[%c17_1146, %c0_1147, %c0_1148] : memref<22x8x128xf32, #tpu.memory_space<vmem>>, vector<1x8x128xf32>
    %1611 = vector.shape_cast %1610 : vector<1x8x128xf32> to vector<8x128xf32>
    %c19_1149 = arith.constant 19 : index
    %c0_1150 = arith.constant 0 : index
    %c0_1151 = arith.constant 0 : index
    %1612 = vector.load %arg4[%c19_1149, %c0_1150, %c0_1151] : memref<22x8x128xf32, #tpu.memory_space<vmem>>, vector<1x8x128xf32>
    %1613 = vector.shape_cast %1612 : vector<1x8x128xf32> to vector<8x128xf32>
    %1614 = arith.mulf %1611, %1613 : vector<8x128xf32>
    %1615 = arith.addf %1609, %1614 : vector<8x128xf32>
    %c17_1152 = arith.constant 17 : index
    %c0_1153 = arith.constant 0 : index
    %c0_1154 = arith.constant 0 : index
    %1616 = vector.load %arg5[%c17_1152, %c0_1153, %c0_1154] : memref<22x8x128xf32, #tpu.memory_space<vmem>>, vector<1x8x128xf32>
    %1617 = vector.shape_cast %1616 : vector<1x8x128xf32> to vector<8x128xf32>
    %c19_1155 = arith.constant 19 : index
    %c0_1156 = arith.constant 0 : index
    %c0_1157 = arith.constant 0 : index
    %1618 = vector.load %arg5[%c19_1155, %c0_1156, %c0_1157] : memref<22x8x128xf32, #tpu.memory_space<vmem>>, vector<1x8x128xf32>
    %1619 = vector.shape_cast %1618 : vector<1x8x128xf32> to vector<8x128xf32>
    %1620 = arith.mulf %1617, %1619 : vector<8x128xf32>
    %1621 = arith.addf %1615, %1620 : vector<8x128xf32>
    %c16_1158 = arith.constant 16 : index
    %c0_1159 = arith.constant 0 : index
    %c0_1160 = arith.constant 0 : index
    %1622 = vector.load %arg5[%c16_1158, %c0_1159, %c0_1160] : memref<22x8x128xf32, #tpu.memory_space<vmem>>, vector<1x8x128xf32>
    %1623 = vector.shape_cast %1622 : vector<1x8x128xf32> to vector<8x128xf32>
    %c18_1161 = arith.constant 18 : index
    %c0_1162 = arith.constant 0 : index
    %c0_1163 = arith.constant 0 : index
    %1624 = vector.load %arg4[%c18_1161, %c0_1162, %c0_1163] : memref<22x8x128xf32, #tpu.memory_space<vmem>>, vector<1x8x128xf32>
    %1625 = vector.shape_cast %1624 : vector<1x8x128xf32> to vector<8x128xf32>
    %1626 = arith.mulf %1623, %1625 : vector<8x128xf32>
    %c16_1164 = arith.constant 16 : index
    %c0_1165 = arith.constant 0 : index
    %c0_1166 = arith.constant 0 : index
    %1627 = vector.load %arg4[%c16_1164, %c0_1165, %c0_1166] : memref<22x8x128xf32, #tpu.memory_space<vmem>>, vector<1x8x128xf32>
    %1628 = vector.shape_cast %1627 : vector<1x8x128xf32> to vector<8x128xf32>
    %c18_1167 = arith.constant 18 : index
    %c0_1168 = arith.constant 0 : index
    %c0_1169 = arith.constant 0 : index
    %1629 = vector.load %arg5[%c18_1167, %c0_1168, %c0_1169] : memref<22x8x128xf32, #tpu.memory_space<vmem>>, vector<1x8x128xf32>
    %1630 = vector.shape_cast %1629 : vector<1x8x128xf32> to vector<8x128xf32>
    %1631 = arith.mulf %1628, %1630 : vector<8x128xf32>
    %1632 = arith.subf %1626, %1631 : vector<8x128xf32>
    %c17_1170 = arith.constant 17 : index
    %c0_1171 = arith.constant 0 : index
    %c0_1172 = arith.constant 0 : index
    %1633 = vector.load %arg5[%c17_1170, %c0_1171, %c0_1172] : memref<22x8x128xf32, #tpu.memory_space<vmem>>, vector<1x8x128xf32>
    %1634 = vector.shape_cast %1633 : vector<1x8x128xf32> to vector<8x128xf32>
    %c19_1173 = arith.constant 19 : index
    %c0_1174 = arith.constant 0 : index
    %c0_1175 = arith.constant 0 : index
    %1635 = vector.load %arg4[%c19_1173, %c0_1174, %c0_1175] : memref<22x8x128xf32, #tpu.memory_space<vmem>>, vector<1x8x128xf32>
    %1636 = vector.shape_cast %1635 : vector<1x8x128xf32> to vector<8x128xf32>
    %1637 = arith.mulf %1634, %1636 : vector<8x128xf32>
    %1638 = arith.addf %1632, %1637 : vector<8x128xf32>
    %c17_1176 = arith.constant 17 : index
    %c0_1177 = arith.constant 0 : index
    %c0_1178 = arith.constant 0 : index
    %1639 = vector.load %arg4[%c17_1176, %c0_1177, %c0_1178] : memref<22x8x128xf32, #tpu.memory_space<vmem>>, vector<1x8x128xf32>
    %1640 = vector.shape_cast %1639 : vector<1x8x128xf32> to vector<8x128xf32>
    %c19_1179 = arith.constant 19 : index
    %c0_1180 = arith.constant 0 : index
    %c0_1181 = arith.constant 0 : index
    %1641 = vector.load %arg5[%c19_1179, %c0_1180, %c0_1181] : memref<22x8x128xf32, #tpu.memory_space<vmem>>, vector<1x8x128xf32>
    %1642 = vector.shape_cast %1641 : vector<1x8x128xf32> to vector<8x128xf32>
    %1643 = arith.mulf %1640, %1642 : vector<8x128xf32>
    %1644 = arith.subf %1638, %1643 : vector<8x128xf32>
    %c12_1182 = arith.constant 12 : index
    %c0_1183 = arith.constant 0 : index
    %c0_1184 = arith.constant 0 : index
    %1645 = vector.load %arg4[%c12_1182, %c0_1183, %c0_1184] : memref<22x8x128xf32, #tpu.memory_space<vmem>>, vector<1x8x128xf32>
    %1646 = vector.shape_cast %1645 : vector<1x8x128xf32> to vector<8x128xf32>
    %c12_1185 = arith.constant 12 : index
    %c0_1186 = arith.constant 0 : index
    %c0_1187 = arith.constant 0 : index
    %1647 = vector.load %arg5[%c12_1185, %c0_1186, %c0_1187] : memref<22x8x128xf32, #tpu.memory_space<vmem>>, vector<1x8x128xf32>
    %1648 = vector.shape_cast %1647 : vector<1x8x128xf32> to vector<8x128xf32>
    %1649 = arith.mulf %1621, %1646 : vector<8x128xf32>
    %1650 = arith.mulf %1644, %1648 : vector<8x128xf32>
    %1651 = arith.subf %1649, %1650 : vector<8x128xf32>
    %1652 = arith.mulf %1621, %1648 : vector<8x128xf32>
    %1653 = arith.mulf %1644, %1646 : vector<8x128xf32>
    %1654 = arith.addf %1652, %1653 : vector<8x128xf32>
    %c0_1188 = arith.constant 0 : index
    %c17_1189 = arith.constant 17 : index
    %1655 = memref.load %arg1[%c0_1188, %c17_1189] : memref<2x20xf32, #tpu.memory_space<smem>>
    %c0_1190 = arith.constant 0 : index
    %c17_1191 = arith.constant 17 : index
    %1656 = memref.load %arg2[%c0_1190, %c17_1191] : memref<2x20xf32, #tpu.memory_space<smem>>
    %1657 = vector.broadcast %1655 : f32 to vector<8x128xf32>
    %1658 = arith.mulf %1657, %1651 : vector<8x128xf32>
    %1659 = vector.broadcast %1656 : f32 to vector<8x128xf32>
    %1660 = arith.mulf %1659, %1654 : vector<8x128xf32>
    %1661 = arith.subf %1658, %1660 : vector<8x128xf32>
    %1662 = arith.addf %1568, %1661 : vector<8x128xf32>
    %1663 = vector.broadcast %1655 : f32 to vector<8x128xf32>
    %1664 = arith.mulf %1663, %1654 : vector<8x128xf32>
    %1665 = vector.broadcast %1656 : f32 to vector<8x128xf32>
    %1666 = arith.mulf %1665, %1651 : vector<8x128xf32>
    %1667 = arith.addf %1664, %1666 : vector<8x128xf32>
    %1668 = arith.addf %1574, %1667 : vector<8x128xf32>
    %c13_1192 = arith.constant 13 : index
    %c0_1193 = arith.constant 0 : index
    %c0_1194 = arith.constant 0 : index
    %1669 = vector.load %arg4[%c13_1192, %c0_1193, %c0_1194] : memref<22x8x128xf32, #tpu.memory_space<vmem>>, vector<1x8x128xf32>
    %1670 = vector.shape_cast %1669 : vector<1x8x128xf32> to vector<8x128xf32>
    %c13_1195 = arith.constant 13 : index
    %c0_1196 = arith.constant 0 : index
    %c0_1197 = arith.constant 0 : index
    %1671 = vector.load %arg5[%c13_1195, %c0_1196, %c0_1197] : memref<22x8x128xf32, #tpu.memory_space<vmem>>, vector<1x8x128xf32>
    %1672 = vector.shape_cast %1671 : vector<1x8x128xf32> to vector<8x128xf32>
    %1673 = arith.mulf %1621, %1670 : vector<8x128xf32>
    %1674 = arith.mulf %1644, %1672 : vector<8x128xf32>
    %1675 = arith.subf %1673, %1674 : vector<8x128xf32>
    %1676 = arith.mulf %1621, %1672 : vector<8x128xf32>
    %1677 = arith.mulf %1644, %1670 : vector<8x128xf32>
    %1678 = arith.addf %1676, %1677 : vector<8x128xf32>
    %c1_1198 = arith.constant 1 : index
    %c17_1199 = arith.constant 17 : index
    %1679 = memref.load %arg1[%c1_1198, %c17_1199] : memref<2x20xf32, #tpu.memory_space<smem>>
    %c1_1200 = arith.constant 1 : index
    %c17_1201 = arith.constant 17 : index
    %1680 = memref.load %arg2[%c1_1200, %c17_1201] : memref<2x20xf32, #tpu.memory_space<smem>>
    %1681 = vector.broadcast %1679 : f32 to vector<8x128xf32>
    %1682 = arith.mulf %1681, %1675 : vector<8x128xf32>
    %1683 = vector.broadcast %1680 : f32 to vector<8x128xf32>
    %1684 = arith.mulf %1683, %1678 : vector<8x128xf32>
    %1685 = arith.subf %1682, %1684 : vector<8x128xf32>
    %1686 = arith.addf %1592, %1685 : vector<8x128xf32>
    %1687 = vector.broadcast %1679 : f32 to vector<8x128xf32>
    %1688 = arith.mulf %1687, %1678 : vector<8x128xf32>
    %1689 = vector.broadcast %1680 : f32 to vector<8x128xf32>
    %1690 = arith.mulf %1689, %1675 : vector<8x128xf32>
    %1691 = arith.addf %1688, %1690 : vector<8x128xf32>
    %1692 = arith.addf %1598, %1691 : vector<8x128xf32>
    %c18_1202 = arith.constant 18 : index
    %c0_1203 = arith.constant 0 : index
    %c0_1204 = arith.constant 0 : index
    %1693 = vector.load %arg4[%c18_1202, %c0_1203, %c0_1204] : memref<22x8x128xf32, #tpu.memory_space<vmem>>, vector<1x8x128xf32>
    %1694 = vector.shape_cast %1693 : vector<1x8x128xf32> to vector<8x128xf32>
    %c20_1205 = arith.constant 20 : index
    %c0_1206 = arith.constant 0 : index
    %c0_1207 = arith.constant 0 : index
    %1695 = vector.load %arg4[%c20_1205, %c0_1206, %c0_1207] : memref<22x8x128xf32, #tpu.memory_space<vmem>>, vector<1x8x128xf32>
    %1696 = vector.shape_cast %1695 : vector<1x8x128xf32> to vector<8x128xf32>
    %1697 = arith.mulf %1694, %1696 : vector<8x128xf32>
    %c18_1208 = arith.constant 18 : index
    %c0_1209 = arith.constant 0 : index
    %c0_1210 = arith.constant 0 : index
    %1698 = vector.load %arg5[%c18_1208, %c0_1209, %c0_1210] : memref<22x8x128xf32, #tpu.memory_space<vmem>>, vector<1x8x128xf32>
    %1699 = vector.shape_cast %1698 : vector<1x8x128xf32> to vector<8x128xf32>
    %c20_1211 = arith.constant 20 : index
    %c0_1212 = arith.constant 0 : index
    %c0_1213 = arith.constant 0 : index
    %1700 = vector.load %arg5[%c20_1211, %c0_1212, %c0_1213] : memref<22x8x128xf32, #tpu.memory_space<vmem>>, vector<1x8x128xf32>
    %1701 = vector.shape_cast %1700 : vector<1x8x128xf32> to vector<8x128xf32>
    %1702 = arith.mulf %1699, %1701 : vector<8x128xf32>
    %1703 = arith.addf %1697, %1702 : vector<8x128xf32>
    %c19_1214 = arith.constant 19 : index
    %c0_1215 = arith.constant 0 : index
    %c0_1216 = arith.constant 0 : index
    %1704 = vector.load %arg4[%c19_1214, %c0_1215, %c0_1216] : memref<22x8x128xf32, #tpu.memory_space<vmem>>, vector<1x8x128xf32>
    %1705 = vector.shape_cast %1704 : vector<1x8x128xf32> to vector<8x128xf32>
    %c21_1217 = arith.constant 21 : index
    %c0_1218 = arith.constant 0 : index
    %c0_1219 = arith.constant 0 : index
    %1706 = vector.load %arg4[%c21_1217, %c0_1218, %c0_1219] : memref<22x8x128xf32, #tpu.memory_space<vmem>>, vector<1x8x128xf32>
    %1707 = vector.shape_cast %1706 : vector<1x8x128xf32> to vector<8x128xf32>
    %1708 = arith.mulf %1705, %1707 : vector<8x128xf32>
    %1709 = arith.addf %1703, %1708 : vector<8x128xf32>
    %c19_1220 = arith.constant 19 : index
    %c0_1221 = arith.constant 0 : index
    %c0_1222 = arith.constant 0 : index
    %1710 = vector.load %arg5[%c19_1220, %c0_1221, %c0_1222] : memref<22x8x128xf32, #tpu.memory_space<vmem>>, vector<1x8x128xf32>
    %1711 = vector.shape_cast %1710 : vector<1x8x128xf32> to vector<8x128xf32>
    %c21_1223 = arith.constant 21 : index
    %c0_1224 = arith.constant 0 : index
    %c0_1225 = arith.constant 0 : index
    %1712 = vector.load %arg5[%c21_1223, %c0_1224, %c0_1225] : memref<22x8x128xf32, #tpu.memory_space<vmem>>, vector<1x8x128xf32>
    %1713 = vector.shape_cast %1712 : vector<1x8x128xf32> to vector<8x128xf32>
    %1714 = arith.mulf %1711, %1713 : vector<8x128xf32>
    %1715 = arith.addf %1709, %1714 : vector<8x128xf32>
    %c18_1226 = arith.constant 18 : index
    %c0_1227 = arith.constant 0 : index
    %c0_1228 = arith.constant 0 : index
    %1716 = vector.load %arg5[%c18_1226, %c0_1227, %c0_1228] : memref<22x8x128xf32, #tpu.memory_space<vmem>>, vector<1x8x128xf32>
    %1717 = vector.shape_cast %1716 : vector<1x8x128xf32> to vector<8x128xf32>
    %c20_1229 = arith.constant 20 : index
    %c0_1230 = arith.constant 0 : index
    %c0_1231 = arith.constant 0 : index
    %1718 = vector.load %arg4[%c20_1229, %c0_1230, %c0_1231] : memref<22x8x128xf32, #tpu.memory_space<vmem>>, vector<1x8x128xf32>
    %1719 = vector.shape_cast %1718 : vector<1x8x128xf32> to vector<8x128xf32>
    %1720 = arith.mulf %1717, %1719 : vector<8x128xf32>
    %c18_1232 = arith.constant 18 : index
    %c0_1233 = arith.constant 0 : index
    %c0_1234 = arith.constant 0 : index
    %1721 = vector.load %arg4[%c18_1232, %c0_1233, %c0_1234] : memref<22x8x128xf32, #tpu.memory_space<vmem>>, vector<1x8x128xf32>
    %1722 = vector.shape_cast %1721 : vector<1x8x128xf32> to vector<8x128xf32>
    %c20_1235 = arith.constant 20 : index
    %c0_1236 = arith.constant 0 : index
    %c0_1237 = arith.constant 0 : index
    %1723 = vector.load %arg5[%c20_1235, %c0_1236, %c0_1237] : memref<22x8x128xf32, #tpu.memory_space<vmem>>, vector<1x8x128xf32>
    %1724 = vector.shape_cast %1723 : vector<1x8x128xf32> to vector<8x128xf32>
    %1725 = arith.mulf %1722, %1724 : vector<8x128xf32>
    %1726 = arith.subf %1720, %1725 : vector<8x128xf32>
    %c19_1238 = arith.constant 19 : index
    %c0_1239 = arith.constant 0 : index
    %c0_1240 = arith.constant 0 : index
    %1727 = vector.load %arg5[%c19_1238, %c0_1239, %c0_1240] : memref<22x8x128xf32, #tpu.memory_space<vmem>>, vector<1x8x128xf32>
    %1728 = vector.shape_cast %1727 : vector<1x8x128xf32> to vector<8x128xf32>
    %c21_1241 = arith.constant 21 : index
    %c0_1242 = arith.constant 0 : index
    %c0_1243 = arith.constant 0 : index
    %1729 = vector.load %arg4[%c21_1241, %c0_1242, %c0_1243] : memref<22x8x128xf32, #tpu.memory_space<vmem>>, vector<1x8x128xf32>
    %1730 = vector.shape_cast %1729 : vector<1x8x128xf32> to vector<8x128xf32>
    %1731 = arith.mulf %1728, %1730 : vector<8x128xf32>
    %1732 = arith.addf %1726, %1731 : vector<8x128xf32>
    %c19_1244 = arith.constant 19 : index
    %c0_1245 = arith.constant 0 : index
    %c0_1246 = arith.constant 0 : index
    %1733 = vector.load %arg4[%c19_1244, %c0_1245, %c0_1246] : memref<22x8x128xf32, #tpu.memory_space<vmem>>, vector<1x8x128xf32>
    %1734 = vector.shape_cast %1733 : vector<1x8x128xf32> to vector<8x128xf32>
    %c21_1247 = arith.constant 21 : index
    %c0_1248 = arith.constant 0 : index
    %c0_1249 = arith.constant 0 : index
    %1735 = vector.load %arg5[%c21_1247, %c0_1248, %c0_1249] : memref<22x8x128xf32, #tpu.memory_space<vmem>>, vector<1x8x128xf32>
    %1736 = vector.shape_cast %1735 : vector<1x8x128xf32> to vector<8x128xf32>
    %1737 = arith.mulf %1734, %1736 : vector<8x128xf32>
    %1738 = arith.subf %1732, %1737 : vector<8x128xf32>
    %c12_1250 = arith.constant 12 : index
    %c0_1251 = arith.constant 0 : index
    %c0_1252 = arith.constant 0 : index
    %1739 = vector.load %arg4[%c12_1250, %c0_1251, %c0_1252] : memref<22x8x128xf32, #tpu.memory_space<vmem>>, vector<1x8x128xf32>
    %1740 = vector.shape_cast %1739 : vector<1x8x128xf32> to vector<8x128xf32>
    %c12_1253 = arith.constant 12 : index
    %c0_1254 = arith.constant 0 : index
    %c0_1255 = arith.constant 0 : index
    %1741 = vector.load %arg5[%c12_1253, %c0_1254, %c0_1255] : memref<22x8x128xf32, #tpu.memory_space<vmem>>, vector<1x8x128xf32>
    %1742 = vector.shape_cast %1741 : vector<1x8x128xf32> to vector<8x128xf32>
    %1743 = arith.mulf %1715, %1740 : vector<8x128xf32>
    %1744 = arith.mulf %1738, %1742 : vector<8x128xf32>
    %1745 = arith.subf %1743, %1744 : vector<8x128xf32>
    %1746 = arith.mulf %1715, %1742 : vector<8x128xf32>
    %1747 = arith.mulf %1738, %1740 : vector<8x128xf32>
    %1748 = arith.addf %1746, %1747 : vector<8x128xf32>
    %c0_1256 = arith.constant 0 : index
    %c18_1257 = arith.constant 18 : index
    %1749 = memref.load %arg1[%c0_1256, %c18_1257] : memref<2x20xf32, #tpu.memory_space<smem>>
    %c0_1258 = arith.constant 0 : index
    %c18_1259 = arith.constant 18 : index
    %1750 = memref.load %arg2[%c0_1258, %c18_1259] : memref<2x20xf32, #tpu.memory_space<smem>>
    %1751 = vector.broadcast %1749 : f32 to vector<8x128xf32>
    %1752 = arith.mulf %1751, %1745 : vector<8x128xf32>
    %1753 = vector.broadcast %1750 : f32 to vector<8x128xf32>
    %1754 = arith.mulf %1753, %1748 : vector<8x128xf32>
    %1755 = arith.subf %1752, %1754 : vector<8x128xf32>
    %1756 = arith.addf %1662, %1755 : vector<8x128xf32>
    %1757 = vector.broadcast %1749 : f32 to vector<8x128xf32>
    %1758 = arith.mulf %1757, %1748 : vector<8x128xf32>
    %1759 = vector.broadcast %1750 : f32 to vector<8x128xf32>
    %1760 = arith.mulf %1759, %1745 : vector<8x128xf32>
    %1761 = arith.addf %1758, %1760 : vector<8x128xf32>
    %1762 = arith.addf %1668, %1761 : vector<8x128xf32>
    %c13_1260 = arith.constant 13 : index
    %c0_1261 = arith.constant 0 : index
    %c0_1262 = arith.constant 0 : index
    %1763 = vector.load %arg4[%c13_1260, %c0_1261, %c0_1262] : memref<22x8x128xf32, #tpu.memory_space<vmem>>, vector<1x8x128xf32>
    %1764 = vector.shape_cast %1763 : vector<1x8x128xf32> to vector<8x128xf32>
    %c13_1263 = arith.constant 13 : index
    %c0_1264 = arith.constant 0 : index
    %c0_1265 = arith.constant 0 : index
    %1765 = vector.load %arg5[%c13_1263, %c0_1264, %c0_1265] : memref<22x8x128xf32, #tpu.memory_space<vmem>>, vector<1x8x128xf32>
    %1766 = vector.shape_cast %1765 : vector<1x8x128xf32> to vector<8x128xf32>
    %1767 = arith.mulf %1715, %1764 : vector<8x128xf32>
    %1768 = arith.mulf %1738, %1766 : vector<8x128xf32>
    %1769 = arith.subf %1767, %1768 : vector<8x128xf32>
    %1770 = arith.mulf %1715, %1766 : vector<8x128xf32>
    %1771 = arith.mulf %1738, %1764 : vector<8x128xf32>
    %1772 = arith.addf %1770, %1771 : vector<8x128xf32>
    %c1_1266 = arith.constant 1 : index
    %c18_1267 = arith.constant 18 : index
    %1773 = memref.load %arg1[%c1_1266, %c18_1267] : memref<2x20xf32, #tpu.memory_space<smem>>
    %c1_1268 = arith.constant 1 : index
    %c18_1269 = arith.constant 18 : index
    %1774 = memref.load %arg2[%c1_1268, %c18_1269] : memref<2x20xf32, #tpu.memory_space<smem>>
    %1775 = vector.broadcast %1773 : f32 to vector<8x128xf32>
    %1776 = arith.mulf %1775, %1769 : vector<8x128xf32>
    %1777 = vector.broadcast %1774 : f32 to vector<8x128xf32>
    %1778 = arith.mulf %1777, %1772 : vector<8x128xf32>
    %1779 = arith.subf %1776, %1778 : vector<8x128xf32>
    %1780 = arith.addf %1686, %1779 : vector<8x128xf32>
    %1781 = vector.broadcast %1773 : f32 to vector<8x128xf32>
    %1782 = arith.mulf %1781, %1772 : vector<8x128xf32>
    %1783 = vector.broadcast %1774 : f32 to vector<8x128xf32>
    %1784 = arith.mulf %1783, %1769 : vector<8x128xf32>
    %1785 = arith.addf %1782, %1784 : vector<8x128xf32>
    %1786 = arith.addf %1692, %1785 : vector<8x128xf32>
    %c14_1270 = arith.constant 14 : index
    %c0_1271 = arith.constant 0 : index
    %c0_1272 = arith.constant 0 : index
    %1787 = vector.load %arg4[%c14_1270, %c0_1271, %c0_1272] : memref<22x8x128xf32, #tpu.memory_space<vmem>>, vector<1x8x128xf32>
    %1788 = vector.shape_cast %1787 : vector<1x8x128xf32> to vector<8x128xf32>
    %c18_1273 = arith.constant 18 : index
    %c0_1274 = arith.constant 0 : index
    %c0_1275 = arith.constant 0 : index
    %1789 = vector.load %arg4[%c18_1273, %c0_1274, %c0_1275] : memref<22x8x128xf32, #tpu.memory_space<vmem>>, vector<1x8x128xf32>
    %1790 = vector.shape_cast %1789 : vector<1x8x128xf32> to vector<8x128xf32>
    %1791 = arith.mulf %1788, %1790 : vector<8x128xf32>
    %c14_1276 = arith.constant 14 : index
    %c0_1277 = arith.constant 0 : index
    %c0_1278 = arith.constant 0 : index
    %1792 = vector.load %arg5[%c14_1276, %c0_1277, %c0_1278] : memref<22x8x128xf32, #tpu.memory_space<vmem>>, vector<1x8x128xf32>
    %1793 = vector.shape_cast %1792 : vector<1x8x128xf32> to vector<8x128xf32>
    %c18_1279 = arith.constant 18 : index
    %c0_1280 = arith.constant 0 : index
    %c0_1281 = arith.constant 0 : index
    %1794 = vector.load %arg5[%c18_1279, %c0_1280, %c0_1281] : memref<22x8x128xf32, #tpu.memory_space<vmem>>, vector<1x8x128xf32>
    %1795 = vector.shape_cast %1794 : vector<1x8x128xf32> to vector<8x128xf32>
    %1796 = arith.mulf %1793, %1795 : vector<8x128xf32>
    %1797 = arith.addf %1791, %1796 : vector<8x128xf32>
    %c15_1282 = arith.constant 15 : index
    %c0_1283 = arith.constant 0 : index
    %c0_1284 = arith.constant 0 : index
    %1798 = vector.load %arg4[%c15_1282, %c0_1283, %c0_1284] : memref<22x8x128xf32, #tpu.memory_space<vmem>>, vector<1x8x128xf32>
    %1799 = vector.shape_cast %1798 : vector<1x8x128xf32> to vector<8x128xf32>
    %c19_1285 = arith.constant 19 : index
    %c0_1286 = arith.constant 0 : index
    %c0_1287 = arith.constant 0 : index
    %1800 = vector.load %arg4[%c19_1285, %c0_1286, %c0_1287] : memref<22x8x128xf32, #tpu.memory_space<vmem>>, vector<1x8x128xf32>
    %1801 = vector.shape_cast %1800 : vector<1x8x128xf32> to vector<8x128xf32>
    %1802 = arith.mulf %1799, %1801 : vector<8x128xf32>
    %1803 = arith.addf %1797, %1802 : vector<8x128xf32>
    %c15_1288 = arith.constant 15 : index
    %c0_1289 = arith.constant 0 : index
    %c0_1290 = arith.constant 0 : index
    %1804 = vector.load %arg5[%c15_1288, %c0_1289, %c0_1290] : memref<22x8x128xf32, #tpu.memory_space<vmem>>, vector<1x8x128xf32>
    %1805 = vector.shape_cast %1804 : vector<1x8x128xf32> to vector<8x128xf32>
    %c19_1291 = arith.constant 19 : index
    %c0_1292 = arith.constant 0 : index
    %c0_1293 = arith.constant 0 : index
    %1806 = vector.load %arg5[%c19_1291, %c0_1292, %c0_1293] : memref<22x8x128xf32, #tpu.memory_space<vmem>>, vector<1x8x128xf32>
    %1807 = vector.shape_cast %1806 : vector<1x8x128xf32> to vector<8x128xf32>
    %1808 = arith.mulf %1805, %1807 : vector<8x128xf32>
    %1809 = arith.addf %1803, %1808 : vector<8x128xf32>
    %c14_1294 = arith.constant 14 : index
    %c0_1295 = arith.constant 0 : index
    %c0_1296 = arith.constant 0 : index
    %1810 = vector.load %arg5[%c14_1294, %c0_1295, %c0_1296] : memref<22x8x128xf32, #tpu.memory_space<vmem>>, vector<1x8x128xf32>
    %1811 = vector.shape_cast %1810 : vector<1x8x128xf32> to vector<8x128xf32>
    %c18_1297 = arith.constant 18 : index
    %c0_1298 = arith.constant 0 : index
    %c0_1299 = arith.constant 0 : index
    %1812 = vector.load %arg4[%c18_1297, %c0_1298, %c0_1299] : memref<22x8x128xf32, #tpu.memory_space<vmem>>, vector<1x8x128xf32>
    %1813 = vector.shape_cast %1812 : vector<1x8x128xf32> to vector<8x128xf32>
    %1814 = arith.mulf %1811, %1813 : vector<8x128xf32>
    %c14_1300 = arith.constant 14 : index
    %c0_1301 = arith.constant 0 : index
    %c0_1302 = arith.constant 0 : index
    %1815 = vector.load %arg4[%c14_1300, %c0_1301, %c0_1302] : memref<22x8x128xf32, #tpu.memory_space<vmem>>, vector<1x8x128xf32>
    %1816 = vector.shape_cast %1815 : vector<1x8x128xf32> to vector<8x128xf32>
    %c18_1303 = arith.constant 18 : index
    %c0_1304 = arith.constant 0 : index
    %c0_1305 = arith.constant 0 : index
    %1817 = vector.load %arg5[%c18_1303, %c0_1304, %c0_1305] : memref<22x8x128xf32, #tpu.memory_space<vmem>>, vector<1x8x128xf32>
    %1818 = vector.shape_cast %1817 : vector<1x8x128xf32> to vector<8x128xf32>
    %1819 = arith.mulf %1816, %1818 : vector<8x128xf32>
    %1820 = arith.subf %1814, %1819 : vector<8x128xf32>
    %c15_1306 = arith.constant 15 : index
    %c0_1307 = arith.constant 0 : index
    %c0_1308 = arith.constant 0 : index
    %1821 = vector.load %arg5[%c15_1306, %c0_1307, %c0_1308] : memref<22x8x128xf32, #tpu.memory_space<vmem>>, vector<1x8x128xf32>
    %1822 = vector.shape_cast %1821 : vector<1x8x128xf32> to vector<8x128xf32>
    %c19_1309 = arith.constant 19 : index
    %c0_1310 = arith.constant 0 : index
    %c0_1311 = arith.constant 0 : index
    %1823 = vector.load %arg4[%c19_1309, %c0_1310, %c0_1311] : memref<22x8x128xf32, #tpu.memory_space<vmem>>, vector<1x8x128xf32>
    %1824 = vector.shape_cast %1823 : vector<1x8x128xf32> to vector<8x128xf32>
    %1825 = arith.mulf %1822, %1824 : vector<8x128xf32>
    %1826 = arith.addf %1820, %1825 : vector<8x128xf32>
    %c15_1312 = arith.constant 15 : index
    %c0_1313 = arith.constant 0 : index
    %c0_1314 = arith.constant 0 : index
    %1827 = vector.load %arg4[%c15_1312, %c0_1313, %c0_1314] : memref<22x8x128xf32, #tpu.memory_space<vmem>>, vector<1x8x128xf32>
    %1828 = vector.shape_cast %1827 : vector<1x8x128xf32> to vector<8x128xf32>
    %c19_1315 = arith.constant 19 : index
    %c0_1316 = arith.constant 0 : index
    %c0_1317 = arith.constant 0 : index
    %1829 = vector.load %arg5[%c19_1315, %c0_1316, %c0_1317] : memref<22x8x128xf32, #tpu.memory_space<vmem>>, vector<1x8x128xf32>
    %1830 = vector.shape_cast %1829 : vector<1x8x128xf32> to vector<8x128xf32>
    %1831 = arith.mulf %1828, %1830 : vector<8x128xf32>
    %1832 = arith.subf %1826, %1831 : vector<8x128xf32>
    %c14_1318 = arith.constant 14 : index
    %c0_1319 = arith.constant 0 : index
    %c0_1320 = arith.constant 0 : index
    %1833 = vector.load %arg4[%c14_1318, %c0_1319, %c0_1320] : memref<22x8x128xf32, #tpu.memory_space<vmem>>, vector<1x8x128xf32>
    %1834 = vector.shape_cast %1833 : vector<1x8x128xf32> to vector<8x128xf32>
    %c14_1321 = arith.constant 14 : index
    %c0_1322 = arith.constant 0 : index
    %c0_1323 = arith.constant 0 : index
    %1835 = vector.load %arg5[%c14_1321, %c0_1322, %c0_1323] : memref<22x8x128xf32, #tpu.memory_space<vmem>>, vector<1x8x128xf32>
    %1836 = vector.shape_cast %1835 : vector<1x8x128xf32> to vector<8x128xf32>
    %1837 = arith.mulf %1809, %1834 : vector<8x128xf32>
    %1838 = arith.mulf %1832, %1836 : vector<8x128xf32>
    %1839 = arith.subf %1837, %1838 : vector<8x128xf32>
    %1840 = arith.mulf %1809, %1836 : vector<8x128xf32>
    %1841 = arith.mulf %1832, %1834 : vector<8x128xf32>
    %1842 = arith.addf %1840, %1841 : vector<8x128xf32>
    %c0_1324 = arith.constant 0 : index
    %c19_1325 = arith.constant 19 : index
    %1843 = memref.load %arg1[%c0_1324, %c19_1325] : memref<2x20xf32, #tpu.memory_space<smem>>
    %c0_1326 = arith.constant 0 : index
    %c19_1327 = arith.constant 19 : index
    %1844 = memref.load %arg2[%c0_1326, %c19_1327] : memref<2x20xf32, #tpu.memory_space<smem>>
    %1845 = vector.broadcast %1843 : f32 to vector<8x128xf32>
    %1846 = arith.mulf %1845, %1839 : vector<8x128xf32>
    %1847 = vector.broadcast %1844 : f32 to vector<8x128xf32>
    %1848 = arith.mulf %1847, %1842 : vector<8x128xf32>
    %1849 = arith.subf %1846, %1848 : vector<8x128xf32>
    %1850 = arith.addf %1756, %1849 : vector<8x128xf32>
    %1851 = vector.broadcast %1843 : f32 to vector<8x128xf32>
    %1852 = arith.mulf %1851, %1842 : vector<8x128xf32>
    %1853 = vector.broadcast %1844 : f32 to vector<8x128xf32>
    %1854 = arith.mulf %1853, %1839 : vector<8x128xf32>
    %1855 = arith.addf %1852, %1854 : vector<8x128xf32>
    %1856 = arith.addf %1762, %1855 : vector<8x128xf32>
    %c15_1328 = arith.constant 15 : index
    %c0_1329 = arith.constant 0 : index
    %c0_1330 = arith.constant 0 : index
    %1857 = vector.load %arg4[%c15_1328, %c0_1329, %c0_1330] : memref<22x8x128xf32, #tpu.memory_space<vmem>>, vector<1x8x128xf32>
    %1858 = vector.shape_cast %1857 : vector<1x8x128xf32> to vector<8x128xf32>
    %c15_1331 = arith.constant 15 : index
    %c0_1332 = arith.constant 0 : index
    %c0_1333 = arith.constant 0 : index
    %1859 = vector.load %arg5[%c15_1331, %c0_1332, %c0_1333] : memref<22x8x128xf32, #tpu.memory_space<vmem>>, vector<1x8x128xf32>
    %1860 = vector.shape_cast %1859 : vector<1x8x128xf32> to vector<8x128xf32>
    %1861 = arith.mulf %1809, %1858 : vector<8x128xf32>
    %1862 = arith.mulf %1832, %1860 : vector<8x128xf32>
    %1863 = arith.subf %1861, %1862 : vector<8x128xf32>
    %1864 = arith.mulf %1809, %1860 : vector<8x128xf32>
    %1865 = arith.mulf %1832, %1858 : vector<8x128xf32>
    %1866 = arith.addf %1864, %1865 : vector<8x128xf32>
    %c1_1334 = arith.constant 1 : index
    %c19_1335 = arith.constant 19 : index
    %1867 = memref.load %arg1[%c1_1334, %c19_1335] : memref<2x20xf32, #tpu.memory_space<smem>>
    %c1_1336 = arith.constant 1 : index
    %c19_1337 = arith.constant 19 : index
    %1868 = memref.load %arg2[%c1_1336, %c19_1337] : memref<2x20xf32, #tpu.memory_space<smem>>
    %1869 = vector.broadcast %1867 : f32 to vector<8x128xf32>
    %1870 = arith.mulf %1869, %1863 : vector<8x128xf32>
    %1871 = vector.broadcast %1868 : f32 to vector<8x128xf32>
    %1872 = arith.mulf %1871, %1866 : vector<8x128xf32>
    %1873 = arith.subf %1870, %1872 : vector<8x128xf32>
    %1874 = arith.addf %1780, %1873 : vector<8x128xf32>
    %1875 = vector.broadcast %1867 : f32 to vector<8x128xf32>
    %1876 = arith.mulf %1875, %1866 : vector<8x128xf32>
    %1877 = vector.broadcast %1868 : f32 to vector<8x128xf32>
    %1878 = arith.mulf %1877, %1863 : vector<8x128xf32>
    %1879 = arith.addf %1876, %1878 : vector<8x128xf32>
    %1880 = arith.addf %1786, %1879 : vector<8x128xf32>
    %c0_1338 = arith.constant 0 : index
    %c0_1339 = arith.constant 0 : index
    %1881 = vector.load %arg3[%c0_1338, %c0_1339] : memref<8x128xf32, #tpu.memory_space<vmem>>, vector<8x128xf32>
    %c10_1340 = arith.constant 10 : index
    %c0_1341 = arith.constant 0 : index
    %c0_1342 = arith.constant 0 : index
    %1882 = vector.load %arg4[%c10_1340, %c0_1341, %c0_1342] : memref<22x8x128xf32, #tpu.memory_space<vmem>>, vector<1x8x128xf32>
    %1883 = vector.shape_cast %1882 : vector<1x8x128xf32> to vector<8x128xf32>
    %1884 = arith.mulf %1881, %1850 : vector<8x128xf32>
    %1885 = arith.addf %1883, %1884 : vector<8x128xf32>
    %c0_1343 = arith.constant 0 : index
    %c0_1344 = arith.constant 0 : index
    %c0_1345 = arith.constant 0 : index
    %1886 = vector.load %arg6[%c0_1343, %c0_1344, %c0_1345] : memref<2x8x128xf32, #tpu.memory_space<vmem>>, vector<1x8x128xf32>
    %1887 = vector.shape_cast %1886 : vector<1x8x128xf32> to vector<8x128xf32>
    %1888 = vector.shape_cast %1885 : vector<8x128xf32> to vector<1x8x128xf32>
    tpu.vector_store %arg6[%c0_1343, %c0_1344, %c0_1345], %1888 {strides = array<i32>} : memref<2x8x128xf32, #tpu.memory_space<vmem>>, vector<1x8x128xf32>,
    %c10_1346 = arith.constant 10 : index
    %c0_1347 = arith.constant 0 : index
    %c0_1348 = arith.constant 0 : index
    %1889 = vector.load %arg5[%c10_1346, %c0_1347, %c0_1348] : memref<22x8x128xf32, #tpu.memory_space<vmem>>, vector<1x8x128xf32>
    %1890 = vector.shape_cast %1889 : vector<1x8x128xf32> to vector<8x128xf32>
    %1891 = arith.mulf %1881, %1856 : vector<8x128xf32>
    %1892 = arith.addf %1890, %1891 : vector<8x128xf32>
    %c0_1349 = arith.constant 0 : index
    %c0_1350 = arith.constant 0 : index
    %c0_1351 = arith.constant 0 : index
    %1893 = vector.load %arg7[%c0_1349, %c0_1350, %c0_1351] : memref<2x8x128xf32, #tpu.memory_space<vmem>>, vector<1x8x128xf32>
    %1894 = vector.shape_cast %1893 : vector<1x8x128xf32> to vector<8x128xf32>
    %1895 = vector.shape_cast %1892 : vector<8x128xf32> to vector<1x8x128xf32>
    tpu.vector_store %arg7[%c0_1349, %c0_1350, %c0_1351], %1895 {strides = array<i32>} : memref<2x8x128xf32, #tpu.memory_space<vmem>>, vector<1x8x128xf32>,
    %c11_1352 = arith.constant 11 : index
    %c0_1353 = arith.constant 0 : index
    %c0_1354 = arith.constant 0 : index
    %1896 = vector.load %arg4[%c11_1352, %c0_1353, %c0_1354] : memref<22x8x128xf32, #tpu.memory_space<vmem>>, vector<1x8x128xf32>
    %1897 = vector.shape_cast %1896 : vector<1x8x128xf32> to vector<8x128xf32>
    %1898 = arith.mulf %1881, %1874 : vector<8x128xf32>
    %1899 = arith.addf %1897, %1898 : vector<8x128xf32>
    %c1_1355 = arith.constant 1 : index
    %c0_1356 = arith.constant 0 : index
    %c0_1357 = arith.constant 0 : index
    %1900 = vector.load %arg6[%c1_1355, %c0_1356, %c0_1357] : memref<2x8x128xf32, #tpu.memory_space<vmem>>, vector<1x8x128xf32>
    %1901 = vector.shape_cast %1900 : vector<1x8x128xf32> to vector<8x128xf32>
    %1902 = vector.shape_cast %1899 : vector<8x128xf32> to vector<1x8x128xf32>
    tpu.vector_store %arg6[%c1_1355, %c0_1356, %c0_1357], %1902 {strides = array<i32>} : memref<2x8x128xf32, #tpu.memory_space<vmem>>, vector<1x8x128xf32>,
    %c11_1358 = arith.constant 11 : index
    %c0_1359 = arith.constant 0 : index
    %c0_1360 = arith.constant 0 : index
    %1903 = vector.load %arg5[%c11_1358, %c0_1359, %c0_1360] : memref<22x8x128xf32, #tpu.memory_space<vmem>>, vector<1x8x128xf32>
    %1904 = vector.shape_cast %1903 : vector<1x8x128xf32> to vector<8x128xf32>
    %1905 = arith.mulf %1881, %1880 : vector<8x128xf32>
    %1906 = arith.addf %1904, %1905 : vector<8x128xf32>
    %c1_1361 = arith.constant 1 : index
    %c0_1362 = arith.constant 0 : index
    %c0_1363 = arith.constant 0 : index
    %1907 = vector.load %arg7[%c1_1361, %c0_1362, %c0_1363] : memref<2x8x128xf32, #tpu.memory_space<vmem>>, vector<1x8x128xf32>
    %1908 = vector.shape_cast %1907 : vector<1x8x128xf32> to vector<8x128xf32>
    %1909 = vector.shape_cast %1906 : vector<8x128xf32> to vector<1x8x128xf32>
    tpu.vector_store %arg7[%c1_1361, %c0_1362, %c0_1363], %1909 {strides = array<i32>} : memref<2x8x128xf32, #tpu.memory_space<vmem>>, vector<1x8x128xf32>,
    return
  }
  func.func @transform_0(%arg0: i32) -> (i32, i32) {
    %c0_i32 = arith.constant 0 : i32
    %c0_i32_0 = arith.constant 0 : i32
    %c0_i32_1 = arith.constant 0 : i32
    return %c0_i32, %c0_i32_0 : i32, i32
  }
  func.func @transform_1(%arg0: i32) -> (i32, i32) {
    %c0_i32 = arith.constant 0 : i32
    %c0_i32_0 = arith.constant 0 : i32
    %c0_i32_1 = arith.constant 0 : i32
    return %c0_i32, %c0_i32_0 : i32, i32
  }
  func.func @transform_2(%arg0: i32) -> (i32, i32) {
    %c0_i32 = arith.constant 0 : i32
    %c0_i32_0 = arith.constant 0 : i32
    return %arg0, %c0_i32 : i32, i32
  }
  func.func @transform_3(%arg0: i32) -> (i32, i32, i32) {
    %c0_i32 = arith.constant 0 : i32
    %c0_i32_0 = arith.constant 0 : i32
    %c0_i32_1 = arith.constant 0 : i32
    return %c0_i32, %arg0, %c0_i32_0 : i32, i32, i32
  }
  func.func @transform_4(%arg0: i32) -> (i32, i32, i32) {
    %c0_i32 = arith.constant 0 : i32
    %c0_i32_0 = arith.constant 0 : i32
    %c0_i32_1 = arith.constant 0 : i32
    return %c0_i32, %arg0, %c0_i32_0 : i32, i32, i32
  }
  func.func @transform_5(%arg0: i32) -> (i32, i32, i32) {
    %c0_i32 = arith.constant 0 : i32
    %c0_i32_0 = arith.constant 0 : i32
    %c0_i32_1 = arith.constant 0 : i32
    return %c0_i32, %arg0, %c0_i32_0 : i32, i32, i32
  }
  func.func @transform_6(%arg0: i32) -> (i32, i32, i32) {
    %c0_i32 = arith.constant 0 : i32
    %c0_i32_0 = arith.constant 0 : i32
    %c0_i32_1 = arith.constant 0 : i32
    return %c0_i32, %arg0, %c0_i32_0 : i32, i32, i32
  }
}

</mosaic_0001>

<bundles_post_ra>
// kernel: tpu_custom_call.1
= control target key start
LH: loop header
LB: loop body
LE: loop exit
PB: predicated region body
PF: predicated region fallthrough
CT: control target
= control target key end

     0   :  { %12 = vsyncpa [#allocation5], 0  ;;  %s2405_s0 = inlined_call_operand.hbm [shape: f32[2,20], index: 0, kind: input, shape index: {}]   ;;  %s2406_s1 = inlined_call_operand.vmem [shape: f32[2,20], index: 1, kind: input, shape index: {}]   ;;  %s2407_s2 = inlined_call_operand.hbm [shape: f32[8,128], index: 2, kind: input, shape index: {}]   ;;  %s2408_s3 = inlined_call_operand.hbm [shape: f32[22,8,128], index: 3, kind: input, shape index: {}]   ;;  %s2409_s4 = inlined_call_operand.hbm [shape: f32[22,8,128], index: 4, kind: input, shape index: {}]   ;;  %s2410_s5 = inlined_call_operand.hbm [shape: f32[2,8,128], index: 5, kind: output, shape index: {0}]   ;;  %s2411_s6 = inlined_call_operand.hbm [shape: f32[2,8,128], index: 6, kind: output, shape index: {1}]  }
   0x1   :  { %13 = vsyncpa [#allocation6], 0 }
   0x2   :  { %14 = vsyncpa [#allocation3], 0 }
   0x3   :  { %15 = vsyncpa [#allocation10], 0 }
   0x4   :  { %16 = vsyncpa [#allocation4], 0 }
   0x5   :  { %17 = vsyncpa [#allocation14], 0  ;;  %s1426_s21 = smov [#allocation9]   ;;  %s1282_s25 = scalar_lea.hbm %s2408_s3, 2816 }
   0x6   :  { %s51_s22 = sshll.u32 %s1426_s21, 4  ;;  %p1283_p0 = scmp.ne.s32.totalorder %s2408_s3, %s1282_s25  ;;  %s52_s22 = int_to_ptr.vmem [resolvable:$true] %s51_s22 }
   0x7   :  { %p1286_p1 = scmp.lt.u32.totalorder %s1282_s25, %s2408_s3 }
   0x9   :  { %p1288_p2 = pnand %p1286_p1, %p1283_p0 }
   0xb   :  { %1291 = shalt.err (!%p1288_p2)
}
   0xc   :  { %s1292_s30 = scalar_lea.vmem %s52_s22, 2816  ;;  %p1297_p4 = scmp.lt.s32.totalorder %s52_s22, %s52_s22 }
   0xd   :  { %p1293_p3 = scmp.ne.s32.totalorder %s52_s22, %s1292_s30  ;;  %p1298_p5 = scmp.lt.s32.totalorder %s1292_s30, %s1292_s30 }
   0xf   :  { %p1299_p6 = por %p1298_p5, %p1297_p4 }
  0x11   :  { %p1300_p7 = pnand %p1299_p6, %p1293_p3 }
  0x13   :  { %1303 = shalt.err (!%p1300_p7)
}
  0x14   :  { %s1427_s7 = smov 128   ;;  %s1428_s8 = smov 8  }
  0x15   :  { %57 = dma.hbm_to_vmem [thread:$0]  %s2408_s3, 2816, %s52_s22, [#allocation10], %s1427_s7, %s1427_s7, %s1428_s8  }
  0x16   :  { %s1304_s13 = scalar_lea.hbm %s2405_s0, 32 }
  0x17   :  { %p1305_p8 = scmp.ne.s32.totalorder %s2405_s0, %s1304_s13  ;;  %p1308_p9 = scmp.lt.u32.totalorder %s1304_s13, %s2405_s0 }
  0x19   :  { %p1310_p10 = pnand %p1308_p9, %p1305_p8 }
  0x1b   :  { %1313 = shalt.err (!%p1310_p10)
}
  0x1c   :  { %s1429_s18 = smov [#allocation2]   ;;  %s32_s22 = sshll.u32 %s2406_s1, 4  ;;  %s33_s22 = int_to_ptr.vmem [resolvable:$true] %s32_s22 }
  0x1d   :  { %25 = dma.hbm_to_smem %s2405_s0, 32, %s1429_s18, [#allocation5]  }
  0x1e   :  { %s1314_s23 = scalar_lea.vmem %s33_s22, 32  ;;  %p1319_p12 = scmp.lt.s32.totalorder %s33_s22, %s33_s22 }
  0x1f   :  { %p1315_p11 = scmp.ne.s32.totalorder %s33_s22, %s1314_s23  ;;  %p1320_p13 = scmp.lt.s32.totalorder %s1314_s23, %s1314_s23 }
  0x21   :  { %p1321_p0 = por %p1320_p13, %p1319_p12 }
  0x23   :  { %p1322_p1 = pnand %p1321_p0, %p1315_p11 }
  0x25   :  { %1325 = shalt.err (!%p1322_p1)
}
  0x26   :  { %s1430_s24 = smov [#allocation7]   ;;  %s1431_s25 = smov [#allocation8]  }
  0x27   :  { %35 = dma.vmem_to_smem %s33_s22, 32, %s1430_s24, [#allocation6]  }
  0x28   :  { %s42_s26 = sshll.u32 %s1431_s25, 4  ;;  %s1432_s27 = smov [#allocation11]   ;;  %s43_s26 = int_to_ptr.vmem [resolvable:$true] %s42_s26 }
  0x29   :  { %s63_s28 = sshll.u32 %s1432_s27, 4  ;;  %s1326_s30 = scalar_lea.hbm %s2407_s2, 128  ;;  %s64_s28 = int_to_ptr.vmem [resolvable:$true] %s63_s28 }
  0x2a   :  { %p1327_p2 = scmp.ne.s32.totalorder %s2407_s2, %s1326_s30  ;;  %p1330_p3 = scmp.lt.u32.totalorder %s1326_s30, %s2407_s2 }
  0x2c   :  { %p1332_p4 = pnand %p1330_p3, %p1327_p2 }
  0x2e   :  { %1335 = shalt.err (!%p1332_p4)
}
  0x2f   :  { %s1336_s12 = scalar_lea.vmem %s43_s26, 128  ;;  %p1341_p6 = scmp.lt.s32.totalorder %s43_s26, %s43_s26 }
  0x30   :  { %p1337_p5 = scmp.ne.s32.totalorder %s43_s26, %s1336_s12  ;;  %p1342_p7 = scmp.lt.s32.totalorder %s1336_s12, %s1336_s12 }
  0x32   :  { %p1343_p8 = por %p1342_p7, %p1341_p6 }
  0x34   :  { %p1344_p9 = pnand %p1343_p8, %p1337_p5 }
  0x36   :  { %1347 = shalt.err (!%p1344_p9)
}
  0x37   :  { %45 = dma.hbm_to_vmem [thread:$0]  %s2407_s2, 128, %s43_s26, [#allocation3]  }
  0x38   :  { %s1348_s17 = scalar_lea.hbm %s2409_s4, 2816 }
  0x39   :  { %p1349_p10 = scmp.ne.s32.totalorder %s2409_s4, %s1348_s17  ;;  %p1352_p11 = scmp.lt.u32.totalorder %s1348_s17, %s2409_s4 }
  0x3b   :  { %p1354_p12 = pnand %p1352_p11, %p1349_p10 }
  0x3d   :  { %1357 = shalt.err (!%p1354_p12)
}
  0x3e   :  { %s1358_s21 = scalar_lea.vmem %s64_s28, 2816  ;;  %p1363_p0 = scmp.lt.s32.totalorder %s64_s28, %s64_s28 }
  0x3f   :  { %p1359_p13 = scmp.ne.s32.totalorder %s64_s28, %s1358_s21  ;;  %p1364_p1 = scmp.lt.s32.totalorder %s1358_s21, %s1358_s21 }
  0x41   :  { %p1365_p2 = por %p1364_p1, %p1363_p0 }
  0x43   :  { %p1366_p3 = pnand %p1365_p2, %p1359_p13 }
  0x45   :  { %1369 = shalt.err (!%p1366_p3)
}
  0x46   :  { %69 = dma.hbm_to_vmem [thread:$0]  %s2409_s4, 2816, %s64_s28, [#allocation10], %s1427_s7, %s1427_s7, %s1428_s8  }
  0x47   :  { %1414 = dma.done.wait [#allocation5], 32  }
  0x48   :  { %1415 = vsyncadd [#allocation5], 4294967264 }
  0x49   :  { %1416 = dma.done.wait [#allocation6], 32  }
  0x4a   :  { %1417 = vsyncadd [#allocation6], 4294967264 }
  0x4b   :  { %1418 = dma.done.wait [#allocation3], 128  }
  0x4c   :  { %1419 = vsyncadd [#allocation3], 4294967168 }
  0x4d   :  { %1420 = dma.done.wait [#allocation10], 5632  }
  0x4e   :  { %1421 = vsyncadd [#allocation10], 4294961664 }
  0x4f   :  { %85 = sfence }
  0x50   :  { %v1527_v0 = vld [vmem:[#allocation9 + $0x60] sm:$0xff]  ;;  %v1529_v1 = vld [vmem:[#allocation9 + $0x10] sm:$0xff]  ;;  %s1533_s23 = sld [smem:[#allocation2]]  ;;  %v1539_v5 = vld [vmem:[#allocation9 + $0x68] sm:$0xff]  ;;  %s1579_s26 = sld [smem:[#allocation2 + $0x1]] }
  0x51   :  { %v1531_v2 = vld [vmem:[#allocation11 + $0x60] sm:$0xff]  ;;  %v90_v3 = vmul.f32 %v1529_v1, %v1527_v0  ;;  %v1537_v4 = vld [vmem:[#allocation11 + $0x10] sm:$0xff]  ;;  %v1541_v6 = vld [vmem:[#allocation9 + $0x18] sm:$0xff]  ;;  %s1545_s4 = sld [smem:[#allocation7]]  ;;  %s1581_s27 = sld [smem:[#allocation7 + $0x1]] }
  0x52   :  { %v109_v7 = vmul.f32 %v1531_v2, %v1529_v1  ;;  %v95_v8 = vmul.f32 %v1537_v4, %v1531_v2  ;;  %v101_v9 = vmul.f32 %v1541_v6, %v1539_v5  ;;  %v1551_v10 = vld [vmem:[#allocation11 + $0x68] sm:$0xff]  ;;  %v1553_v11 = vld [vmem:[#allocation11 + $0x18] sm:$0xff]  ;;  %v110_v12 = vmul.f32 %v1537_v4, %v1527_v0  ;;  %v116_v13 = vld [vmem:[#allocation9] sm:$0xff]  ;;  %s1557_s24 = sld [smem:[#allocation2 + $0x80]]  ;;  %s1595_s28 = sld [smem:[#allocation2 + $0x81]] }
  0x53   :  { %v112_v14 = vmul.f32 %v1551_v10, %v1541_v6  ;;  %v117_v15 = vld [vmem:[#allocation11] sm:$0xff]  ;;  %v137_v16 = vld [vmem:[#allocation9 + $0x8] sm:$0xff]  ;;  %v139_v17 = vld [vmem:[#allocation11 + $0x8] sm:$0xff]  ;;  %s1561_s25 = sld [smem:[#allocation7 + $0x80]]  ;;  %v107_v19 = vmul.f32 %v1553_v11, %v1551_v10  ;;  %v114_v21 = vmul.f32 %v1553_v11, %v1539_v5  ;;  %s1597_s0 = sld [smem:[#allocation7 + $0x81]] }
  0x54   :  { %v96_v18 = vadd.f32 %v95_v8, %v90_v3  ;;  %v111_v20 = vsub.f32 %v109_v7, %v110_v12  ;;  %v1567_v22 = vld [vmem:[#allocation9 + $0x40] sm:$0xff]  ;;  %v1569_v23 = vld [vmem:[#allocation11 + $0x40] sm:$0xff]  ;;  %v1571_v24 = vld [vmem:[#allocation9 + $0x48] sm:$0xff]  ;;  %s1619_s29 = sld [smem:[#allocation2 + $0x2]]  ;;  %s1639_s10 = sld [smem:[#allocation2 + $0x3]] }
  0x55   :  { %v160_v25 = vmul.f32 %v1567_v22, %v116_v13  ;;  %v163_v26 = vmul.f32 %v1569_v23, %v117_v15  ;;  %v167_v27 = vmul.f32 %v1571_v24, %v137_v16  ;;  %v1576_v28 = vld [vmem:[#allocation11 + $0x48] sm:$0xff]  ;;  %v173_v29 = vmul.f32 %v1569_v23, %v116_v13  ;;  %v1585_v34 = vld [vmem:[#allocation9 + $0x20] sm:$0xff]  ;;  %s1621_s30 = sld [smem:[#allocation7 + $0x2]]  ;;  %s1641_s11 = sld [smem:[#allocation7 + $0x3]] }
  0x56   :  { %v102_v30 = vadd.f32 %v101_v9, %v96_v18  ;;  %v113_v31 = vadd.f32 %v112_v14, %v111_v20  ;;  %v126_v32 = vstv %s1533_s23  ;;  %v171_v33 = vmul.f32 %v1576_v28, %v139_v17  ;;  %s1629_s1 = sld [smem:[#allocation2 + $0x82]]  ;;  %s1645_s12 = sld [smem:[#allocation2 + $0x83]] }
  0x57   :  { %v128_v35 = vstv %s1545_s4  ;;  %v164_v36 = vadd.f32 %v163_v26, %v160_v25  ;;  %v174_v37 = vmul.f32 %v1567_v22, %v117_v15  ;;  %v176_v38 = vmul.f32 %v1576_v28, %v137_v16  ;;  %s1631_s9 = sld [smem:[#allocation7 + $0x82]]  ;;  %s1647_s13 = sld [smem:[#allocation7 + $0x83]] }
  0x58   :  { %v108_v39 = vadd.f32 %v107_v19, %v102_v30  ;;  %v115_v40 = vsub.f32 %v113_v31, %v114_v21  ;;  %v148_v41 = vstv %s1557_s24  ;;  %v178_v42 = vmul.f32 %v1571_v24, %v139_v17  ;;  %v1602_v19 = vld [vmem:[#allocation11 + $0x20] sm:$0xff]  ;;  %s1698_s14 = sld [smem:[#allocation2 + $0x4]]  ;;  %s1719_s18 = sld [smem:[#allocation2 + $0x5]] }
  0x59   :  { %v150_v43 = vstv %s1561_s25  ;;  %v168_v44 = vadd.f32 %v167_v27, %v164_v36  ;;  %v175_v45 = vsub.f32 %v173_v29, %v174_v37  ;;  %v218_v46 = vmul.f32 %v1585_v34, %v1527_v0  ;;  %v1606_v27 = vld [vmem:[#allocation9 + $0x28] sm:$0xff]  ;;  %s1703_s15 = sld [smem:[#allocation7 + $0x4]]  ;;  %s1737_s19 = sld [smem:[#allocation7 + $0x5]] }
  0x5a   :  { %v118_v47 = vmul.f32 %v116_v13, %v108_v39  ;;  %v119_v48 = vmul.f32 %v117_v15, %v115_v40  ;;  %v121_v49 = vmul.f32 %v117_v15, %v108_v39  ;;  %v122_v50 = vmul.f32 %v116_v13, %v115_v40  ;;  %s1707_s16 = sld [smem:[#allocation2 + $0x84]]  ;;  %s1739_s20 = sld [smem:[#allocation2 + $0x85]] }
  0x5b   :  { %v140_v51 = vmul.f32 %v137_v16, %v108_v39  ;;  %v141_v52 = vmul.f32 %v139_v17, %v115_v40  ;;  %v143_v53 = vmul.f32 %v139_v17, %v108_v39  ;;  %v144_v54 = vmul.f32 %v137_v16, %v115_v40  ;;  %s1709_s17 = sld [smem:[#allocation7 + $0x84]]  ;;  %s1754_s3 = sld [smem:[#allocation7 + $0x85]] }
  0x5c   :  { %v120_v55 = vsub.f32 %v118_v47, %v119_v48  ;;  %v123_v56 = vadd.f32 %v122_v50, %v121_v49  ;;  %v172_v57 = vadd.f32 %v171_v33, %v168_v44  ;;  %v177_v58 = vadd.f32 %v176_v38, %v175_v45  ;;  %v1612_v33 = vld [vmem:[#allocation11 + $0x28] sm:$0xff]  ;;  %s1771_s21 = sld [smem:[#allocation2 + $0x6]]  ;;  %s1791_s4 = sld [smem:[#allocation2 + $0x7]] }
  0x5d   :  { %v142_v59 = vsub.f32 %v140_v51, %v141_v52  ;;  %v145_v60 = vadd.f32 %v144_v54, %v143_v53  ;;  %v188_v61 = vstv %s1579_s26  ;;  %v190_v62 = vstv %s1581_s27  ;;  %s1773_s2 = sld [smem:[#allocation7 + $0x6]]  ;;  %s1793_s24 = sld [smem:[#allocation7 + $0x7]] }
  0x5e   :  { %v127_v63 = vmul.f32 %v126_v32, %v120_v55  ;;  %v129_v3 = vmul.f32 %v128_v35, %v123_v56  ;;  %v132_v7 = vmul.f32 %v126_v32, %v123_v56  ;;  %v133_v8 = vmul.f32 %v128_v35, %v120_v55  ;;  %s1781_s22 = sld [smem:[#allocation2 + $0x86]]  ;;  %s1801_s25 = sld [smem:[#allocation2 + $0x87]] }
  0x5f   :  { %v149_v9 = vmul.f32 %v148_v41, %v142_v59  ;;  %v151_v12 = vmul.f32 %v150_v43, %v145_v60  ;;  %v154_v13 = vmul.f32 %v148_v41, %v145_v60  ;;  %v155_v14 = vmul.f32 %v150_v43, %v142_v59  ;;  %s1783_s23 = sld [smem:[#allocation7 + $0x86]]  ;;  %s1803_s26 = sld [smem:[#allocation7 + $0x87]] }
  0x60   :  { %v130_v15 = vsub.f32 %v127_v63, %v129_v3  ;;  %v134_v16 = vadd.f32 %v133_v8, %v132_v7  ;;  %v179_v17 = vsub.f32 %v177_v58, %v178_v42  ;;  %v180_v18 = vmul.f32 %v172_v57, %v1529_v1  ;;  %s1862_s27 = sld [smem:[#allocation2 + $0x8]] }
  0x61   :  { %v152_v20 = vsub.f32 %v149_v9, %v151_v12  ;;  %v156_v21 = vadd.f32 %v155_v14, %v154_v13  ;;  %v183_v25 = vmul.f32 %v172_v57, %v1537_v4  ;;  %v198_v26 = vmul.f32 %v172_v57, %v1541_v6 }
  0x62   :  { %v181_v29 = vmul.f32 %v179_v17, %v1537_v4  ;;  %v184_v30 = vmul.f32 %v179_v17, %v1529_v1  ;;  %v199_v31 = vmul.f32 %v179_v17, %v1553_v11  ;;  %v201_v32 = vmul.f32 %v172_v57, %v1553_v11 }
  0x63   :  { %v202_v35 = vmul.f32 %v179_v17, %v1541_v6  ;;  %v206_v36 = vstv %s1595_s28  ;;  %v208_v37 = vstv %s1597_s0  ;;  %v221_v38 = vmul.f32 %v1602_v19, %v1531_v2  ;;  %s1869_s28 = sld [smem:[#allocation7 + $0x8]] }
  0x64   :  { %v182_v39 = vsub.f32 %v180_v18, %v181_v29  ;;  %v185_v40 = vadd.f32 %v184_v30, %v183_v25  ;;  %v200_v41 = vsub.f32 %v198_v26, %v199_v31  ;;  %v225_v42 = vmul.f32 %v1606_v27, %v1539_v5  ;;  %s1873_s0 = sld [smem:[#allocation2 + $0x88]] }
  0x65   :  { %v203_v43 = vadd.f32 %v202_v35, %v201_v32  ;;  %v222_v44 = vadd.f32 %v221_v38, %v218_v46  ;;  %v229_v45 = vmul.f32 %v1612_v33, %v1551_v10  ;;  %v231_v47 = vmul.f32 %v1585_v34, %v1531_v2 }
  0x66   :  { %v189_v48 = vmul.f32 %v188_v61, %v182_v39  ;;  %v191_v49 = vmul.f32 %v190_v62, %v185_v40  ;;  %v194_v50 = vmul.f32 %v188_v61, %v185_v40  ;;  %v195_v51 = vmul.f32 %v190_v62, %v182_v39 }
  0x67   :  { %v207_v52 = vmul.f32 %v206_v36, %v200_v41  ;;  %v209_v53 = vmul.f32 %v208_v37, %v203_v43  ;;  %v212_v54 = vmul.f32 %v206_v36, %v203_v43  ;;  %v213_v55 = vmul.f32 %v208_v37, %v200_v41 }
  0x68   :  { %v192_v56 = vsub.f32 %v189_v48, %v191_v49  ;;  %v196_v46 = vadd.f32 %v195_v51, %v194_v50  ;;  %v226_v57 = vadd.f32 %v225_v42, %v222_v44  ;;  %v232_v58 = vmul.f32 %v1602_v19, %v1527_v0 }
  0x69   :  { %v210_v59 = vsub.f32 %v207_v52, %v209_v53  ;;  %v214_v60 = vadd.f32 %v213_v55, %v212_v54  ;;  %v234_v63 = vmul.f32 %v1606_v27, %v1551_v10  ;;  %v236_v61 = vmul.f32 %v1612_v33, %v1539_v5 }
  0x6a   :  { %v193_v62 = vadd.f32 %v192_v56, %v130_v15  ;;  %v197_v3 = vadd.f32 %v196_v46, %v134_v16  ;;  %v230_v7 = vadd.f32 %v229_v45, %v226_v57  ;;  %v233_v8 = vsub.f32 %v231_v47, %v232_v58 }
  0x6b   :  { %v211_v9 = vadd.f32 %v210_v59, %v152_v20  ;;  %v215_v12 = vadd.f32 %v214_v60, %v156_v21  ;;  %v246_v13 = vstv %s1619_s29  ;;  %v248_v14 = vstv %s1621_s30  ;;  %v1679_v59 = vld [vmem:[#allocation9 + $0x30] sm:$0xff]  ;;  %v1681_v60 = vld [vmem:[#allocation11 + $0x30] sm:$0xff]  ;;  %s1875_s29 = sld [smem:[#allocation7 + $0x88]]  ;;  %s1885_s30 = sld [smem:[#allocation2 + $0x9]] }
  0x6c   :  { %v235_v17 = vadd.f32 %v234_v63, %v233_v8  ;;  %v238_v18 = vmul.f32 %v230_v7, %v1529_v1  ;;  %v241_v25 = vmul.f32 %v230_v7, %v1537_v4  ;;  %v256_v26 = vmul.f32 %v230_v7, %v1541_v6 }
  0x6d   :  { %v259_v15 = vmul.f32 %v230_v7, %v1553_v11  ;;  %v264_v16 = vstv %s1629_s1  ;;  %v266_v29 = vstv %s1631_s9  ;;  %v274_v20 = vmul.f32 %v1567_v22, %v1529_v1  ;;  %s1903_s1 = sld [smem:[#allocation7 + $0x9]] }
  0x6e   :  { %v237_v21 = vsub.f32 %v235_v17, %v236_v61  ;;  %v275_v30 = vmul.f32 %v1569_v23, %v1537_v4  ;;  %v277_v31 = vmul.f32 %v1571_v24, %v1541_v6  ;;  %v279_v32 = vmul.f32 %v1576_v28, %v1553_v11  ;;  %s1905_s9 = sld [smem:[#allocation2 + $0x89]] }
  0x6f   :  { %v281_v35 = vmul.f32 %v1569_v23, %v1529_v1  ;;  %v282_v36 = vmul.f32 %v1567_v22, %v1537_v4  ;;  %v284_v37 = vmul.f32 %v1576_v28, %v1541_v6  ;;  %v286_v38 = vmul.f32 %v1571_v24, %v1553_v11 }
  0x70   :  { %v239_v39 = vmul.f32 %v237_v21, %v1537_v4  ;;  %v242_v40 = vmul.f32 %v237_v21, %v1529_v1  ;;  %v257_v41 = vmul.f32 %v237_v21, %v1553_v11  ;;  %v260_v42 = vmul.f32 %v237_v21, %v1541_v6 }
  0x71   :  { %v276_v43 = vadd.f32 %v275_v30, %v274_v20  ;;  %v283_v44 = vsub.f32 %v281_v35, %v282_v36  ;;  %v296_v45 = vstv %s1639_s10  ;;  %v298_v47 = vstv %s1641_s11  ;;  %s1920_s10 = sld [smem:[#allocation7 + $0x89]]  ;;  %s1937_s11 = sld [smem:[#allocation2 + $0xa]] }
  0x72   :  { %v240_v48 = vsub.f32 %v238_v18, %v239_v39  ;;  %v243_v49 = vadd.f32 %v242_v40, %v241_v25  ;;  %v258_v50 = vsub.f32 %v256_v26, %v257_v41  ;;  %v261_v51 = vadd.f32 %v260_v42, %v259_v15 }
  0x73   :  { %v278_v52 = vadd.f32 %v277_v31, %v276_v43  ;;  %v285_v53 = vadd.f32 %v284_v37, %v283_v44  ;;  %v314_v54 = vstv %s1645_s12  ;;  %v316_v55 = vstv %s1647_s13  ;;  %s1939_s12 = sld [smem:[#allocation7 + $0xa]] }
  0x74   :  { %v247_v56 = vmul.f32 %v246_v13, %v240_v48  ;;  %v249_v46 = vmul.f32 %v248_v14, %v243_v49  ;;  %v252_v57 = vmul.f32 %v246_v13, %v243_v49  ;;  %v253_v58 = vmul.f32 %v248_v14, %v240_v48  ;;  %s1949_s13 = sld [smem:[#allocation2 + $0x8a]] }
  0x75   :  { %v265_v63 = vmul.f32 %v264_v16, %v258_v50  ;;  %v267_v61 = vmul.f32 %v266_v29, %v261_v51  ;;  %v270_v7 = vmul.f32 %v264_v16, %v261_v51  ;;  %v271_v8 = vmul.f32 %v266_v29, %v258_v50  ;;  %v1689_v16 = vld [vmem:[#allocation9 + $0x38] sm:$0xff] }
  0x76   :  { %v250_v17 = vsub.f32 %v247_v56, %v249_v46  ;;  %v254_v18 = vadd.f32 %v253_v58, %v252_v57  ;;  %v280_v25 = vadd.f32 %v279_v32, %v278_v52  ;;  %v287_v26 = vsub.f32 %v285_v53, %v286_v38  ;;  %v1693_v38 = vld [vmem:[#allocation11 + $0x38] sm:$0xff] }
  0x77   :  { %v268_v15 = vsub.f32 %v265_v63, %v267_v61  ;;  %v272_v20 = vadd.f32 %v271_v8, %v270_v7  ;;  %v326_v21 = vmul.f32 %v1679_v59, %v1527_v0  ;;  %v329_v13 = vmul.f32 %v1681_v60, %v1531_v2 }
  0x78   :  { %v251_v14 = vadd.f32 %v250_v17, %v193_v62  ;;  %v255_v30 = vadd.f32 %v254_v18, %v197_v3  ;;  %v288_v31 = vmul.f32 %v280_v25, %v1585_v34  ;;  %v289_v35 = vmul.f32 %v287_v26, %v1602_v19 }
  0x79   :  { %v269_v29 = vadd.f32 %v268_v15, %v211_v9  ;;  %v273_v36 = vadd.f32 %v272_v20, %v215_v12  ;;  %v291_v32 = vmul.f32 %v280_v25, %v1602_v19  ;;  %v292_v37 = vmul.f32 %v287_v26, %v1585_v34 }
  0x7a   :  { %v290_v39 = vsub.f32 %v288_v31, %v289_v35  ;;  %v306_v40 = vmul.f32 %v280_v25, %v1606_v27  ;;  %v307_v62 = vmul.f32 %v287_v26, %v1612_v33  ;;  %v309_v3 = vmul.f32 %v280_v25, %v1612_v33 }
  0x7b   :  { %v293_v41 = vadd.f32 %v292_v37, %v291_v32  ;;  %v310_v42 = vmul.f32 %v287_v26, %v1606_v27  ;;  %v330_v9 = vadd.f32 %v329_v13, %v326_v21  ;;  %v333_v12 = vmul.f32 %v1689_v16, %v1539_v5 }
  0x7c   :  { %v297_v43 = vmul.f32 %v296_v45, %v290_v39  ;;  %v303_v44 = vmul.f32 %v298_v47, %v290_v39  ;;  %v308_v48 = vsub.f32 %v306_v40, %v307_v62  ;;  %v337_v49 = vmul.f32 %v1693_v38, %v1551_v10 }
  0x7d   :  { %v299_v50 = vmul.f32 %v298_v47, %v293_v41  ;;  %v302_v51 = vmul.f32 %v296_v45, %v293_v41  ;;  %v311_v52 = vadd.f32 %v310_v42, %v309_v3  ;;  %v334_v53 = vadd.f32 %v333_v12, %v330_v9 }
  0x7e   :  { %v315_v56 = vmul.f32 %v314_v54, %v308_v48  ;;  %v321_v46 = vmul.f32 %v316_v55, %v308_v48  ;;  %v339_v57 = vmul.f32 %v1679_v59, %v1531_v2  ;;  %v340_v58 = vmul.f32 %v1681_v60, %v1527_v0 }
  0x7f   :  { %v300_v63 = vsub.f32 %v297_v43, %v299_v50  ;;  %v304_v61 = vadd.f32 %v303_v44, %v302_v51  ;;  %v317_v7 = vmul.f32 %v316_v55, %v311_v52  ;;  %v320_v8 = vmul.f32 %v314_v54, %v311_v52 }
  0x80   :  { %v338_v17 = vadd.f32 %v337_v49, %v334_v53  ;;  %v341_v18 = vsub.f32 %v339_v57, %v340_v58  ;;  %v342_v45 = vmul.f32 %v1689_v16, %v1551_v10  ;;  %v344_v47 = vmul.f32 %v1693_v38, %v1539_v5 }
  0x81   :  { %v301_v25 = vadd.f32 %v300_v63, %v251_v14  ;;  %v305_v26 = vadd.f32 %v304_v61, %v255_v30  ;;  %v318_v15 = vsub.f32 %v315_v56, %v317_v7  ;;  %v322_v20 = vadd.f32 %v321_v46, %v320_v8 }
  0x82   :  { %v343_v21 = vadd.f32 %v342_v45, %v341_v18  ;;  %v346_v54 = vmul.f32 %v338_v17, %v1585_v34  ;;  %v349_v55 = vmul.f32 %v338_v17, %v1602_v19  ;;  %v354_v13 = vstv %s1698_s14  ;;  %s1951_s14 = sld [smem:[#allocation7 + $0x8a]] }
  0x83   :  { %v319_v31 = vadd.f32 %v318_v15, %v269_v29  ;;  %v323_v35 = vadd.f32 %v322_v20, %v273_v36  ;;  %v356_v32 = vstv %s1703_s15  ;;  %v364_v37 = vmul.f32 %v338_v17, %v1606_v27  ;;  %s1965_s15 = sld [smem:[#allocation2 + $0xb]] }
  0x84   :  { %v345_v39 = vsub.f32 %v343_v21, %v344_v47  ;;  %v367_v14 = vmul.f32 %v338_v17, %v1612_v33  ;;  %v372_v40 = vstv %s1707_s16  ;;  %v374_v30 = vstv %s1709_s17  ;;  %s1967_s16 = sld [smem:[#allocation7 + $0xb]] }
  0x85   :  { %v382_v62 = vmul.f32 %v1679_v59, %v1529_v1  ;;  %v383_v3 = vmul.f32 %v1681_v60, %v1537_v4  ;;  %v385_v41 = vmul.f32 %v1689_v16, %v1541_v6  ;;  %v387_v29 = vmul.f32 %v1693_v38, %v1553_v11  ;;  %s1979_s17 = sld [smem:[#allocation2 + $0x8b]] }
  0x86   :  { %v347_v36 = vmul.f32 %v345_v39, %v1602_v19  ;;  %v350_v42 = vmul.f32 %v345_v39, %v1585_v34  ;;  %v365_v9 = vmul.f32 %v345_v39, %v1612_v33  ;;  %v368_v12 = vmul.f32 %v345_v39, %v1606_v27 }
  0x87   :  { %v384_v43 = vadd.f32 %v383_v3, %v382_v62  ;;  %v389_v44 = vmul.f32 %v1681_v60, %v1529_v1  ;;  %v390_v48 = vmul.f32 %v1679_v59, %v1537_v4  ;;  %v392_v49 = vmul.f32 %v1693_v38, %v1541_v6 }
  0x88   :  { %v348_v50 = vsub.f32 %v346_v54, %v347_v36  ;;  %v351_v51 = vadd.f32 %v350_v42, %v349_v55  ;;  %v366_v52 = vsub.f32 %v364_v37, %v365_v9  ;;  %v369_v53 = vadd.f32 %v368_v12, %v367_v14 }
  0x89   :  { %v386_v56 = vadd.f32 %v385_v41, %v384_v43  ;;  %v391_v46 = vsub.f32 %v389_v44, %v390_v48  ;;  %v394_v57 = vmul.f32 %v1689_v16, %v1553_v11  ;;  %v404_v58 = vstv %s1719_s18  ;;  %s1981_s18 = sld [smem:[#allocation7 + $0x8b]] }
  0x8a   :  { %v355_v1 = vmul.f32 %v354_v13, %v348_v50  ;;  %v357_v63 = vmul.f32 %v356_v32, %v351_v51  ;;  %v360_v4 = vmul.f32 %v354_v13, %v351_v51  ;;  %v361_v61 = vmul.f32 %v356_v32, %v348_v50 }
  0x8b   :  { %v373_v7 = vmul.f32 %v372_v40, %v366_v52  ;;  %v375_v6 = vmul.f32 %v374_v30, %v369_v53  ;;  %v378_v8 = vmul.f32 %v372_v40, %v369_v53  ;;  %v379_v17 = vmul.f32 %v374_v30, %v366_v52 }
  0x8c   :  { %v358_v18 = vsub.f32 %v355_v1, %v357_v63  ;;  %v362_v45 = vadd.f32 %v361_v61, %v360_v4  ;;  %v388_v47 = vadd.f32 %v387_v29, %v386_v56  ;;  %v393_v15 = vadd.f32 %v392_v49, %v391_v46 }
  0x8d   :  { %v376_v20 = vsub.f32 %v373_v7, %v375_v6  ;;  %v380_v21 = vadd.f32 %v379_v17, %v378_v8  ;;  %v406_v11 = vstv %s1737_s19  ;;  %v422_v54 = vstv %s1739_s20  ;;  %s2060_s19 = sld [smem:[#allocation2 + $0xc]] }
  0x8e   :  { %v359_v55 = vadd.f32 %v358_v18, %v301_v25  ;;  %v363_v37 = vadd.f32 %v362_v45, %v305_v26  ;;  %v395_v39 = vsub.f32 %v393_v15, %v394_v57  ;;  %v396_v14 = vmul.f32 %v388_v47, %v1679_v59  ;;  %s2067_s20 = sld [smem:[#allocation7 + $0xc]] }
  0x8f   :  { %v377_v13 = vadd.f32 %v376_v20, %v319_v31  ;;  %v381_v32 = vadd.f32 %v380_v21, %v323_v35  ;;  %v399_v62 = vmul.f32 %v388_v47, %v1681_v60  ;;  %v414_v40 = vmul.f32 %v388_v47, %v1689_v16 }
  0x90   :  { %v397_v30 = vmul.f32 %v395_v39, %v1681_v60  ;;  %v400_v3 = vmul.f32 %v395_v39, %v1679_v59  ;;  %v415_v41 = vmul.f32 %v395_v39, %v1693_v38  ;;  %v417_v29 = vmul.f32 %v388_v47, %v1693_v38 }
  0x91   :  { %v418_v25 = vmul.f32 %v395_v39, %v1689_v16  ;;  %v424_v26 = vstv %s1754_s3  ;;  %v432_v36 = vmul.f32 %v1585_v34, %v1567_v22  ;;  %v433_v31 = vmul.f32 %v1602_v19, %v1569_v23  ;;  %s2071_s3 = sld [smem:[#allocation2 + $0x8c]] }
  0x92   :  { %v398_v35 = vsub.f32 %v396_v14, %v397_v30  ;;  %v401_v42 = vadd.f32 %v400_v3, %v399_v62  ;;  %v416_v9 = vsub.f32 %v414_v40, %v415_v41  ;;  %v435_v12 = vmul.f32 %v1606_v27, %v1571_v24 }
  0x93   :  { %v419_v43 = vadd.f32 %v418_v25, %v417_v29  ;;  %v434_v44 = vadd.f32 %v433_v31, %v432_v36  ;;  %v437_v48 = vmul.f32 %v1612_v33, %v1576_v28  ;;  %v439_v49 = vmul.f32 %v1585_v34, %v1569_v23 }
  0x94   :  { %v405_v50 = vmul.f32 %v404_v58, %v398_v35  ;;  %v407_v51 = vmul.f32 %v406_v11, %v401_v42  ;;  %v410_v52 = vmul.f32 %v404_v58, %v401_v42  ;;  %v411_v53 = vmul.f32 %v406_v11, %v398_v35 }
  0x95   :  { %v423_v56 = vmul.f32 %v422_v54, %v416_v9  ;;  %v425_v46 = vmul.f32 %v424_v26, %v419_v43  ;;  %v428_v57 = vmul.f32 %v422_v54, %v419_v43  ;;  %v429_v1 = vmul.f32 %v424_v26, %v416_v9 }
  0x96   :  { %v408_v63 = vsub.f32 %v405_v50, %v407_v51  ;;  %v412_v4 = vadd.f32 %v411_v53, %v410_v52  ;;  %v436_v61 = vadd.f32 %v435_v12, %v434_v44  ;;  %v440_v34 = vmul.f32 %v1602_v19, %v1567_v22 }
  0x97   :  { %v426_v7 = vsub.f32 %v423_v56, %v425_v46  ;;  %v430_v6 = vadd.f32 %v429_v1, %v428_v57  ;;  %v442_v8 = vmul.f32 %v1606_v27, %v1576_v28  ;;  %v444_v58 = vmul.f32 %v1612_v33, %v1571_v24  ;;  %v1835_v56 = vld [vmem:[#allocation9 + $0x70] sm:$0xff] }
  0x98   :  { %v409_v17 = vadd.f32 %v408_v63, %v359_v55  ;;  %v413_v18 = vadd.f32 %v412_v4, %v363_v37  ;;  %v438_v45 = vadd.f32 %v437_v48, %v436_v61  ;;  %v441_v47 = vsub.f32 %v439_v49, %v440_v34  ;;  %v1837_v4 = vld [vmem:[#allocation9 + $0x50] sm:$0xff]  ;;  %v1839_v61 = vld [vmem:[#allocation11 + $0x70] sm:$0xff] }
  0x99   :  { %v1795_v15 = vadd.f32 %v426_v7, %v377_v13  ;;  %v1797_v19 = vadd.f32 %v430_v6, %v381_v32  ;;  %v454_v20 = vstv %s1771_s21  ;;  %v456_v21 = vstv %s1773_s2  ;;  %v1841_v34 = vld [vmem:[#allocation11 + $0x50] sm:$0xff]  ;;  %s2073_s21 = sld [smem:[#allocation7 + $0x8c]]  ;;  %s2095_s2 = sld [smem:[#allocation2 + $0xd]] }
  0x9a   :  { %v443_v27 = vadd.f32 %v442_v8, %v441_v47  ;;  %v446_v33 = vmul.f32 %v438_v45, %v1679_v59  ;;  %v449_v11 = vmul.f32 %v438_v45, %v1681_v60  ;;  %v464_v54 = vmul.f32 %v438_v45, %v1689_v16 }
  0x9b   :  { %v467_v55 = vmul.f32 %v438_v45, %v1693_v38  ;;  %v472_v37 = vstv %s1781_s22  ;;  %v474_v39 = vstv %s1783_s23  ;;  %v482_v14 = vmul.f32 %v1567_v22, %v1527_v0  ;;  %s2127_s22 = sld [smem:[#allocation7 + $0xd]] }
  0x9c   :  { %v445_v13 = vsub.f32 %v443_v27, %v444_v58  ;;  %v483_v32 = vmul.f32 %v1569_v23, %v1531_v2  ;;  %v485_v62 = vmul.f32 %v1571_v24, %v1539_v5  ;;  %v487_v40 = vmul.f32 %v1576_v28, %v1551_v10  ;;  %s2129_s23 = sld [smem:[#allocation2 + $0x8d]] }
  0x9d   :  { %v489_v30 = vmul.f32 %v1567_v22, %v1531_v2  ;;  %v490_v3 = vmul.f32 %v1569_v23, %v1527_v0  ;;  %v492_v41 = vmul.f32 %v1571_v24, %v1551_v10  ;;  %v494_v29 = vmul.f32 %v1576_v28, %v1539_v5 }
  0x9e   :  { %v447_v25 = vmul.f32 %v445_v13, %v1681_v60  ;;  %v450_v26 = vmul.f32 %v445_v13, %v1679_v59  ;;  %v465_v36 = vmul.f32 %v445_v13, %v1693_v38  ;;  %v468_v31 = vmul.f32 %v445_v13, %v1689_v16 }
  0x9f   :  { %v484_v35 = vadd.f32 %v483_v32, %v482_v14  ;;  %v491_v42 = vsub.f32 %v489_v30, %v490_v3  ;;  %v504_v9 = vstv %s1791_s4  ;;  %v506_v12 = vstv %s1793_s24  ;;  %s2154_s4 = sld [smem:[#allocation7 + $0x8d]]  ;;  %s2178_s24 = sld [smem:[#allocation2 + $0xe]] }
  0xa0   :  { %v448_v43 = vsub.f32 %v446_v33, %v447_v25  ;;  %v451_v44 = vadd.f32 %v450_v26, %v449_v11  ;;  %v466_v48 = vsub.f32 %v464_v54, %v465_v36  ;;  %v469_v49 = vadd.f32 %v468_v31, %v467_v55  ;;  %v1867_v31 = vld [vmem:[#allocation11 + $0x78] sm:$0xff] }
  0xa1   :  { %v486_v50 = vadd.f32 %v485_v62, %v484_v35  ;;  %v493_v51 = vadd.f32 %v492_v41, %v491_v42  ;;  %v522_v52 = vstv %s1801_s25  ;;  %v524_v53 = vstv %s1803_s26  ;;  %v1857_v41 = vld [vmem:[#allocation11 + $0x58] sm:$0xff]  ;;  %s2180_s25 = sld [smem:[#allocation7 + $0xe]] }
  0xa2   :  { %v455_v46 = vmul.f32 %v454_v20, %v448_v43  ;;  %v457_v57 = vmul.f32 %v456_v21, %v451_v44  ;;  %v460_v1 = vmul.f32 %v454_v20, %v451_v44  ;;  %v461_v63 = vmul.f32 %v456_v21, %v448_v43  ;;  %s2186_s26 = sld [smem:[#allocation2 + $0x8e]] }
  0xa3   :  { %v473_v7 = vmul.f32 %v472_v37, %v466_v48  ;;  %v475_v6 = vmul.f32 %v474_v39, %v469_v49  ;;  %v478_v8 = vmul.f32 %v472_v37, %v469_v49  ;;  %v479_v58 = vmul.f32 %v474_v39, %v466_v48  ;;  %v1849_v37 = vld [vmem:[#allocation9 + $0x78] sm:$0xff] }
  0xa4   :  { %v458_v45 = vsub.f32 %v455_v46, %v457_v57  ;;  %v462_v47 = vadd.f32 %v461_v63, %v460_v1  ;;  %v488_v27 = vadd.f32 %v487_v40, %v486_v50  ;;  %v495_v33 = vsub.f32 %v493_v51, %v494_v29  ;;  %v1851_v39 = vld [vmem:[#allocation9 + $0x58] sm:$0xff] }
  0xa5   :  { %v476_v11 = vsub.f32 %v473_v7, %v475_v6  ;;  %v480_v54 = vadd.f32 %v479_v58, %v478_v8  ;;  %v536_v20 = vmul.f32 %v1837_v4, %v1835_v56  ;;  %v541_v21 = vmul.f32 %v1841_v34, %v1839_v61 }
  0xa6   :  { %v459_v55 = vadd.f32 %v458_v45, %v409_v17  ;;  %v463_v14 = vadd.f32 %v462_v47, %v413_v18  ;;  %v496_v13 = vmul.f32 %v488_v27, %v1679_v59  ;;  %v497_v32 = vmul.f32 %v495_v33, %v1681_v60 }
  0xa7   :  { %v477_v62 = vadd.f32 %v476_v11, %v1795_v15  ;;  %v481_v40 = vadd.f32 %v480_v54, %v1797_v19  ;;  %v499_v30 = vmul.f32 %v488_v27, %v1681_v60  ;;  %v500_v3 = vmul.f32 %v495_v33, %v1679_v59 }
  0xa8   :  { %v498_v17 = vsub.f32 %v496_v13, %v497_v32  ;;  %v514_v18 = vmul.f32 %v488_v27, %v1689_v16  ;;  %v515_v29 = vmul.f32 %v495_v33, %v1693_v38  ;;  %v517_v25 = vmul.f32 %v488_v27, %v1693_v38 }
  0xa9   :  { %v501_v26 = vadd.f32 %v500_v3, %v499_v30  ;;  %v518_v15 = vmul.f32 %v495_v33, %v1689_v16  ;;  %v542_v36 = vadd.f32 %v541_v21, %v536_v20  ;;  %v547_v19 = vmul.f32 %v1851_v39, %v1849_v37 }
  0xaa   :  { %v505_v35 = vmul.f32 %v504_v9, %v498_v17  ;;  %v511_v42 = vmul.f32 %v506_v12, %v498_v17  ;;  %v516_v43 = vsub.f32 %v514_v18, %v515_v29  ;;  %v553_v44 = vmul.f32 %v1857_v41, %v1867_v31 }
  0xab   :  { %v507_v48 = vmul.f32 %v506_v12, %v501_v26  ;;  %v510_v49 = vmul.f32 %v504_v9, %v501_v26  ;;  %v519_v50 = vadd.f32 %v518_v15, %v517_v25  ;;  %v548_v51 = vadd.f32 %v547_v19, %v542_v36 }
  0xac   :  { %v523_v46 = vmul.f32 %v522_v52, %v516_v43  ;;  %v529_v57 = vmul.f32 %v524_v53, %v516_v43  ;;  %v555_v1 = vmul.f32 %v1839_v61, %v1837_v4  ;;  %v556_v63 = vmul.f32 %v1841_v34, %v1835_v56 }
  0xad   :  { %v508_v7 = vsub.f32 %v505_v35, %v507_v48  ;;  %v512_v6 = vadd.f32 %v511_v42, %v510_v49  ;;  %v525_v8 = vmul.f32 %v524_v53, %v519_v50  ;;  %v528_v58 = vmul.f32 %v522_v52, %v519_v50 }
  0xae   :  { %v554_v45 = vadd.f32 %v553_v44, %v548_v51  ;;  %v557_v47 = vsub.f32 %v555_v1, %v556_v63  ;;  %v558_v9 = vmul.f32 %v1867_v31, %v1851_v39  ;;  %v560_v12 = vmul.f32 %v1857_v41, %v1849_v37 }
  0xaf   :  { %v509_v27 = vadd.f32 %v508_v7, %v459_v55  ;;  %v513_v33 = vadd.f32 %v512_v6, %v463_v14  ;;  %v526_v11 = vsub.f32 %v523_v46, %v525_v8  ;;  %v530_v54 = vadd.f32 %v529_v57, %v528_v58 }
  0xb0   :  { %v559_v20 = vadd.f32 %v558_v9, %v557_v47  ;;  %v562_v52 = vmul.f32 %v554_v45, %v1679_v59  ;;  %v565_v53 = vmul.f32 %v554_v45, %v1681_v60  ;;  %v570_v21 = vstv %s1862_s27  ;;  %s2188_s27 = sld [smem:[#allocation7 + $0x8e]] }
  0xb1   :  { %v527_v13 = vadd.f32 %v526_v11, %v477_v62  ;;  %v531_v32 = vadd.f32 %v530_v54, %v481_v40  ;;  %v572_v30 = vstv %s1869_s28  ;;  %v580_v3 = vmul.f32 %v554_v45, %v1689_v16  ;;  %s2190_s28 = sld [smem:[#allocation2 + $0xf]] }
  0xb2   :  { %v561_v17 = vsub.f32 %v559_v20, %v560_v12  ;;  %v583_v55 = vmul.f32 %v554_v45, %v1693_v38  ;;  %v588_v18 = vstv %s1873_s0  ;;  %v590_v14 = vstv %s1875_s29  ;;  %s2192_s0 = sld [smem:[#allocation7 + $0xf]] }
  0xb3   :  { %v598_v29 = vmul.f32 %v1679_v59, %v1567_v22  ;;  %v599_v25 = vmul.f32 %v1681_v60, %v1569_v23  ;;  %v601_v26 = vmul.f32 %v1689_v16, %v1571_v24  ;;  %v603_v62 = vmul.f32 %v1693_v38, %v1576_v28  ;;  %s2200_s29 = sld [smem:[#allocation2 + $0x8f]] }
  0xb4   :  { %v563_v40 = vmul.f32 %v561_v17, %v1681_v60  ;;  %v566_v15 = vmul.f32 %v561_v17, %v1679_v59  ;;  %v581_v36 = vmul.f32 %v561_v17, %v1693_v38  ;;  %v584_v19 = vmul.f32 %v561_v17, %v1689_v16 }
  0xb5   :  { %v600_v35 = vadd.f32 %v599_v25, %v598_v29  ;;  %v605_v42 = vmul.f32 %v1679_v59, %v1569_v23  ;;  %v606_v43 = vmul.f32 %v1681_v60, %v1567_v22  ;;  %v608_v44 = vmul.f32 %v1689_v16, %v1576_v28 }
  0xb6   :  { %v564_v48 = vsub.f32 %v562_v52, %v563_v40  ;;  %v567_v49 = vadd.f32 %v566_v15, %v565_v53  ;;  %v582_v50 = vsub.f32 %v580_v3, %v581_v36  ;;  %v585_v51 = vadd.f32 %v584_v19, %v583_v55  ;;  %v1945_v19 = vld [vmem:[#allocation11 + $0x60] sm:$0xff] }
  0xb7   :  { %v602_v46 = vadd.f32 %v601_v26, %v600_v35  ;;  %v607_v57 = vsub.f32 %v605_v42, %v606_v43  ;;  %v610_v1 = vmul.f32 %v1693_v38, %v1571_v24  ;;  %v620_v63 = vstv %s1885_s30  ;;  %s2235_s30 = sld [smem:[#allocation7 + $0x8f]] }
  0xb8   :  { %v571_v59 = vmul.f32 %v570_v21, %v564_v48  ;;  %v573_v7 = vmul.f32 %v572_v30, %v567_v49  ;;  %v576_v60 = vmul.f32 %v570_v21, %v567_v49  ;;  %v577_v6 = vmul.f32 %v572_v30, %v564_v48 }
  0xb9   :  { %v589_v8 = vmul.f32 %v588_v18, %v582_v50  ;;  %v591_v16 = vmul.f32 %v590_v14, %v585_v51  ;;  %v594_v58 = vmul.f32 %v588_v18, %v585_v51  ;;  %v595_v45 = vmul.f32 %v590_v14, %v582_v50 }
  0xba   :  { %v574_v47 = vsub.f32 %v571_v59, %v573_v7  ;;  %v578_v9 = vadd.f32 %v577_v6, %v576_v60  ;;  %v604_v12 = vadd.f32 %v603_v62, %v602_v46  ;;  %v609_v11 = vadd.f32 %v608_v44, %v607_v57  ;;  %v1953_v46 = vld [vmem:[#allocation9 + $0x60] sm:$0xff]  ;;  %v1957_v59 = vld [vmem:[#allocation11 + $0x68] sm:$0xff]  ;;  %v1961_v7 = vld [vmem:[#allocation9 + $0x68] sm:$0xff] }
  0xbb   :  { %v592_v54 = vsub.f32 %v589_v8, %v591_v16  ;;  %v596_v20 = vadd.f32 %v595_v45, %v594_v58  ;;  %v622_v38 = vstv %s1903_s1  ;;  %v638_v52 = vstv %s1905_s9  ;;  %s2259_s1 = sld [smem:[#allocation2 + $0x10]] }
  0xbc   :  { %v575_v53 = vadd.f32 %v574_v47, %v509_v27  ;;  %v579_v3 = vadd.f32 %v578_v9, %v513_v33  ;;  %v611_v17 = vsub.f32 %v609_v11, %v610_v1  ;;  %v612_v55 = vmul.f32 %v604_v12, %v1567_v22  ;;  %v1983_v9 = vld [vmem:[#allocation9 + $0x40] sm:$0xff]  ;;  %v1986_v11 = vld [vmem:[#allocation11 + $0x40] sm:$0xff]  ;;  %s2261_s9 = sld [smem:[#allocation7 + $0x10]] }
  0xbd   :  { %v593_v21 = vadd.f32 %v592_v54, %v527_v13  ;;  %v597_v30 = vadd.f32 %v596_v20, %v531_v32  ;;  %v615_v29 = vmul.f32 %v604_v12, %v1569_v23  ;;  %v630_v18 = vmul.f32 %v604_v12, %v1571_v24  ;;  %v1989_v20 = vld [vmem:[#allocation9 + $0x48] sm:$0xff] }
  0xbe   :  { %v613_v14 = vmul.f32 %v611_v17, %v1569_v23  ;;  %v616_v25 = vmul.f32 %v611_v17, %v1567_v22  ;;  %v631_v26 = vmul.f32 %v611_v17, %v1576_v28  ;;  %v633_v62 = vmul.f32 %v604_v12, %v1576_v28 }
  0xbf   :  { %v634_v27 = vmul.f32 %v611_v17, %v1571_v24  ;;  %v640_v33 = vstv %s1920_s10  ;;  %v648_v40 = vmul.f32 %v1837_v4, %v1527_v0  ;;  %v649_v13 = vmul.f32 %v1841_v34, %v1531_v2  ;;  %s2263_s10 = sld [smem:[#allocation2 + $0x90]] }
  0xc0   :  { %v614_v23 = vsub.f32 %v612_v55, %v613_v14  ;;  %v617_v32 = vadd.f32 %v616_v25, %v615_v29  ;;  %v632_v22 = vsub.f32 %v630_v18, %v631_v26  ;;  %v651_v15 = vmul.f32 %v1851_v39, %v1539_v5 }
  0xc1   :  { %v635_v28 = vadd.f32 %v634_v27, %v633_v62  ;;  %v650_v36 = vadd.f32 %v649_v13, %v648_v40  ;;  %v653_v24 = vmul.f32 %v1857_v41, %v1551_v10  ;;  %v655_v0 = vmul.f32 %v1945_v19, %v1837_v4 }
  0xc2   :  { %v621_v2 = vmul.f32 %v620_v63, %v614_v23  ;;  %v623_v35 = vmul.f32 %v622_v38, %v617_v32  ;;  %v626_v42 = vmul.f32 %v620_v63, %v617_v32  ;;  %v627_v43 = vmul.f32 %v622_v38, %v614_v23 }
  0xc3   :  { %v639_v44 = vmul.f32 %v638_v52, %v632_v22  ;;  %v641_v5 = vmul.f32 %v640_v33, %v635_v28  ;;  %v644_v48 = vmul.f32 %v638_v52, %v635_v28  ;;  %v645_v49 = vmul.f32 %v640_v33, %v632_v22  ;;  %v1992_v52 = vld [vmem:[#allocation11 + $0x48] sm:$0xff] }
  0xc4   :  { %v624_v50 = vsub.f32 %v621_v2, %v623_v35  ;;  %v628_v51 = vadd.f32 %v627_v43, %v626_v42  ;;  %v652_v10 = vadd.f32 %v651_v15, %v650_v36  ;;  %v656_v4 = vmul.f32 %v1953_v46, %v1841_v34 }
  0xc5   :  { %v642_v57 = vsub.f32 %v639_v44, %v641_v5  ;;  %v646_v1 = vadd.f32 %v645_v49, %v644_v48  ;;  %v658_v63 = vmul.f32 %v1957_v59, %v1851_v39  ;;  %v660_v60 = vmul.f32 %v1961_v7, %v1857_v41 }
  0xc6   :  { %v1969_v6 = vadd.f32 %v624_v50, %v575_v53  ;;  %v1971_v34 = vadd.f32 %v628_v51, %v579_v3  ;;  %v654_v8 = vadd.f32 %v653_v24, %v652_v10  ;;  %v657_v16 = vsub.f32 %v655_v0, %v656_v4  ;;  %v2032_v50 = vld [vmem:[#allocation9 + $0x80] sm:$0xff]  ;;  %v2034_v51 = vld [vmem:[#allocation11 + $0x80] sm:$0xff] }
  0xc7   :  { %v1973_v58 = vadd.f32 %v642_v57, %v593_v21  ;;  %v1975_v39 = vadd.f32 %v646_v1, %v597_v30  ;;  %v670_v45 = vstv %s1937_s11  ;;  %v672_v47 = vstv %s1939_s12  ;;  %s2265_s11 = sld [smem:[#allocation7 + $0x90]]  ;;  %s2281_s12 = sld [smem:[#allocation2 + $0x11]] }
  0xc8   :  { %v659_v41 = vadd.f32 %v658_v63, %v657_v16  ;;  %v662_v12 = vmul.f32 %v1983_v9, %v654_v8  ;;  %v665_v54 = vmul.f32 %v1986_v11, %v654_v8  ;;  %v680_v38 = vmul.f32 %v1989_v20, %v654_v8 }
  0xc9   :  { %v683_v53 = vmul.f32 %v1992_v52, %v654_v8  ;;  %v688_v3 = vstv %s1949_s13  ;;  %v690_v17 = vstv %s1951_s14  ;;  %v698_v55 = vmul.f32 %v1953_v46, %v1835_v56  ;;  %s2287_s13 = sld [smem:[#allocation7 + $0x11]] }
  0xca   :  { %v661_v21 = vsub.f32 %v659_v41, %v660_v60  ;;  %v699_v30 = vmul.f32 %v1945_v19, %v1839_v61  ;;  %v701_v29 = vmul.f32 %v1961_v7, %v1849_v37  ;;  %v703_v18 = vmul.f32 %v1957_v59, %v1867_v31  ;;  %s2298_s14 = sld [smem:[#allocation2 + $0x91]] }
  0xcb   :  { %v2007_v14 = vmul.f32 %v1953_v46, %v1839_v61  ;;  %v2011_v25 = vmul.f32 %v1945_v19, %v1835_v56  ;;  %v2015_v26 = vmul.f32 %v1961_v7, %v1867_v31  ;;  %v2019_v62 = vmul.f32 %v1957_v59, %v1849_v37 }
  0xcc   :  { %v663_v27 = vmul.f32 %v1986_v11, %v661_v21  ;;  %v666_v33 = vmul.f32 %v1983_v9, %v661_v21  ;;  %v681_v40 = vmul.f32 %v1992_v52, %v661_v21  ;;  %v684_v13 = vmul.f32 %v1989_v20, %v661_v21 }
  0xcd   :  { %v700_v23 = vadd.f32 %v699_v30, %v698_v55  ;;  %v707_v32 = vsub.f32 %v2007_v14, %v2011_v25  ;;  %v720_v22 = vstv %s1965_s15  ;;  %v722_v15 = vstv %s1967_s16  ;;  %s2300_s15 = sld [smem:[#allocation7 + $0x91]]  ;;  %s2315_s16 = sld [smem:[#allocation2 + $0x12]] }
  0xce   :  { %v664_v28 = vsub.f32 %v662_v12, %v663_v27  ;;  %v667_v36 = vadd.f32 %v666_v33, %v665_v54  ;;  %v682_v24 = vsub.f32 %v680_v38, %v681_v40  ;;  %v685_v0 = vadd.f32 %v684_v13, %v683_v53  ;;  %v2065_v13 = vld [vmem:[#allocation11 + $0x88] sm:$0xff] }
  0xcf   :  { %v702_v2 = vadd.f32 %v701_v29, %v700_v23  ;;  %v709_v35 = vadd.f32 %v2015_v26, %v707_v32  ;;  %v738_v42 = vstv %s1979_s17  ;;  %v740_v43 = vstv %s1981_s18  ;;  %s2319_s17 = sld [smem:[#allocation7 + $0x12]] }
  0xd0   :  { %v671_v44 = vmul.f32 %v670_v45, %v664_v28  ;;  %v673_v5 = vmul.f32 %v672_v47, %v667_v36  ;;  %v676_v48 = vmul.f32 %v670_v45, %v667_v36  ;;  %v677_v49 = vmul.f32 %v672_v47, %v664_v28  ;;  %s2321_s18 = sld [smem:[#allocation2 + $0x92]] }
  0xd1   :  { %v689_v10 = vmul.f32 %v688_v3, %v682_v24  ;;  %v691_v4 = vmul.f32 %v690_v17, %v685_v0  ;;  %v694_v57 = vmul.f32 %v688_v3, %v685_v0  ;;  %v695_v1 = vmul.f32 %v690_v17, %v682_v24  ;;  %v2048_v17 = vld [vmem:[#allocation9 + $0x88] sm:$0xff] }
  0xd2   :  { %v674_v63 = vsub.f32 %v671_v44, %v673_v5  ;;  %v678_v60 = vadd.f32 %v677_v49, %v676_v48  ;;  %v2036_v8 = vadd.f32 %v703_v18, %v702_v2  ;;  %v711_v16 = vsub.f32 %v709_v35, %v2019_v62 }
  0xd3   :  { %v692_v41 = vsub.f32 %v689_v10, %v691_v4  ;;  %v696_v12 = vadd.f32 %v695_v1, %v694_v57  ;;  %v750_v45 = vmul.f32 %v2032_v50, %v1835_v56  ;;  %v753_v47 = vmul.f32 %v2034_v51, %v1839_v61 }
  0xd4   :  { %v675_v54 = vadd.f32 %v674_v63, %v1969_v6  ;;  %v679_v38 = vadd.f32 %v678_v60, %v1971_v34  ;;  %v712_v53 = vmul.f32 %v1983_v9, %v2036_v8  ;;  %v713_v3 = vmul.f32 %v1986_v11, %v711_v16 }
  0xd5   :  { %v693_v55 = vadd.f32 %v692_v41, %v1973_v58  ;;  %v697_v21 = vadd.f32 %v696_v12, %v1975_v39  ;;  %v715_v30 = vmul.f32 %v1986_v11, %v2036_v8  ;;  %v716_v29 = vmul.f32 %v1983_v9, %v711_v16 }
  0xd6   :  { %v714_v18 = vsub.f32 %v712_v53, %v713_v3  ;;  %v730_v6 = vmul.f32 %v1989_v20, %v2036_v8  ;;  %v731_v34 = vmul.f32 %v1992_v52, %v711_v16  ;;  %v733_v27 = vmul.f32 %v1992_v52, %v2036_v8 }
  0xd7   :  { %v717_v33 = vadd.f32 %v716_v29, %v715_v30  ;;  %v734_v58 = vmul.f32 %v1989_v20, %v711_v16  ;;  %v754_v39 = vadd.f32 %v753_v47, %v750_v45  ;;  %v757_v40 = vmul.f32 %v2048_v17, %v1849_v37  ;;  %v2103_v45 = vld [vmem:[#allocation9 + $0x90] sm:$0xff]  ;;  %v2107_v47 = vld [vmem:[#allocation9 + $0x98] sm:$0xff] }
  0xd8   :  { %v721_v23 = vmul.f32 %v720_v22, %v714_v18  ;;  %v727_v32 = vmul.f32 %v722_v15, %v714_v18  ;;  %v732_v28 = vsub.f32 %v730_v6, %v731_v34  ;;  %v761_v36 = vmul.f32 %v2065_v13, %v1867_v31  ;;  %v2117_v34 = vld [vmem:[#allocation11 + $0x98] sm:$0xff] }
  0xd9   :  { %v723_v24 = vmul.f32 %v722_v15, %v717_v33  ;;  %v726_v0 = vmul.f32 %v720_v22, %v717_v33  ;;  %v735_v2 = vadd.f32 %v734_v58, %v733_v27  ;;  %v758_v35 = vadd.f32 %v757_v40, %v754_v39 }
  0xda   :  { %v739_v44 = vmul.f32 %v738_v42, %v732_v28  ;;  %v745_v5 = vmul.f32 %v740_v43, %v732_v28  ;;  %v2077_v48 = vmul.f32 %v2034_v51, %v1835_v56  ;;  %v2081_v49 = vmul.f32 %v2032_v50, %v1839_v61 }
  0xdb   :  { %v724_v10 = vsub.f32 %v721_v23, %v723_v24  ;;  %v728_v4 = vadd.f32 %v727_v32, %v726_v0  ;;  %v741_v57 = vmul.f32 %v740_v43, %v735_v2  ;;  %v744_v1 = vmul.f32 %v738_v42, %v735_v2 }
  0xdc   :  { %v2083_v63 = vadd.f32 %v761_v36, %v758_v35  ;;  %v765_v22 = vsub.f32 %v2077_v48, %v2081_v49  ;;  %v2089_v15 = vmul.f32 %v2065_v13, %v1849_v37  ;;  %v2093_v56 = vmul.f32 %v2048_v17, %v1867_v31  ;;  %v2105_v31 = vld [vmem:[#allocation11 + $0x90] sm:$0xff] }
  0xdd   :  { %v725_v61 = vadd.f32 %v724_v10, %v675_v54  ;;  %v729_v60 = vadd.f32 %v728_v4, %v679_v38  ;;  %v742_v16 = vsub.f32 %v739_v44, %v741_v57  ;;  %v746_v43 = vadd.f32 %v745_v5, %v744_v1 }
  0xde   :  { %v767_v42 = vadd.f32 %v2089_v15, %v765_v22  ;;  %v770_v41 = vmul.f32 %v1983_v9, %v2083_v63  ;;  %v773_v37 = vmul.f32 %v1986_v11, %v2083_v63  ;;  %v778_v12 = vstv %s2060_s19  ;;  %s2328_s19 = sld [smem:[#allocation7 + $0x92]] }
  0xdf   :  { %v743_v54 = vadd.f32 %v742_v16, %v693_v55  ;;  %v747_v38 = vadd.f32 %v746_v43, %v697_v21  ;;  %v780_v53 = vstv %s2067_s20  ;;  %v788_v3 = vmul.f32 %v1989_v20, %v2083_v63  ;;  %s2354_s20 = sld [smem:[#allocation2 + $0x13]] }
  0xe0   :  { %v769_v30 = vsub.f32 %v767_v42, %v2093_v56  ;;  %v791_v29 = vmul.f32 %v1992_v52, %v2083_v63  ;;  %v796_v18 = vstv %s2071_s3  ;;  %v798_v6 = vstv %s2073_s21  ;;  %s2356_s3 = sld [smem:[#allocation7 + $0x13]] }
  0xe1   :  { %v808_v27 = vmul.f32 %v2103_v45, %v2032_v50  ;;  %v811_v55 = vmul.f32 %v2105_v31, %v2034_v51  ;;  %v815_v21 = vmul.f32 %v2107_v47, %v2048_v17  ;;  %v819_v33 = vmul.f32 %v2117_v34, %v2065_v13  ;;  %s2358_s21 = sld [smem:[#allocation2 + $0x93]] }
  0xe2   :  { %v771_v58 = vmul.f32 %v1986_v11, %v769_v30  ;;  %v774_v39 = vmul.f32 %v1983_v9, %v769_v30  ;;  %v789_v40 = vmul.f32 %v1992_v52, %v769_v30  ;;  %v792_v23 = vmul.f32 %v1989_v20, %v769_v30 }
  0xe3   :  { %v812_v32 = vadd.f32 %v811_v55, %v808_v27  ;;  %v2137_v28 = vmul.f32 %v2105_v31, %v2032_v50  ;;  %v2141_v36 = vmul.f32 %v2103_v45, %v2034_v51  ;;  %v2145_v24 = vmul.f32 %v2117_v34, %v2048_v17 }
  0xe4   :  { %v772_v0 = vsub.f32 %v770_v41, %v771_v58  ;;  %v775_v2 = vadd.f32 %v774_v39, %v773_v37  ;;  %v790_v35 = vsub.f32 %v788_v3, %v789_v40  ;;  %v793_v44 = vadd.f32 %v792_v23, %v791_v29 }
  0xe5   :  { %v816_v5 = vadd.f32 %v815_v21, %v812_v32  ;;  %v823_v10 = vsub.f32 %v2137_v28, %v2141_v36  ;;  %v2151_v50 = vmul.f32 %v2107_v47, %v2065_v13  ;;  %v836_v4 = vstv %s2095_s2  ;;  %v872_v32 = vld [vmem:[#allocation9 + $0xa8] sm:$0xff]  ;;  %s2360_s2 = sld [smem:[#allocation7 + $0x93]] }
  0xe6   :  { %v779_v51 = vmul.f32 %v778_v12, %v772_v0  ;;  %v781_v17 = vmul.f32 %v780_v53, %v775_v2  ;;  %v784_v57 = vmul.f32 %v778_v12, %v775_v2  ;;  %v785_v1 = vmul.f32 %v780_v53, %v772_v0 }
  0xe7   :  { %v797_v22 = vmul.f32 %v796_v18, %v790_v35  ;;  %v799_v16 = vmul.f32 %v798_v6, %v793_v44  ;;  %v802_v43 = vmul.f32 %v796_v18, %v793_v44  ;;  %v803_v42 = vmul.f32 %v798_v6, %v790_v35  ;;  %v865_v18 = vld [vmem:[#allocation9 + $0xa0] sm:$0xff]  ;;  %v868_v6 = vld [vmem:[#allocation11 + $0xa0] sm:$0xff] }
  0xe8   :  { %v782_v41 = vsub.f32 %v779_v51, %v781_v17  ;;  %v786_v37 = vadd.f32 %v785_v1, %v784_v57  ;;  %v2156_v3 = vadd.f32 %v819_v33, %v816_v5  ;;  %v825_v13 = vadd.f32 %v2145_v24, %v823_v10  ;;  %v876_v57 = vld [vmem:[#allocation11 + $0xa8] sm:$0xff] }
  0xe9   :  { %v800_v30 = vsub.f32 %v797_v22, %v799_v16  ;;  %v804_v29 = vadd.f32 %v803_v42, %v802_v43  ;;  %v838_v27 = vstv %s2127_s22  ;;  %v854_v55 = vstv %s2129_s23  ;;  %s1433_s22 = smov [#allocation12]  }
  0xea   :  { %v783_v21 = vadd.f32 %v782_v41, %v725_v61  ;;  %v787_v58 = vadd.f32 %v786_v37, %v729_v60  ;;  %v827_v12 = vsub.f32 %v825_v13, %v2151_v50  ;;  %v828_v53 = vmul.f32 %v1983_v9, %v2156_v3  ;;  %s1151_s23 = sshll.u32 %s1433_s22, 4  ;;  %s1152_s23 = int_to_ptr.vmem [resolvable:$true] %s1151_s23 }
  0xeb   :  { %v801_v39 = vadd.f32 %v800_v30, %v743_v54  ;;  %v805_v40 = vadd.f32 %v804_v29, %v747_v38  ;;  %v831_v33 = vmul.f32 %v1986_v11, %v2156_v3  ;;  %v846_v23 = vmul.f32 %v1989_v20, %v2156_v3  ;;  %p1375_p5 = scmp.lt.s32.totalorder %s1152_s23, %s1152_s23 }
  0xec   :  { %v829_v61 = vmul.f32 %v1986_v11, %v827_v12  ;;  %v832_v60 = vmul.f32 %v1983_v9, %v827_v12  ;;  %v847_v0 = vmul.f32 %v1992_v52, %v827_v12  ;;  %v849_v2 = vmul.f32 %v1992_v52, %v2156_v3 }
  0xed   :  { %v850_v35 = vmul.f32 %v1989_v20, %v827_v12  ;;  %v856_v54 = vstv %s2154_s4  ;;  %v866_v38 = vmul.f32 %v865_v18, %v2103_v45  ;;  %v869_v44 = vmul.f32 %v868_v6, %v2105_v31  ;;  %s1434_s4 = smov [#allocation13]  }
  0xee   :  { %v830_v5 = vsub.f32 %v828_v53, %v829_v61  ;;  %v833_v10 = vadd.f32 %v832_v60, %v831_v33  ;;  %v848_v51 = vsub.f32 %v846_v23, %v847_v0  ;;  %v873_v17 = vmul.f32 %v872_v32, %v2107_v47 }
  0xef   :  { %v851_v1 = vadd.f32 %v850_v35, %v849_v2  ;;  %v870_v22 = vadd.f32 %v869_v44, %v866_v38  ;;  %v877_v16 = vmul.f32 %v876_v57, %v2117_v34  ;;  %v2184_v43 = vmul.f32 %v868_v6, %v2103_v45 }
  0xf0   :  { %v837_v42 = vmul.f32 %v836_v4, %v830_v5  ;;  %v839_v41 = vmul.f32 %v838_v27, %v833_v10  ;;  %v842_v37 = vmul.f32 %v836_v4, %v833_v10  ;;  %v843_v13 = vmul.f32 %v838_v27, %v830_v5 }
  0xf1   :  { %v855_v30 = vmul.f32 %v854_v55, %v848_v51  ;;  %v857_v29 = vmul.f32 %v856_v54, %v851_v1  ;;  %v860_v12 = vmul.f32 %v854_v55, %v851_v1  ;;  %v861_v53 = vmul.f32 %v856_v54, %v848_v51 }
  0xf2   :  { %v840_v33 = vsub.f32 %v837_v42, %v839_v41  ;;  %v844_v23 = vadd.f32 %v843_v13, %v842_v37  ;;  %v874_v6 = vadd.f32 %v873_v17, %v870_v22  ;;  %v2195_v4 = vmul.f32 %v865_v18, %v2105_v31 }
  0xf3   :  { %v858_v27 = vsub.f32 %v855_v30, %v857_v29  ;;  %v862_v61 = vadd.f32 %v861_v53, %v860_v12  ;;  %v2198_v60 = vmul.f32 %v876_v57, %v2107_v47  ;;  %v2207_v2 = vmul.f32 %v872_v32, %v2117_v34 }
  0xf4   :  { %v2202_v55 = vadd.f32 %v877_v16, %v874_v6  ;;  %v881_v0 = vsub.f32 %v2184_v43, %v2195_v4  ;;  %v2209_v35 = vadd.f32 %v840_v33, %v783_v21  ;;  %v2211_v18 = vadd.f32 %v844_v23, %v787_v58 }
  0xf5   :  { %v2213_v54 = vadd.f32 %v858_v27, %v801_v39  ;;  %v2215_v38 = vadd.f32 %v862_v61, %v805_v40  ;;  %v894_v10 = vstv %s2178_s24  ;;  %v896_v51 = vstv %s2180_s25  ;;  %s1163_s24 = sshll.u32 %s1434_s4, 4  ;;  %s1370_s25 = scalar_lea.vmem %s1152_s23, 256  ;;  %s2368_s24 = int_to_ptr.vmem [resolvable:$true] %s1163_s24 }
  0xf6   :  { %v883_v44 = vadd.f32 %v2198_v60, %v881_v0  ;;  %v886_v5 = vmul.f32 %v1983_v9, %v2202_v55  ;;  %v889_v32 = vmul.f32 %v1986_v11, %v2202_v55  ;;  %v904_v21 = vmul.f32 %v1989_v20, %v2202_v55  ;;  %p1371_p4 = scmp.ne.s32.totalorder %s1152_s23, %s1370_s25  ;;  %p1376_p6 = scmp.lt.s32.totalorder %s1370_s25, %s1370_s25 }
  0xf7   :  { %v907_v58 = vmul.f32 %v1992_v52, %v2202_v55  ;;  %v922_v39 = vsub.f32 %v2011_v25, %v2007_v14  ;;  %v912_v17 = vstv %s2186_s26  ;;  %v914_v57 = vstv %s2188_s27 }
  0xf8   :  { %v885_v40 = vsub.f32 %v883_v44, %v2207_v2  ;;  %v925_v1 = vmul.f32 %v1953_v46, %v2036_v8  ;;  %v928_v16 = vmul.f32 %v1945_v19, %v2036_v8  ;;  %v933_v42 = vstv %s2190_s28  ;;  %p1377_p7 = por %p1376_p6, %p1375_p5 }
  0xf9   :  { %v923_v22 = vadd.f32 %v922_v39, %v2019_v62  ;;  %v935_v41 = vstv %s2192_s0  ;;  %v943_v29 = vmul.f32 %v1961_v7, %v2036_v8  ;;  %v946_v62 = vmul.f32 %v1957_v59, %v2036_v8 }
  0xfa   :  { %v887_v37 = vmul.f32 %v1986_v11, %v885_v40  ;;  %v890_v14 = vmul.f32 %v1983_v9, %v885_v40  ;;  %v905_v25 = vmul.f32 %v1992_v52, %v885_v40  ;;  %v908_v13 = vmul.f32 %v1989_v20, %v885_v40  ;;  %p1378_p8 = pnand %p1377_p7, %p1371_p4 }
  0xfb   :  { %v924_v30 = vsub.f32 %v923_v22, %v2015_v26  ;;  %v951_v12 = vstv %s2200_s29  ;;  %v953_v40 = vstv %s2235_s30 }
  0xfc   :  { %v888_v53 = vsub.f32 %v886_v5, %v887_v37  ;;  %v891_v33 = vadd.f32 %v890_v14, %v889_v32  ;;  %v906_v23 = vsub.f32 %v904_v21, %v905_v25  ;;  %v909_v6 = vadd.f32 %v908_v13, %v907_v58 }
  0xfd   :  { %v926_v9 = vmul.f32 %v1945_v19, %v924_v30  ;;  %v929_v11 = vmul.f32 %v1953_v46, %v924_v30  ;;  %v944_v20 = vmul.f32 %v1957_v59, %v924_v30  ;;  %v947_v52 = vmul.f32 %v1961_v7, %v924_v30 }
  0xfe   :  { %v895_v26 = vmul.f32 %v894_v10, %v888_v53  ;;  %v897_v27 = vmul.f32 %v896_v51, %v891_v33  ;;  %v900_v61 = vmul.f32 %v894_v10, %v891_v33  ;;  %v901_v0 = vmul.f32 %v896_v51, %v888_v53 }
  0xff   :  { %v913_v44 = vmul.f32 %v912_v17, %v906_v23  ;;  %v915_v8 = vmul.f32 %v914_v57, %v909_v6  ;;  %v918_v39 = vmul.f32 %v912_v17, %v909_v6  ;;  %v919_v5 = vmul.f32 %v914_v57, %v906_v23 }
 0x100   :  { %v898_v32 = vsub.f32 %v895_v26, %v897_v27  ;;  %v927_v21 = vsub.f32 %v925_v1, %v926_v9  ;;  %v930_v58 = vadd.f32 %v929_v11, %v928_v16  ;;  %v902_v22 = vadd.f32 %v901_v0, %v900_v61 }
 0x101   :  { %v945_v37 = vsub.f32 %v943_v29, %v944_v20  ;;  %v948_v14 = vadd.f32 %v947_v52, %v946_v62  ;;  %v961_v25 = vsub.f32 %v2081_v49, %v2077_v48  ;;  %v916_v13 = vsub.f32 %v913_v44, %v915_v8 }
 0x102   :  { %v920_v30 = vadd.f32 %v919_v5, %v918_v39  ;;  %v934_v10 = vmul.f32 %v933_v42, %v927_v21  ;;  %v936_v51 = vmul.f32 %v935_v41, %v930_v58  ;;  %v939_v17 = vmul.f32 %v933_v42, %v930_v58 }
 0x103   :  { %v940_v57 = vmul.f32 %v935_v41, %v927_v21  ;;  %v899_v1 = vadd.f32 %v898_v32, %v2209_v35  ;;  %v952_v29 = vmul.f32 %v951_v12, %v945_v37  ;;  %v954_v62 = vmul.f32 %v953_v40, %v948_v14 }
 0x104   :  { %v937_v16 = vsub.f32 %v934_v10, %v936_v51  ;;  %v903_v48 = vadd.f32 %v902_v22, %v2211_v18  ;;  %v962_v49 = vadd.f32 %v961_v25, %v2093_v56  ;;  %v917_v53 = vadd.f32 %v916_v13, %v2213_v54 }
 0x105   :  { %v921_v33 = vadd.f32 %v920_v30, %v2215_v38  ;;  %v941_v23 = vadd.f32 %v940_v57, %v939_v17  ;;  %v957_v42 = vmul.f32 %v951_v12, %v948_v14  ;;  %v958_v41 = vmul.f32 %v953_v40, %v945_v37 }
 0x106   :  { %v963_v6 = vsub.f32 %v962_v49, %v2089_v15  ;;  %v964_v35 = vmul.f32 %v1953_v46, %v2083_v63  ;;  %v967_v18 = vmul.f32 %v1945_v19, %v2083_v63  ;;  %v938_v9 = vadd.f32 %v937_v16, %v899_v1 }
 0x107   :  { %v955_v56 = vsub.f32 %v952_v29, %v954_v62  ;;  %v982_v54 = vmul.f32 %v1961_v7, %v2083_v63  ;;  %v985_v38 = vmul.f32 %v1957_v59, %v2083_v63  ;;  %v972_v11 = vstv %s2259_s1 }
 0x108   :  { %v965_v12 = vmul.f32 %v1945_v19, %v963_v6  ;;  %v968_v15 = vmul.f32 %v1953_v46, %v963_v6  ;;  %v983_v20 = vmul.f32 %v1957_v59, %v963_v6  ;;  %v974_v52 = vstv %s2261_s9 }
 0x109   :  { %v986_v26 = vmul.f32 %v1961_v7, %v963_v6  ;;  %v990_v27 = vstv %s2263_s10  ;;  %v1000_v61 = vsub.f32 %v2141_v36, %v2137_v28  ;;  %v992_v8 = vstv %s2265_s11 }
 0x10a   :  { %v966_v0 = vsub.f32 %v964_v35, %v965_v12  ;;  %v969_v63 = vadd.f32 %v968_v15, %v967_v18  ;;  %v984_v44 = vsub.f32 %v982_v54, %v983_v20  ;;  %v942_v39 = vadd.f32 %v941_v23, %v903_v48 }
 0x10b   :  { %v959_v5 = vadd.f32 %v958_v41, %v957_v42  ;;  %v987_v32 = vadd.f32 %v986_v26, %v985_v38  ;;  %v1001_v21 = vadd.f32 %v1000_v61, %v2151_v50  ;;  %v956_v58 = vadd.f32 %v955_v56, %v917_v53 }
 0x10c   :  { %v973_v40 = vmul.f32 %v972_v11, %v966_v0  ;;  %v975_v22 = vmul.f32 %v974_v52, %v969_v63  ;;  %v1003_v37 = vmul.f32 %v1953_v46, %v2156_v3  ;;  %v978_v28 = vmul.f32 %v972_v11, %v969_v63 }
 0x10d   :  { %v979_v36 = vmul.f32 %v974_v52, %v966_v0  ;;  %v991_v14 = vmul.f32 %v990_v27, %v984_v44  ;;  %v993_v25 = vmul.f32 %v992_v8, %v987_v32  ;;  %v996_v13 = vmul.f32 %v990_v27, %v987_v32 }
 0x10e   :  { %v997_v30 = vmul.f32 %v992_v8, %v984_v44  ;;  %v1002_v50 = vsub.f32 %v1001_v21, %v2145_v24  ;;  %v1006_v10 = vmul.f32 %v1945_v19, %v2156_v3  ;;  %v960_v51 = vadd.f32 %v959_v5, %v921_v33 }
 0x10f   :  { %v1011_v17 = vstv %s2281_s12  ;;  %v1021_v57 = vmul.f32 %v1961_v7, %v2156_v3  ;;  %v1024_v1 = vmul.f32 %v1957_v59, %v2156_v3  ;;  %v976_v16 = vsub.f32 %v973_v40, %v975_v22 }
 0x110   :  { %v1004_v29 = vmul.f32 %v1945_v19, %v1002_v50  ;;  %v1007_v62 = vmul.f32 %v1953_v46, %v1002_v50  ;;  %v1013_v48 = vstv %s2287_s13  ;;  %v980_v24 = vadd.f32 %v979_v36, %v978_v28  ;;  %v1277_v28 = vld [vmem:[#allocation9 + $0x70] sm:$0xff] }
 0x111   :  { %v994_v49 = vsub.f32 %v991_v14, %v993_v25  ;;  %v1022_v53 = vmul.f32 %v1957_v59, %v1002_v50  ;;  %v1025_v33 = vmul.f32 %v1961_v7, %v1002_v50  ;;  %v998_v23 = vadd.f32 %v997_v30, %v996_v13  ;;  %v1278_v14 = vld [vmem:[#allocation11 + $0x70] sm:$0xff]  ;;  %v1279_v50 = vld [vmem:[#allocation9 + $0x78] sm:$0xff] }
 0x112   :  { %v1005_v42 = vsub.f32 %v1003_v37, %v1004_v29  ;;  %v1008_v41 = vadd.f32 %v1007_v62, %v1006_v10  ;;  %v1039_v3 = vsub.f32 %v2195_v4, %v2184_v43  ;;  %v2323_v18 = vadd.f32 %v976_v16, %v938_v9 }
 0x113   :  { %v1023_v6 = vsub.f32 %v1021_v57, %v1022_v53  ;;  %v1026_v35 = vadd.f32 %v1025_v33, %v1024_v1  ;;  %v1029_v56 = vstv %s2298_s14  ;;  %v1031_v54 = vstv %s2300_s15  ;;  %v1280_v57 = vld [vmem:[#allocation11 + $0x78] sm:$0xff] }
 0x114   :  { %v1012_v38 = vmul.f32 %v1011_v17, %v1005_v42  ;;  %v1014_v12 = vmul.f32 %v1013_v48, %v1008_v41  ;;  %v1017_v15 = vmul.f32 %v1011_v17, %v1008_v41  ;;  %v1018_v11 = vmul.f32 %v1013_v48, %v1005_v42 }
 0x115   :  { %v981_v20 = vadd.f32 %v980_v24, %v942_v39  ;;  %v995_v52 = vadd.f32 %v994_v49, %v956_v58  ;;  %v999_v26 = vadd.f32 %v998_v23, %v960_v51  ;;  %v1040_v43 = vadd.f32 %v1039_v3, %v2207_v2 }
 0x116   :  { %v1030_v4 = vmul.f32 %v1029_v56, %v1023_v6  ;;  %v1032_v27 = vmul.f32 %v1031_v54, %v1026_v35  ;;  %v1042_v9 = vmul.f32 %v1953_v46, %v2202_v55  ;;  %v1045_v61 = vmul.f32 %v1945_v19, %v2202_v55 }
 0x117   :  { %v1035_v0 = vmul.f32 %v1029_v56, %v1026_v35  ;;  %v1036_v63 = vmul.f32 %v1031_v54, %v1023_v6  ;;  %v1041_v44 = vsub.f32 %v1040_v43, %v2198_v60  ;;  %v1060_v8 = vmul.f32 %v1961_v7, %v2202_v55 }
 0x118   :  { %v1015_v2 = vsub.f32 %v1012_v38, %v1014_v12  ;;  %v1019_v39 = vadd.f32 %v1018_v11, %v1017_v15  ;;  %v1050_v5 = vstv %s2315_s16  ;;  %v1063_v32 = vmul.f32 %v1957_v59, %v2202_v55 }
 0x119   :  { %v1043_v21 = vmul.f32 %v1945_v19, %v1041_v44  ;;  %v1046_v58 = vmul.f32 %v1953_v46, %v1041_v44  ;;  %v1061_v40 = vmul.f32 %v1957_v59, %v1041_v44  ;;  %v1064_v22 = vmul.f32 %v1961_v7, %v1041_v44 }
 0x11a   :  { %v1052_v37 = vstv %s2319_s17  ;;  %v1068_v60 = vstv %s2321_s18  ;;  %v1078_v36 = vmul.f32 %v1277_v28, %v2103_v45  ;;  %v1079_v25 = vmul.f32 %v1278_v14, %v2105_v31 }
 0x11b   :  { %v1044_v13 = vsub.f32 %v1042_v9, %v1043_v21  ;;  %v1047_v30 = vadd.f32 %v1046_v58, %v1045_v61  ;;  %v1062_v55 = vsub.f32 %v1060_v8, %v1061_v40  ;;  %v1081_v19 = vmul.f32 %v1279_v50, %v2107_v47 }
 0x11c   :  { %v1065_v46 = vadd.f32 %v1064_v22, %v1063_v32  ;;  %v1080_v10 = vadd.f32 %v1079_v25, %v1078_v36  ;;  %v1085_v59 = vmul.f32 %v1278_v14, %v2103_v45  ;;  %v1086_v7 = vmul.f32 %v1277_v28, %v2105_v31 }
 0x11d   :  { %v1033_v51 = vsub.f32 %v1030_v4, %v1032_v27  ;;  %v1070_v17 = vstv %s2328_s19  ;;  %v1083_v1 = vmul.f32 %v1280_v57, %v2117_v34  ;;  %v1088_v16 = vmul.f32 %v1280_v57, %v2107_v47 }
 0x11e   :  { %v1037_v29 = vadd.f32 %v1036_v63, %v1035_v0  ;;  %v1051_v62 = vmul.f32 %v1050_v5, %v1044_v13  ;;  %v1053_v48 = vmul.f32 %v1052_v37, %v1047_v30  ;;  %v1056_v24 = vmul.f32 %v1050_v5, %v1047_v30 }
 0x11f   :  { %v1057_v45 = vmul.f32 %v1052_v37, %v1044_v13  ;;  %v1069_v31 = vmul.f32 %v1068_v60, %v1062_v55  ;;  %v1082_v49 = vadd.f32 %v1081_v19, %v1080_v10  ;;  %v1087_v53 = vsub.f32 %v1085_v59, %v1086_v7 }
 0x120   :  { %v1071_v33 = vmul.f32 %v1070_v17, %v1065_v46  ;;  %v1074_v23 = vmul.f32 %v1068_v60, %v1065_v46  ;;  %v1075_v42 = vmul.f32 %v1070_v17, %v1062_v55  ;;  %v1090_v47 = vmul.f32 %v1279_v50, %v2117_v34  ;;  %v1128_v46 = vld [vmem:[#allocation8] sm:$0xff]  ;;  %v1132_v17 = vld [vmem:[#allocation11 + $0x50] sm:$0xff] }
 0x121   :  { %v1016_v41 = vadd.f32 %v1015_v2, %v2323_v18  ;;  %v1084_v3 = vadd.f32 %v1083_v1, %v1082_v49  ;;  %v1089_v6 = vadd.f32 %v1088_v16, %v1087_v53  ;;  %v1020_v35 = vadd.f32 %v1019_v39, %v981_v20  ;;  %v1136_v16 = vld [vmem:[#allocation9 + $0x58] sm:$0xff] }
 0x122   :  { %v1034_v56 = vadd.f32 %v1033_v51, %v995_v52  ;;  %v1038_v54 = vadd.f32 %v1037_v29, %v999_v26  ;;  %v1054_v38 = vsub.f32 %v1051_v62, %v1053_v48  ;;  %v1058_v4 = vadd.f32 %v1057_v45, %v1056_v24  ;;  %v1141_v29 = vld [vmem:[#allocation11 + $0x58] sm:$0xff]  ;;  %v1281_v24 = vld [vmem:[#allocation9 + $0x50] sm:$0xff] }
 0x123   :  { %v1091_v12 = vsub.f32 %v1089_v6, %v1090_v47  ;;  %v1092_v15 = vmul.f32 %v1277_v28, %v1084_v3  ;;  %v1095_v11 = vmul.f32 %v1278_v14, %v1084_v3  ;;  %v1110_v43 = vmul.f32 %v1279_v50, %v1084_v3 }
 0x124   :  { %v1072_v27 = vsub.f32 %v1069_v31, %v1071_v33  ;;  %v1076_v9 = vadd.f32 %v1075_v42, %v1074_v23  ;;  %v1113_v34 = vmul.f32 %v1280_v57, %v1084_v3  ;;  %v1100_v20 = vstv %s2354_s20 }
 0x125   :  { %v1093_v61 = vmul.f32 %v1278_v14, %v1091_v12  ;;  %v1096_v18 = vmul.f32 %v1277_v28, %v1091_v12  ;;  %v1111_v0 = vmul.f32 %v1280_v57, %v1091_v12  ;;  %v1114_v63 = vmul.f32 %v1279_v50, %v1091_v12 }
 0x126   :  { %v1102_v44 = vstv %s2356_s3  ;;  %v1118_v52 = vstv %s2358_s21  ;;  %v1120_v8 = vstv %s2360_s2  ;;  %v1055_v32 = vadd.f32 %v1054_v38, %v1016_v41 }
 0x127   :  { %v1094_v26 = vsub.f32 %v1092_v15, %v1093_v61  ;;  %v1097_v2 = vadd.f32 %v1096_v18, %v1095_v11  ;;  %v1112_v39 = vsub.f32 %v1110_v43, %v1111_v0  ;;  %v1115_v5 = vadd.f32 %v1114_v63, %v1113_v34 }
 0x128   :  { %v1059_v21 = vadd.f32 %v1058_v4, %v1020_v35  ;;  %v1073_v58 = vadd.f32 %v1072_v27, %v1034_v56  ;;  %v1077_v40 = vadd.f32 %v1076_v9, %v1038_v54 }
 0x129   :  { %v1101_v22 = vmul.f32 %v1100_v20, %v1094_v26  ;;  %v1103_v37 = vmul.f32 %v1102_v44, %v1097_v2  ;;  %v1106_v60 = vmul.f32 %v1100_v20, %v1097_v2  ;;  %v1107_v36 = vmul.f32 %v1102_v44, %v1094_v26 }
 0x12a   :  { %v1119_v14 = vmul.f32 %v1118_v52, %v1112_v39  ;;  %v1121_v28 = vmul.f32 %v1120_v8, %v1115_v5  ;;  %v1124_v25 = vmul.f32 %v1118_v52, %v1115_v5  ;;  %v1125_v13 = vmul.f32 %v1120_v8, %v1112_v39 }
 0x12b   :  { %v1104_v30 = vsub.f32 %v1101_v22, %v1103_v37  ;;  %v1108_v55 = vadd.f32 %v1107_v36, %v1106_v60 }
 0x12c   :  { %v1122_v50 = vsub.f32 %v1119_v14, %v1121_v28  ;;  %v1126_v19 = vadd.f32 %v1125_v13, %v1124_v25 }
 0x12d   :  { %v1105_v10 = vadd.f32 %v1104_v30, %v1055_v32  ;;  %v1109_v59 = vadd.f32 %v1108_v55, %v1059_v21 }
 0x12e   :  { %v1123_v7 = vadd.f32 %v1122_v50, %v1073_v58  ;;  %v1127_v51 = vadd.f32 %v1126_v19, %v1077_v40 }
 0x12f   :  { %v1129_v57 = vmul.f32 %v1128_v46, %v1105_v10  ;;  %v1133_v1 = vmul.f32 %v1128_v46, %v1109_v59 }
 0x130   :  { %v1137_v62 = vmul.f32 %v1128_v46, %v1123_v7  ;;  %v1142_v48 = vmul.f32 %v1128_v46, %v1127_v51 }
 0x131   :  { %v1130_v45 = vadd.f32 %v1281_v24, %v1129_v57  ;;  %v1134_v31 = vadd.f32 %v1133_v1, %v1132_v17 }
 0x132   :  { %v1138_v49 = vadd.f32 %v1137_v62, %v1136_v16  ;;  %v1143_v53 = vadd.f32 %v1142_v48, %v1141_v29 }
 0x133   :  { %1131 = vst [vmem:[#allocation12] sm:$0xff] %v1130_v45  ;;  %1135 = vst [vmem:[#allocation13] sm:$0xff] %v1134_v31 }
 0x134   :  { %1140 = vst [vmem:[#allocation12 + $0x8] sm:$0xff] %v1138_v49  ;;  %1145 = vst [vmem:[#allocation13 + $0x8] sm:$0xff] %v1143_v53 }
 0x135   :  { %1381 = shalt.err (!%p1378_p8)
}
 0x136   :  { %s1382_s28 = scalar_lea.hbm %s2410_s5, 256 }
 0x137   :  { %p1383_p9 = scmp.ne.s32.totalorder %s2410_s5, %s1382_s28  ;;  %p1386_p10 = scmp.lt.u32.totalorder %s1382_s28, %s2410_s5 }
 0x139   :  { %p1388_p11 = pnand %p1386_p10, %p1383_p9 }
 0x13b   :  { %1391 = shalt.err (!%p1388_p11)
}
 0x13c   :  { %1157 = dma.vmem_to_hbm [thread:$0]  %s1152_s23, 256, %s2410_s5, [#allocation4], %s1427_s7, %s1427_s7, %s1428_s8  }
 0x13d   :  { %s1392_s11 = scalar_lea.vmem %s2368_s24, 256  ;;  %p1397_p13 = scmp.lt.s32.totalorder %s2368_s24, %s2368_s24 }
 0x13e   :  { %p1393_p12 = scmp.ne.s32.totalorder %s2368_s24, %s1392_s11  ;;  %p1398_p0 = scmp.lt.s32.totalorder %s1392_s11, %s1392_s11 }
 0x140   :  { %p1399_p1 = por %p1398_p0, %p1397_p13 }
 0x142   :  { %p1400_p2 = pnand %p1399_p1, %p1393_p12 }
 0x144   :  { %1403 = shalt.err (!%p1400_p2)
}
 0x145   :  { %s1404_s14 = scalar_lea.hbm %s2411_s6, 256 }
 0x146   :  { %p1405_p3 = scmp.ne.s32.totalorder %s2411_s6, %s1404_s14  ;;  %p1408_p4 = scmp.lt.u32.totalorder %s1404_s14, %s2411_s6 }
 0x148   :  { %p1410_p5 = pnand %p1408_p4, %p1405_p3 }
 0x14a   :  { %1413 = shalt.err (!%p1410_p5)
}
 0x14b   :  { %1169 = dma.vmem_to_hbm [thread:$0]  %s2368_s24, 256, %s2411_s6, [#allocation14], %s1427_s7, %s1427_s7, %s1428_s8  }
 0x14c   :  { %1422 = dma.done.wait [#allocation4], 256  }
 0x14d   :  { %1423 = vsyncadd [#allocation4], 4294967040 }
 0x14e   :  { %1424 = dma.done.wait [#allocation14], 256  }
 0x14f   :  { %1425 = vsyncadd [#allocation14], 4294967040 }
 0x150   :  { %1176 = vsyncpa [#allocation3], 1 }
 0x151   :  { %1177 = vsyncpa [#allocation10], 1 }
 0x152   :  { %1178 = vsyncpa [#allocation4], 1 }
 0x153   :  { %1179 = vsyncpa [#allocation14], 1 }
 0x154   :  { %1180 = vsyncpa [#allocation5], 1 }
 0x155   :  { %1181 = vsyncpa [#allocation6], 1 }

</bundles_post_ra>
